<compile_context>
chip_gen: v7x
topology: tpu7x:2x2x1
jax: 0.10.0
libtpu: 0.0.40
codegen_flags: <defaults>
</compile_context>

<pallas_src>
import functools

import jax
import jax.numpy as jnp
from jax import lax
from jax.experimental import pallas as pl
from jax.experimental.pallas import tpu as pltpu


def _round_up(x, m):
    return (x + m - 1) // m * m


def _device_vmem_capacity():
    try:
        return int(pltpu.get_tpu_info().vmem_capacity_bytes)
    except Exception:
        return 64 * 1024 * 1024          # conservative fallback (v7x per-TC budget)


# ---------------------------------------------------------------------------
# Kernel: one grid step == Tc timesteps of the SkipLSTM recurrence for one
# batch block.  State (h, c, u) lives in VMEM scratch across the time axis.
# ---------------------------------------------------------------------------
def skip_lstm_seq_kernel(x_ref, h0_ref, c0_ref, u0_ref,
                         wx_ref, wh_ref, b_ref, w2_ref, b2_ref,
                         out_h_ref, out_c_ref, out_scal_ref,
                         h_scr, c_scr, u_scr, xw_scr,
                         *, tc, bb, hc_pad):
    tb = pl.program_id(1)

    @pl.when(tb == 0)
    def _():                                   # (re)load initial state per batch block
        h_scr[...] = h0_ref[...]
        c_scr[...] = c0_ref[...]
        u_scr[...] = u0_ref[...]

    # Hoisted input projection for this whole time block: one MXU GEMM with
    # M = tc*bb, kept entirely in VMEM (no f32 xw stream through HBM).
    # forget_bias is already folded into b_ref at param-prep time.
    ic_pad = x_ref.shape[-1]
    x_blk = x_ref[...].reshape(tc * bb, ic_pad)
    xw = jnp.dot(x_blk, wx_ref[...], preferred_element_type=jnp.float32) + b_ref[...]
    xw_scr[...] = xw.reshape(tc, bb, 4 * hc_pad)

    w2 = w2_ref[...]                            # [1, hc_pad]
    b2 = b2_ref[0, 0]
    lane = lax.broadcasted_iota(jnp.int32, (bb, 128), 1)   # hoisted out of the loop

    def step(t, carry):
        h, c, u = carry
        bu = jnp.round(u)                       # STE forward: round()

        # gates = (x@Wx + b)[t] (from scratch) + h@Wh (MXU, VMEM-resident Wh)
        gates = xw_scr[t] + jnp.dot(h.astype(wh_ref.dtype), wh_ref[...],
                                    preferred_element_type=jnp.float32)

        # hc_pad is a multiple of 128 -> every gate slice is lane aligned.
        forget_gate = jax.nn.sigmoid(gates[:, 0 * hc_pad:1 * hc_pad])   # bias folded
        input_gate = jax.nn.sigmoid(gates[:, 1 * hc_pad:2 * hc_pad])
        output_gate = jax.nn.sigmoid(gates[:, 2 * hc_pad:3 * hc_pad])
        modulation_gate = jnp.tanh(gates[:, 3 * hc_pad:4 * hc_pad])

        new_c = c * forget_gate + modulation_gate * input_gate
        new_h = output_gate * jnp.tanh(new_c)

        # skip / copy gating
        new_h = new_h * bu + (1.0 - bu) * h
        new_c = new_c * bu + (1.0 - bu) * c

        # delta_u = sigmoid(Linear(new_c)) : VPU multiply + XLU lane reduce
        delta_u = jax.nn.sigmoid(
            jnp.sum(new_c * w2, axis=-1, keepdims=True) + b2)
        new_u = delta_u * bu + jnp.clip(u + delta_u, 0.0, 1.0) * (1.0 - bu)

        out_h_ref[t] = new_h
        out_c_ref[t] = new_c
        # pack the three narrow per-step scalars into one lane-dense [bb,128] store
        out_scal_ref[t] = jnp.where(lane == 0, bu,
                          jnp.where(lane == 1, new_u,
                          jnp.where(lane == 2, delta_u, 0.0)))
        return new_h, new_c, new_u

    h, c, u = lax.fori_loop(0, tc, step,
                            (h_scr[...], c_scr[...], u_scr[...]),
                            unroll=True)
    # carry state to the next time block
    h_scr[...] = h
    c_scr[...] = c
    u_scr[...] = u


# ---------------------------------------------------------------------------
# Parameter repacking: lane-align each gate block, fold forget_bias into bias.
# ---------------------------------------------------------------------------
def _prepare_params(params, ic, hc, ic_pad, hc_pad, matmul_dtype, forget_bias=1.0):
    wx, wh, b, w2, b2 = params

    def pad_gate_cols(w):   # [..., 4*hc] -> [..., 4*hc_pad] with aligned gate blocks
        lead = w.shape[:-1]
        w4 = w.reshape(lead + (4, hc))
        w4 = jnp.pad(w4, [(0, 0)] * len(lead) + [(0, 0), (0, hc_pad - hc)])
        return w4.reshape(lead + (4 * hc_pad,))

    wx_p = jnp.pad(pad_gate_cols(wx), ((0, ic_pad - ic), (0, 0))).astype(matmul_dtype)
    wh_p = jnp.pad(pad_gate_cols(wh), ((0, hc_pad - hc), (0, 0))).astype(matmul_dtype)
    b_p = pad_gate_cols(b).astype(jnp.float32)
    b_p = b_p.at[:, :hc].add(forget_bias)       # fold forget_bias (real columns only)
    w2_row = jnp.pad(w2.T, ((0, 0), (0, hc_pad - hc))).astype(jnp.float32)   # [1, hc_pad]
    b2_s = b2.astype(jnp.float32).reshape(1, 1)
    return wx_p, wh_p, b_p, w2_row, b2_s


# ---------------------------------------------------------------------------
# Blocking heuristics.
# ---------------------------------------------------------------------------
def _pick_batch_block(B):
    b8 = _round_up(B, 8)                         # sublane padding for tiny batches
    if b8 >= 512:
        bb = 256                                 # fill 256-wide MXU M dim (v6e/v7x)
    elif b8 >= 16:
        bb = _round_up((b8 + 1) // 2, 8)         # >= 2 blocks -> both v7x TCs busy
    else:
        bb = b8
    nb = -(-b8 // bb)
    return bb, nb, bb * nb


def _pick_time_block(T, bb, ic_pad, hc_pad, x_itemsize, weight_bytes, budget,
                     tc_cap=16):
    per_t = bb * (2 * ic_pad * x_itemsize        # x block (double-buffered)
                  + 2 * 2 * hc_pad * 4           # out_h + out_c blocks (dbl-buffered)
                  + 2 * 128 * 4                  # packed-scalar block (dbl-buffered)
                  + 4 * hc_pad * 4)              # in-kernel xw scratch (single)
    state_bytes = bb * (2 * hc_pad + 128) * 4
    avail = budget - weight_bytes - state_bytes
    tc_max = int(max(1, min(tc_cap, avail // max(per_t, 1))))
    tc = 1
    for d in range(1, tc_max + 1):               # largest divisor of T <= tc_max
        if T % d == 0:
            tc = d
    return tc, per_t, state_bytes


# ---------------------------------------------------------------------------
# Wrapper: whole-sequence SkipLSTM.  Returns per-step outputs with a leading T.
# ---------------------------------------------------------------------------
def skip_lstm_sequence(x_seq, u0, h0, c0, params, *, matmul_dtype=jnp.bfloat16):
    T, B, ic = x_seq.shape
    hc = h0.shape[1]
    hc_pad = _round_up(hc, 128)
    ic_pad = _round_up(ic, 128)

    bb, nb, b_pad = _pick_batch_block(B)

    wx_p, wh_p, b_p, w2_row, b2 = _prepare_params(params, ic, hc, ic_pad, hc_pad,
                                                  matmul_dtype)

    x_p = jnp.pad(x_seq.astype(matmul_dtype),
                  ((0, 0), (0, b_pad - B), (0, ic_pad - ic)))
    h0_p = jnp.pad(h0.astype(jnp.float32), ((0, b_pad - B), (0, hc_pad - hc)))
    c0_p = jnp.pad(c0.astype(jnp.float32), ((0, b_pad - B), (0, hc_pad - hc)))
    u0_p = jnp.pad(u0.astype(jnp.float32), ((0, b_pad - B), (0, 0)))

    w_itemsize = jnp.dtype(matmul_dtype).itemsize
    weight_bytes = (2 * (ic_pad + hc_pad) * 4 * hc_pad * w_itemsize   # Wx, Wh (dbl-buf)
                    + 2 * (4 * hc_pad + hc_pad) * 4                   # bias, w2
                    + 2 * bb * (2 * hc_pad + 1) * 4)                  # h0 / c0 / u0

    vmem_cap = _device_vmem_capacity()
    tc, per_t, state_bytes = _pick_time_block(
        T, bb, ic_pad, hc_pad, w_itemsize, weight_bytes,
        budget=vmem_cap - 16 * 1024 * 1024)
    n_tb = T // tc

    vmem_est = weight_bytes + state_bytes + tc * per_t
    vmem_limit = int(min(vmem_cap - 4 * 1024 * 1024,
                         max(32 * 1024 * 1024, int(1.5 * vmem_est))))

    kernel = functools.partial(skip_lstm_seq_kernel, tc=tc, bb=bb, hc_pad=hc_pad)

    out_shape = (
        jax.ShapeDtypeStruct((T, b_pad, hc_pad), jnp.float32),   # new_h (lane padded)
        jax.ShapeDtypeStruct((T, b_pad, hc_pad), jnp.float32),   # new_c (lane padded)
        jax.ShapeDtypeStruct((T, b_pad, 128), jnp.float32),      # packed bu/new_u/delta_u
    )
    in_specs = [
        pl.BlockSpec((tc, bb, ic_pad), lambda b, t: (t, b, 0)),    # x  (streamed)
        pl.BlockSpec((bb, hc_pad), lambda b, t: (b, 0)),           # h0
        pl.BlockSpec((bb, hc_pad), lambda b, t: (b, 0)),           # c0
        pl.BlockSpec((bb, 1), lambda b, t: (b, 0)),                # u0
        pl.BlockSpec((ic_pad, 4 * hc_pad), lambda b, t: (0, 0)),   # Wx  (VMEM resident)
        pl.BlockSpec((hc_pad, 4 * hc_pad), lambda b, t: (0, 0)),   # Wh  (VMEM resident)
        pl.BlockSpec((1, 4 * hc_pad), lambda b, t: (0, 0)),        # bias (+forget_bias)
        pl.BlockSpec((1, hc_pad), lambda b, t: (0, 0)),            # w2 row (resident)
        pl.BlockSpec(memory_space=pltpu.MemorySpace.SMEM),         # b2 scalar
    ]
    out_specs = (
        pl.BlockSpec((tc, bb, hc_pad), lambda b, t: (t, b, 0)),
        pl.BlockSpec((tc, bb, hc_pad), lambda b, t: (t, b, 0)),
        pl.BlockSpec((tc, bb, 128), lambda b, t: (t, b, 0)),
    )
    scratch_shapes = [
        pltpu.VMEM((bb, hc_pad), jnp.float32),            # h state
        pltpu.VMEM((bb, hc_pad), jnp.float32),            # c state
        pltpu.VMEM((bb, 1), jnp.float32),                 # u state
        pltpu.VMEM((tc, bb, 4 * hc_pad), jnp.float32),    # per-block x @ Wx + b
    ]

    out_h, out_c, out_scal = pl.pallas_call(
        kernel,
        out_shape=out_shape,
        grid=(nb, n_tb),
        in_specs=in_specs,
        out_specs=out_specs,
        scratch_shapes=scratch_shapes,
        compiler_params=pltpu.CompilerParams(
            dimension_semantics=("parallel", "arbitrary"),
            vmem_limit_bytes=vmem_limit),
    )(x_p, h0_p, c0_p, u0_p, wx_p, wh_p, b_p, w2_row, b2)

    bu_seq = out_scal[:, :B, 0:1]
    nu_seq = out_scal[:, :B, 1:2]
    du_seq = out_scal[:, :B, 2:3]
    # NOTE: the [:B, :hc] depad is a no-op when B/hc are already aligned; consumers
    # that can handle padded outputs should take out_h/out_c directly.
    return bu_seq, nu_seq, (out_h[:, :B, :hc], out_c[:, :B, :hc]), du_seq


def skip_lstm_cell_no_skip(x, u, h, c, params, *, matmul_dtype=jnp.bfloat16):
    """Single-step forward matching the PyTorch module's signature / outputs."""
    bu, nu, (nh, nc), du = skip_lstm_sequence(x[None], u, h, c, params,
                                              matmul_dtype=matmul_dtype)
    return bu[0], nu[0], (nh[0], nc[0]), du[0]


# ---------------------------------------------------------------------------
# Deterministic init (mirrors the PyTorch module's __init__) and pure-JAX ref.
# ---------------------------------------------------------------------------
def init_params(key, ic, hc):
    k1, k2 = jax.random.split(key, 2)
    fan_in, fan_out = ic + hc, 4 * hc
    std = (2.0 / (fan_in + fan_out)) ** 0.5
    w_full = jax.random.normal(k1, (4 * hc, ic + hc), jnp.float32) * std
    w_t = w_full.T                      # [ic+hc, 4*hc]
    wx = w_t[:ic, :]                    # [ic, 4*hc]
    wh = w_t[ic:, :]                    # [hc, 4*hc]
    b = jnp.zeros((1, 4 * hc), jnp.float32)
    std2 = (2.0 / (hc + 1)) ** 0.5
    w2 = (jax.random.normal(k2, (1, hc), jnp.float32) * std2).T   # [hc, 1]
    b2 = jnp.ones((1, 1), jnp.float32)
    return wx, wh, b, w2, b2


def reference_forward(x, u, h, c, params, matmul_dtype=jnp.float32):
    """Pure-JAX reference mirroring the PyTorch forward exactly (single step)."""
    wx, wh, b, w2, b2 = params
    hc = h.shape[1]
    bu = jnp.round(u)
    gates = (jnp.dot(x.astype(matmul_dtype), wx.astype(matmul_dtype),
                     preferred_element_type=jnp.float32)
             + jnp.dot(h.astype(matmul_dtype), wh.astype(matmul_dtype),
                       preferred_element_type=jnp.float32)
             + b)
    f = jax.nn.sigmoid(gates[:, 0 * hc:1 * hc] + 1.0)
    i = jax.nn.sigmoid(gates[:, 1 * hc:2 * hc])
    o = jax.nn.sigmoid(gates[:, 2 * hc:3 * hc])
    g = jnp.tanh(gates[:, 3 * hc:4 * hc])
    new_c = c * f + g * i
    new_h = o * jnp.tanh(new_c)
    new_h = new_h * bu + (1 - bu) * h
    new_c = new_c * bu + (1 - bu) * c
    du = jax.nn.sigmoid(jnp.dot(new_c, w2, preferred_element_type=jnp.float32) + b2)
    new_u = du * bu + jnp.clip(u + du, 0.0, 1.0) * (1 - bu)
    return bu, new_u, (new_h, new_c), du


def reference_sequence(x_seq, u0, h0, c0, params, matmul_dtype=jnp.float32):
    u, h, c = u0, h0, c0
    bus, nus, nhs, ncs, dus = [], [], [], [], []
    for t in range(x_seq.shape[0]):
        bu, u, (h, c), du = reference_forward(x_seq[t], u, h, c, params, matmul_dtype)
        bus.append(bu); nus.append(u); nhs.append(h); ncs.append(c); dus.append(du)
    return (jnp.stack(bus), jnp.stack(nus),
            (jnp.stack(nhs), jnp.stack(ncs)), jnp.stack(dus))


# TODO(synk): STEFunction's straight-through backward (grad(round) := identity) is a
# training-time custom_vjp concern; this kernel implements the forward pass only.

if __name__ == "__main__":
    B, ic, hc, T = 2, 4, 32, 8
    key = jax.random.PRNGKey(0)
    kx, ku, kh, kc, kp = jax.random.split(key, 5)

    x_seq = jax.random.normal(kx, (T, B, ic), jnp.float32)
    u0 = jax.random.uniform(ku, (B, 1), jnp.float32)
    h0 = jax.random.normal(kh, (B, hc), jnp.float32)
    c0 = jax.random.normal(kc, (B, hc), jnp.float32)
    params = init_params(kp, ic, hc)

    def check(got, ref, name, atol, rtol):
        assert got.shape == ref.shape, f"{name}: shape {got.shape} vs {ref.shape}"
        assert jnp.allclose(got, ref, atol=atol, rtol=rtol), f"{name}: mismatch vs reference"

    # --- full-sequence kernel, f32 matmul operands (tight check) ---------------------
    bu, nu, (nh, nc), du = skip_lstm_sequence(x_seq, u0, h0, c0, params,
                                              matmul_dtype=jnp.float32)
    jax.block_until_ready((bu, nu, nh, nc, du))
    rbu, rnu, (rnh, rnc), rdu = reference_sequence(x_seq, u0, h0, c0, params,
                                                   matmul_dtype=jnp.float32)
    for g, r, n in ((bu, rbu, "bu"), (nu, rnu, "new_u"), (nh, rnh, "new_h"),
                    (nc, rnc, "new_c"), (du, rdu, "delta_u")):
        check(g, r, "f32 " + n, atol=1e-4, rtol=1e-4)

    # --- full-sequence kernel, bf16 matmul operands (default; MXU-native) ------------
    bu, nu, (nh, nc), du = skip_lstm_sequence(x_seq, u0, h0, c0, params)
    jax.block_until_ready((bu, nu, nh, nc, du))
    rbu, rnu, (rnh, rnc), rdu = reference_sequence(x_seq, u0, h0, c0, params,
                                                   matmul_dtype=jnp.bfloat16)
    for g, r, n in ((bu, rbu, "bu"), (nu, rnu, "new_u"), (nh, rnh, "new_h"),
                    (nc, rnc, "new_c"), (du, rdu, "delta_u")):
        check(g, r, "bf16 " + n, atol=5e-3, rtol=5e-3)

    # --- single-step API matching the PyTorch module signature -----------------------
    bu1, nu1, (nh1, nc1), du1 = skip_lstm_cell_no_skip(x_seq[0], u0, h0, c0, params,
                                                       matmul_dtype=jnp.float32)
    jax.block_until_ready((bu1, nu1, nh1, nc1, du1))
    rbu1, rnu1, (rnh1, rnc1), rdu1 = reference_forward(x_seq[0], u0, h0, c0, params)
    for g, r, n in ((bu1, rbu1, "bu"), (nu1, rnu1, "new_u"), (nh1, rnh1, "new_h"),
                    (nc1, rnc1, "new_c"), (du1, rdu1, "delta_u")):
        check(g, r, "step " + n, atol=2e-5, rtol=2e-5)

    print("KERNEL_OK")
</pallas_src>

<mosaic_0001>
module attributes {stable_mosaic.version = 11 : i64} {
  func.func @skip_lstm_seq_kernel(%arg0: i32, %arg1: i32, %arg2: memref<8x8x128xf32, #tpu.memory_space<vmem>>, %arg3: memref<8x128xf32, #tpu.memory_space<vmem>>, %arg4: memref<8x128xf32, #tpu.memory_space<vmem>>, %arg5: memref<8x1xf32, #tpu.memory_space<vmem>>, %arg6: memref<128x512xf32, #tpu.memory_space<vmem>>, %arg7: memref<128x512xf32, #tpu.memory_space<vmem>>, %arg8: memref<1x512xf32, #tpu.memory_space<vmem>>, %arg9: memref<1x128xf32, #tpu.memory_space<vmem>>, %arg10: memref<1x1xf32, #tpu.memory_space<smem>>, %arg11: memref<8x8x128xf32, #tpu.memory_space<vmem>>, %arg12: memref<8x8x128xf32, #tpu.memory_space<vmem>>, %arg13: memref<8x8x128xf32, #tpu.memory_space<vmem>>, %arg14: memref<8x128xf32, #tpu.memory_space<vmem>>, %arg15: memref<8x128xf32, #tpu.memory_space<vmem>>, %arg16: memref<8x1xf32, #tpu.memory_space<vmem>>, %arg17: memref<8x8x512xf32, #tpu.memory_space<vmem>>) attributes {dimension_semantics = [#tpu.dimension_semantics<parallel>, #tpu.dimension_semantics<arbitrary>], iteration_bounds = array<i64: 1, 1>, scalar_prefetch = 0 : i64, scratch_operands = 4 : i64, tpu.core_type = #tpu.core_type<tc>, window_params = [{transform_indices = @transform_0, window_bounds = array<i64: 8, 8, 128>}, {transform_indices = @transform_1, window_bounds = array<i64: 8, 128>}, {transform_indices = @transform_2, window_bounds = array<i64: 8, 128>}, {transform_indices = @transform_3, window_bounds = array<i64: 8, 1>}, {pipeline_mode = #tpu.pipeline_mode<synchronous>, transform_indices = @transform_4, window_bounds = array<i64: 128, 512>}, {pipeline_mode = #tpu.pipeline_mode<synchronous>, transform_indices = @transform_5, window_bounds = array<i64: 128, 512>}, {pipeline_mode = #tpu.pipeline_mode<synchronous>, transform_indices = @transform_6, window_bounds = array<i64: 1, 512>}, {pipeline_mode = #tpu.pipeline_mode<synchronous>, transform_indices = @transform_7, window_bounds = array<i64: 1, 128>}, {transform_indices = @transform_8, window_bounds = array<i64: 1, 1>}, {transform_indices = @transform_9, window_bounds = array<i64: 8, 8, 128>}, {transform_indices = @transform_10, window_bounds = array<i64: 8, 8, 128>}, {transform_indices = @transform_11, window_bounds = array<i64: 8, 8, 128>}]} {
    %c0_i32 = arith.constant 0 : i32
    %0 = arith.cmpi eq, %arg1, %c0_i32 : i32
    %1 = arith.extui %0 : i1 to i32
    %c0_i32_0 = arith.constant 0 : i32
    %2 = arith.cmpi ne, %1, %c0_i32_0 : i32
    scf.if %2 {
      %c0_227 = arith.constant 0 : index
      %c0_228 = arith.constant 0 : index
      %781 = vector.load %arg3[%c0_227, %c0_228] : memref<8x128xf32, #tpu.memory_space<vmem>>, vector<8x128xf32>
      %c0_229 = arith.constant 0 : index
      %c0_230 = arith.constant 0 : index
      %782 = vector.load %arg14[%c0_229, %c0_230] : memref<8x128xf32, #tpu.memory_space<vmem>>, vector<8x128xf32>
      tpu.vector_store %arg14[%c0_229, %c0_230], %781 {strides = array<i32>} : memref<8x128xf32, #tpu.memory_space<vmem>>, vector<8x128xf32>,
      %c0_231 = arith.constant 0 : index
      %c0_232 = arith.constant 0 : index
      %783 = vector.load %arg4[%c0_231, %c0_232] : memref<8x128xf32, #tpu.memory_space<vmem>>, vector<8x128xf32>
      %c0_233 = arith.constant 0 : index
      %c0_234 = arith.constant 0 : index
      %784 = vector.load %arg15[%c0_233, %c0_234] : memref<8x128xf32, #tpu.memory_space<vmem>>, vector<8x128xf32>
      tpu.vector_store %arg15[%c0_233, %c0_234], %783 {strides = array<i32>} : memref<8x128xf32, #tpu.memory_space<vmem>>, vector<8x128xf32>,
      %c0_235 = arith.constant 0 : index
      %c0_236 = arith.constant 0 : index
      %785 = vector.load %arg5[%c0_235, %c0_236] : memref<8x1xf32, #tpu.memory_space<vmem>>, vector<8x1xf32>
      %c0_237 = arith.constant 0 : index
      %c0_238 = arith.constant 0 : index
      %786 = vector.load %arg16[%c0_237, %c0_238] : memref<8x1xf32, #tpu.memory_space<vmem>>, vector<8x1xf32>
      tpu.vector_store %arg16[%c0_237, %c0_238], %785 {strides = array<i32>} : memref<8x1xf32, #tpu.memory_space<vmem>>, vector<8x1xf32>,
    } else {
    }
    %c0 = arith.constant 0 : index
    %c0_1 = arith.constant 0 : index
    %c0_2 = arith.constant 0 : index
    %3 = vector.load %arg2[%c0, %c0_1, %c0_2] : memref<8x8x128xf32, #tpu.memory_space<vmem>>, vector<8x8x128xf32>
    %4 = vector.shape_cast %3 : vector<8x8x128xf32> to vector<64x128xf32>
    %c0_3 = arith.constant 0 : index
    %c0_4 = arith.constant 0 : index
    %5 = vector.load %arg6[%c0_3, %c0_4] : memref<128x512xf32, #tpu.memory_space<vmem>>, vector<128x512xf32>
    %cst = arith.constant dense<0.000000e+00> : vector<64x512xf32>
    %6 = tpu.matmul %4, %5, %cst {dimension_numbers = #tpu.dot_dimension_numbers<[1], [0], [0], [1], [0, 0, 1, 1], [], []>} : vector<64x128xf32>, vector<128x512xf32>, vector<64x512xf32> -> vector<64x512xf32>
    %c0_5 = arith.constant 0 : index
    %c0_6 = arith.constant 0 : index
    %7 = vector.load %arg8[%c0_5, %c0_6] : memref<1x512xf32, #tpu.memory_space<vmem>>, vector<1x512xf32>
    %8 = vector.broadcast %7 : vector<1x512xf32> to vector<64x512xf32>
    %9 = arith.addf %6, %8 : vector<64x512xf32>
    %10 = vector.shape_cast %9 : vector<64x512xf32> to vector<8x8x512xf32>
    %c0_7 = arith.constant 0 : index
    %c0_8 = arith.constant 0 : index
    %c0_9 = arith.constant 0 : index
    %11 = vector.load %arg17[%c0_7, %c0_8, %c0_9] : memref<8x8x512xf32, #tpu.memory_space<vmem>>, vector<8x8x512xf32>
    tpu.vector_store %arg17[%c0_7, %c0_8, %c0_9], %10 {strides = array<i32>} : memref<8x8x512xf32, #tpu.memory_space<vmem>>, vector<8x8x512xf32>,
    %c0_10 = arith.constant 0 : index
    %c0_11 = arith.constant 0 : index
    %12 = vector.load %arg9[%c0_10, %c0_11] : memref<1x128xf32, #tpu.memory_space<vmem>>, vector<1x128xf32>
    %c0_12 = arith.constant 0 : index
    %c0_13 = arith.constant 0 : index
    %13 = memref.load %arg10[%c0_12, %c0_13] : memref<1x1xf32, #tpu.memory_space<smem>>
    %14 = tpu.iota {dimensions = array<i32: 1>} : vector<8x128xi32>
    %c0_14 = arith.constant 0 : index
    %c0_15 = arith.constant 0 : index
    %15 = vector.load %arg14[%c0_14, %c0_15] : memref<8x128xf32, #tpu.memory_space<vmem>>, vector<8x128xf32>
    %c0_16 = arith.constant 0 : index
    %c0_17 = arith.constant 0 : index
    %16 = vector.load %arg15[%c0_16, %c0_17] : memref<8x128xf32, #tpu.memory_space<vmem>>, vector<8x128xf32>
    %c0_18 = arith.constant 0 : index
    %c0_19 = arith.constant 0 : index
    %17 = vector.load %arg16[%c0_18, %c0_19] : memref<8x1xf32, #tpu.memory_space<vmem>>, vector<8x1xf32>
    %c0_i32_20 = arith.constant 0 : i32
    %18 = math.roundeven %17 : vector<8x1xf32>
    %19 = arith.index_cast %c0_i32_20 : i32 to index
    %c0_21 = arith.constant 0 : index
    %c0_22 = arith.constant 0 : index
    %20 = vector.load %arg17[%19, %c0_21, %c0_22] : memref<8x8x512xf32, #tpu.memory_space<vmem>>, vector<1x8x512xf32>
    %21 = vector.shape_cast %20 : vector<1x8x512xf32> to vector<8x512xf32>
    %c0_23 = arith.constant 0 : index
    %c0_24 = arith.constant 0 : index
    %22 = vector.load %arg7[%c0_23, %c0_24] : memref<128x512xf32, #tpu.memory_space<vmem>>, vector<128x512xf32>
    %cst_25 = arith.constant dense<0.000000e+00> : vector<8x512xf32>
    %23 = tpu.matmul %15, %22, %cst_25 {dimension_numbers = #tpu.dot_dimension_numbers<[1], [0], [0], [1], [0, 0, 1, 1], [], []>} : vector<8x128xf32>, vector<128x512xf32>, vector<8x512xf32> -> vector<8x512xf32>
    %24 = arith.addf %21, %23 : vector<8x512xf32>
    %25 = vector.extract_strided_slice %24 {offsets = [0, 0], sizes = [8, 128], strides = [1, 1]} : vector<8x512xf32> to vector<8x128xf32>
    %26 = arith.negf %25 : vector<8x128xf32>
    %27 = math.exp %26 : vector<8x128xf32>
    %cst_26 = arith.constant 1.000000e+00 : f32
    %28 = vector.broadcast %cst_26 : f32 to vector<8x128xf32>
    %29 = arith.addf %28, %27 : vector<8x128xf32>
    %30 = arith.divf %28, %29 : vector<8x128xf32>
    %31 = vector.extract_strided_slice %24 {offsets = [0, 128], sizes = [8, 128], strides = [1, 1]} : vector<8x512xf32> to vector<8x128xf32>
    %32 = arith.negf %31 : vector<8x128xf32>
    %33 = math.exp %32 : vector<8x128xf32>
    %cst_27 = arith.constant 1.000000e+00 : f32
    %34 = vector.broadcast %cst_27 : f32 to vector<8x128xf32>
    %35 = arith.addf %34, %33 : vector<8x128xf32>
    %36 = arith.divf %34, %35 : vector<8x128xf32>
    %37 = vector.extract_strided_slice %24 {offsets = [0, 256], sizes = [8, 128], strides = [1, 1]} : vector<8x512xf32> to vector<8x128xf32>
    %38 = arith.negf %37 : vector<8x128xf32>
    %39 = math.exp %38 : vector<8x128xf32>
    %cst_28 = arith.constant 1.000000e+00 : f32
    %40 = vector.broadcast %cst_28 : f32 to vector<8x128xf32>
    %41 = arith.addf %40, %39 : vector<8x128xf32>
    %42 = arith.divf %40, %41 : vector<8x128xf32>
    %43 = vector.extract_strided_slice %24 {offsets = [0, 384], sizes = [8, 128], strides = [1, 1]} : vector<8x512xf32> to vector<8x128xf32>
    %44 = math.tanh %43 : vector<8x128xf32>
    %45 = arith.mulf %16, %30 : vector<8x128xf32>
    %46 = arith.mulf %44, %36 : vector<8x128xf32>
    %47 = arith.addf %45, %46 : vector<8x128xf32>
    %48 = math.tanh %47 : vector<8x128xf32>
    %49 = arith.mulf %42, %48 : vector<8x128xf32>
    %50 = vector.broadcast %18 : vector<8x1xf32> to vector<8x128xf32>
    %51 = arith.mulf %49, %50 : vector<8x128xf32>
    %cst_29 = arith.constant 1.000000e+00 : f32
    %52 = vector.broadcast %cst_29 : f32 to vector<8x1xf32>
    %53 = arith.subf %52, %18 : vector<8x1xf32>
    %54 = vector.broadcast %53 : vector<8x1xf32> to vector<8x128xf32>
    %55 = arith.mulf %54, %15 : vector<8x128xf32>
    %56 = arith.addf %51, %55 : vector<8x128xf32>
    %57 = vector.broadcast %18 : vector<8x1xf32> to vector<8x128xf32>
    %58 = arith.mulf %47, %57 : vector<8x128xf32>
    %cst_30 = arith.constant 1.000000e+00 : f32
    %59 = vector.broadcast %cst_30 : f32 to vector<8x1xf32>
    %60 = arith.subf %59, %18 : vector<8x1xf32>
    %61 = vector.broadcast %60 : vector<8x1xf32> to vector<8x128xf32>
    %62 = arith.mulf %61, %16 : vector<8x128xf32>
    %63 = arith.addf %58, %62 : vector<8x128xf32>
    %64 = vector.broadcast %12 : vector<1x128xf32> to vector<8x128xf32>
    %65 = arith.mulf %63, %64 : vector<8x128xf32>
    %cst_31 = arith.constant dense<0.000000e+00> : vector<8xf32>
    %66 = vector.multi_reduction <add>, %65, %cst_31 [1] : vector<8x128xf32> to vector<8xf32>
    %67 = vector.shape_cast %66 : vector<8xf32> to vector<8x1xf32>
    %68 = vector.broadcast %13 : f32 to vector<8x1xf32>
    %69 = arith.addf %67, %68 : vector<8x1xf32>
    %70 = arith.negf %69 : vector<8x1xf32>
    %71 = math.exp %70 : vector<8x1xf32>
    %cst_32 = arith.constant 1.000000e+00 : f32
    %72 = vector.broadcast %cst_32 : f32 to vector<8x1xf32>
    %73 = arith.addf %72, %71 : vector<8x1xf32>
    %74 = arith.divf %72, %73 : vector<8x1xf32>
    %75 = arith.mulf %74, %18 : vector<8x1xf32>
    %76 = arith.addf %17, %74 : vector<8x1xf32>
    %cst_33 = arith.constant 0.000000e+00 : f32
    %cst_34 = arith.constant 1.000000e+00 : f32
    %77 = vector.broadcast %cst_33 : f32 to vector<8x1xf32>
    %78 = arith.maximumf %77, %76 : vector<8x1xf32>
    %79 = vector.broadcast %cst_34 : f32 to vector<8x1xf32>
    %80 = arith.minimumf %79, %78 : vector<8x1xf32>
    %cst_35 = arith.constant 1.000000e+00 : f32
    %81 = vector.broadcast %cst_35 : f32 to vector<8x1xf32>
    %82 = arith.subf %81, %18 : vector<8x1xf32>
    %83 = arith.mulf %80, %82 : vector<8x1xf32>
    %84 = arith.addf %75, %83 : vector<8x1xf32>
    %85 = arith.index_cast %c0_i32_20 : i32 to index
    %c0_36 = arith.constant 0 : index
    %c0_37 = arith.constant 0 : index
    %86 = vector.load %arg11[%85, %c0_36, %c0_37] : memref<8x8x128xf32, #tpu.memory_space<vmem>>, vector<1x8x128xf32>
    %87 = vector.shape_cast %86 : vector<1x8x128xf32> to vector<8x128xf32>
    %88 = vector.shape_cast %56 : vector<8x128xf32> to vector<1x8x128xf32>
    tpu.vector_store %arg11[%85, %c0_36, %c0_37], %88 {strides = array<i32>} : memref<8x8x128xf32, #tpu.memory_space<vmem>>, vector<1x8x128xf32>,
    %89 = arith.index_cast %c0_i32_20 : i32 to index
    %c0_38 = arith.constant 0 : index
    %c0_39 = arith.constant 0 : index
    %90 = vector.load %arg12[%89, %c0_38, %c0_39] : memref<8x8x128xf32, #tpu.memory_space<vmem>>, vector<1x8x128xf32>
    %91 = vector.shape_cast %90 : vector<1x8x128xf32> to vector<8x128xf32>
    %92 = vector.shape_cast %63 : vector<8x128xf32> to vector<1x8x128xf32>
    tpu.vector_store %arg12[%89, %c0_38, %c0_39], %92 {strides = array<i32>} : memref<8x8x128xf32, #tpu.memory_space<vmem>>, vector<1x8x128xf32>,
    %c0_i32_40 = arith.constant 0 : i32
    %93 = vector.broadcast %c0_i32_40 : i32 to vector<8x128xi32>
    %94 = arith.cmpi eq, %14, %93 : vector<8x128xi32>
    %c1_i32 = arith.constant 1 : i32
    %95 = vector.broadcast %c1_i32 : i32 to vector<8x128xi32>
    %96 = arith.cmpi eq, %14, %95 : vector<8x128xi32>
    %c2_i32 = arith.constant 2 : i32
    %97 = vector.broadcast %c2_i32 : i32 to vector<8x128xi32>
    %98 = arith.cmpi eq, %14, %97 : vector<8x128xi32>
    %cst_41 = arith.constant 0.000000e+00 : f32
    %99 = vector.shape_cast %74 : vector<8x1xf32> to vector<8x1xf32>
    %100 = vector.broadcast %99 : vector<8x1xf32> to vector<8x128xf32>
    %101 = vector.broadcast %cst_41 : f32 to vector<8x128xf32>
    %102 = arith.select %98, %100, %101 : vector<8x128xi1>, vector<8x128xf32>
    %103 = vector.shape_cast %84 : vector<8x1xf32> to vector<8x1xf32>
    %104 = vector.broadcast %103 : vector<8x1xf32> to vector<8x128xf32>
    %105 = arith.select %96, %104, %102 : vector<8x128xi1>, vector<8x128xf32>
    %106 = vector.shape_cast %18 : vector<8x1xf32> to vector<8x1xf32>
    %107 = vector.broadcast %106 : vector<8x1xf32> to vector<8x128xf32>
    %108 = arith.select %94, %107, %105 : vector<8x128xi1>, vector<8x128xf32>
    %109 = arith.index_cast %c0_i32_20 : i32 to index
    %c0_42 = arith.constant 0 : index
    %c0_43 = arith.constant 0 : index
    %110 = vector.load %arg13[%109, %c0_42, %c0_43] : memref<8x8x128xf32, #tpu.memory_space<vmem>>, vector<1x8x128xf32>
    %111 = vector.shape_cast %110 : vector<1x8x128xf32> to vector<8x128xf32>
    %112 = vector.shape_cast %108 : vector<8x128xf32> to vector<1x8x128xf32>
    tpu.vector_store %arg13[%109, %c0_42, %c0_43], %112 {strides = array<i32>} : memref<8x8x128xf32, #tpu.memory_space<vmem>>, vector<1x8x128xf32>,
    %c1_i32_44 = arith.constant 1 : i32
    %113 = math.roundeven %84 : vector<8x1xf32>
    %114 = arith.index_cast %c1_i32_44 : i32 to index
    %c0_45 = arith.constant 0 : index
    %c0_46 = arith.constant 0 : index
    %115 = vector.load %arg17[%114, %c0_45, %c0_46] : memref<8x8x512xf32, #tpu.memory_space<vmem>>, vector<1x8x512xf32>
    %116 = vector.shape_cast %115 : vector<1x8x512xf32> to vector<8x512xf32>
    %c0_47 = arith.constant 0 : index
    %c0_48 = arith.constant 0 : index
    %117 = vector.load %arg7[%c0_47, %c0_48] : memref<128x512xf32, #tpu.memory_space<vmem>>, vector<128x512xf32>
    %cst_49 = arith.constant dense<0.000000e+00> : vector<8x512xf32>
    %118 = tpu.matmul %56, %117, %cst_49 {dimension_numbers = #tpu.dot_dimension_numbers<[1], [0], [0], [1], [0, 0, 1, 1], [], []>} : vector<8x128xf32>, vector<128x512xf32>, vector<8x512xf32> -> vector<8x512xf32>
    %119 = arith.addf %116, %118 : vector<8x512xf32>
    %120 = vector.extract_strided_slice %119 {offsets = [0, 0], sizes = [8, 128], strides = [1, 1]} : vector<8x512xf32> to vector<8x128xf32>
    %121 = arith.negf %120 : vector<8x128xf32>
    %122 = math.exp %121 : vector<8x128xf32>
    %cst_50 = arith.constant 1.000000e+00 : f32
    %123 = vector.broadcast %cst_50 : f32 to vector<8x128xf32>
    %124 = arith.addf %123, %122 : vector<8x128xf32>
    %125 = arith.divf %123, %124 : vector<8x128xf32>
    %126 = vector.extract_strided_slice %119 {offsets = [0, 128], sizes = [8, 128], strides = [1, 1]} : vector<8x512xf32> to vector<8x128xf32>
    %127 = arith.negf %126 : vector<8x128xf32>
    %128 = math.exp %127 : vector<8x128xf32>
    %cst_51 = arith.constant 1.000000e+00 : f32
    %129 = vector.broadcast %cst_51 : f32 to vector<8x128xf32>
    %130 = arith.addf %129, %128 : vector<8x128xf32>
    %131 = arith.divf %129, %130 : vector<8x128xf32>
    %132 = vector.extract_strided_slice %119 {offsets = [0, 256], sizes = [8, 128], strides = [1, 1]} : vector<8x512xf32> to vector<8x128xf32>
    %133 = arith.negf %132 : vector<8x128xf32>
    %134 = math.exp %133 : vector<8x128xf32>
    %cst_52 = arith.constant 1.000000e+00 : f32
    %135 = vector.broadcast %cst_52 : f32 to vector<8x128xf32>
    %136 = arith.addf %135, %134 : vector<8x128xf32>
    %137 = arith.divf %135, %136 : vector<8x128xf32>
    %138 = vector.extract_strided_slice %119 {offsets = [0, 384], sizes = [8, 128], strides = [1, 1]} : vector<8x512xf32> to vector<8x128xf32>
    %139 = math.tanh %138 : vector<8x128xf32>
    %140 = arith.mulf %63, %125 : vector<8x128xf32>
    %141 = arith.mulf %139, %131 : vector<8x128xf32>
    %142 = arith.addf %140, %141 : vector<8x128xf32>
    %143 = math.tanh %142 : vector<8x128xf32>
    %144 = arith.mulf %137, %143 : vector<8x128xf32>
    %145 = vector.broadcast %113 : vector<8x1xf32> to vector<8x128xf32>
    %146 = arith.mulf %144, %145 : vector<8x128xf32>
    %cst_53 = arith.constant 1.000000e+00 : f32
    %147 = vector.broadcast %cst_53 : f32 to vector<8x1xf32>
    %148 = arith.subf %147, %113 : vector<8x1xf32>
    %149 = vector.broadcast %148 : vector<8x1xf32> to vector<8x128xf32>
    %150 = arith.mulf %149, %56 : vector<8x128xf32>
    %151 = arith.addf %146, %150 : vector<8x128xf32>
    %152 = vector.broadcast %113 : vector<8x1xf32> to vector<8x128xf32>
    %153 = arith.mulf %142, %152 : vector<8x128xf32>
    %cst_54 = arith.constant 1.000000e+00 : f32
    %154 = vector.broadcast %cst_54 : f32 to vector<8x1xf32>
    %155 = arith.subf %154, %113 : vector<8x1xf32>
    %156 = vector.broadcast %155 : vector<8x1xf32> to vector<8x128xf32>
    %157 = arith.mulf %156, %63 : vector<8x128xf32>
    %158 = arith.addf %153, %157 : vector<8x128xf32>
    %159 = vector.broadcast %12 : vector<1x128xf32> to vector<8x128xf32>
    %160 = arith.mulf %158, %159 : vector<8x128xf32>
    %cst_55 = arith.constant dense<0.000000e+00> : vector<8xf32>
    %161 = vector.multi_reduction <add>, %160, %cst_55 [1] : vector<8x128xf32> to vector<8xf32>
    %162 = vector.shape_cast %161 : vector<8xf32> to vector<8x1xf32>
    %163 = vector.broadcast %13 : f32 to vector<8x1xf32>
    %164 = arith.addf %162, %163 : vector<8x1xf32>
    %165 = arith.negf %164 : vector<8x1xf32>
    %166 = math.exp %165 : vector<8x1xf32>
    %cst_56 = arith.constant 1.000000e+00 : f32
    %167 = vector.broadcast %cst_56 : f32 to vector<8x1xf32>
    %168 = arith.addf %167, %166 : vector<8x1xf32>
    %169 = arith.divf %167, %168 : vector<8x1xf32>
    %170 = arith.mulf %169, %113 : vector<8x1xf32>
    %171 = arith.addf %84, %169 : vector<8x1xf32>
    %cst_57 = arith.constant 0.000000e+00 : f32
    %cst_58 = arith.constant 1.000000e+00 : f32
    %172 = vector.broadcast %cst_57 : f32 to vector<8x1xf32>
    %173 = arith.maximumf %172, %171 : vector<8x1xf32>
    %174 = vector.broadcast %cst_58 : f32 to vector<8x1xf32>
    %175 = arith.minimumf %174, %173 : vector<8x1xf32>
    %cst_59 = arith.constant 1.000000e+00 : f32
    %176 = vector.broadcast %cst_59 : f32 to vector<8x1xf32>
    %177 = arith.subf %176, %113 : vector<8x1xf32>
    %178 = arith.mulf %175, %177 : vector<8x1xf32>
    %179 = arith.addf %170, %178 : vector<8x1xf32>
    %180 = arith.index_cast %c1_i32_44 : i32 to index
    %c0_60 = arith.constant 0 : index
    %c0_61 = arith.constant 0 : index
    %181 = vector.load %arg11[%180, %c0_60, %c0_61] : memref<8x8x128xf32, #tpu.memory_space<vmem>>, vector<1x8x128xf32>
    %182 = vector.shape_cast %181 : vector<1x8x128xf32> to vector<8x128xf32>
    %183 = vector.shape_cast %151 : vector<8x128xf32> to vector<1x8x128xf32>
    tpu.vector_store %arg11[%180, %c0_60, %c0_61], %183 {strides = array<i32>} : memref<8x8x128xf32, #tpu.memory_space<vmem>>, vector<1x8x128xf32>,
    %184 = arith.index_cast %c1_i32_44 : i32 to index
    %c0_62 = arith.constant 0 : index
    %c0_63 = arith.constant 0 : index
    %185 = vector.load %arg12[%184, %c0_62, %c0_63] : memref<8x8x128xf32, #tpu.memory_space<vmem>>, vector<1x8x128xf32>
    %186 = vector.shape_cast %185 : vector<1x8x128xf32> to vector<8x128xf32>
    %187 = vector.shape_cast %158 : vector<8x128xf32> to vector<1x8x128xf32>
    tpu.vector_store %arg12[%184, %c0_62, %c0_63], %187 {strides = array<i32>} : memref<8x8x128xf32, #tpu.memory_space<vmem>>, vector<1x8x128xf32>,
    %c0_i32_64 = arith.constant 0 : i32
    %188 = vector.broadcast %c0_i32_64 : i32 to vector<8x128xi32>
    %189 = arith.cmpi eq, %14, %188 : vector<8x128xi32>
    %c1_i32_65 = arith.constant 1 : i32
    %190 = vector.broadcast %c1_i32_65 : i32 to vector<8x128xi32>
    %191 = arith.cmpi eq, %14, %190 : vector<8x128xi32>
    %c2_i32_66 = arith.constant 2 : i32
    %192 = vector.broadcast %c2_i32_66 : i32 to vector<8x128xi32>
    %193 = arith.cmpi eq, %14, %192 : vector<8x128xi32>
    %cst_67 = arith.constant 0.000000e+00 : f32
    %194 = vector.shape_cast %169 : vector<8x1xf32> to vector<8x1xf32>
    %195 = vector.broadcast %194 : vector<8x1xf32> to vector<8x128xf32>
    %196 = vector.broadcast %cst_67 : f32 to vector<8x128xf32>
    %197 = arith.select %193, %195, %196 : vector<8x128xi1>, vector<8x128xf32>
    %198 = vector.shape_cast %179 : vector<8x1xf32> to vector<8x1xf32>
    %199 = vector.broadcast %198 : vector<8x1xf32> to vector<8x128xf32>
    %200 = arith.select %191, %199, %197 : vector<8x128xi1>, vector<8x128xf32>
    %201 = vector.shape_cast %113 : vector<8x1xf32> to vector<8x1xf32>
    %202 = vector.broadcast %201 : vector<8x1xf32> to vector<8x128xf32>
    %203 = arith.select %189, %202, %200 : vector<8x128xi1>, vector<8x128xf32>
    %204 = arith.index_cast %c1_i32_44 : i32 to index
    %c0_68 = arith.constant 0 : index
    %c0_69 = arith.constant 0 : index
    %205 = vector.load %arg13[%204, %c0_68, %c0_69] : memref<8x8x128xf32, #tpu.memory_space<vmem>>, vector<1x8x128xf32>
    %206 = vector.shape_cast %205 : vector<1x8x128xf32> to vector<8x128xf32>
    %207 = vector.shape_cast %203 : vector<8x128xf32> to vector<1x8x128xf32>
    tpu.vector_store %arg13[%204, %c0_68, %c0_69], %207 {strides = array<i32>} : memref<8x8x128xf32, #tpu.memory_space<vmem>>, vector<1x8x128xf32>,
    %c2_i32_70 = arith.constant 2 : i32
    %208 = math.roundeven %179 : vector<8x1xf32>
    %209 = arith.index_cast %c2_i32_70 : i32 to index
    %c0_71 = arith.constant 0 : index
    %c0_72 = arith.constant 0 : index
    %210 = vector.load %arg17[%209, %c0_71, %c0_72] : memref<8x8x512xf32, #tpu.memory_space<vmem>>, vector<1x8x512xf32>
    %211 = vector.shape_cast %210 : vector<1x8x512xf32> to vector<8x512xf32>
    %c0_73 = arith.constant 0 : index
    %c0_74 = arith.constant 0 : index
    %212 = vector.load %arg7[%c0_73, %c0_74] : memref<128x512xf32, #tpu.memory_space<vmem>>, vector<128x512xf32>
    %cst_75 = arith.constant dense<0.000000e+00> : vector<8x512xf32>
    %213 = tpu.matmul %151, %212, %cst_75 {dimension_numbers = #tpu.dot_dimension_numbers<[1], [0], [0], [1], [0, 0, 1, 1], [], []>} : vector<8x128xf32>, vector<128x512xf32>, vector<8x512xf32> -> vector<8x512xf32>
    %214 = arith.addf %211, %213 : vector<8x512xf32>
    %215 = vector.extract_strided_slice %214 {offsets = [0, 0], sizes = [8, 128], strides = [1, 1]} : vector<8x512xf32> to vector<8x128xf32>
    %216 = arith.negf %215 : vector<8x128xf32>
    %217 = math.exp %216 : vector<8x128xf32>
    %cst_76 = arith.constant 1.000000e+00 : f32
    %218 = vector.broadcast %cst_76 : f32 to vector<8x128xf32>
    %219 = arith.addf %218, %217 : vector<8x128xf32>
    %220 = arith.divf %218, %219 : vector<8x128xf32>
    %221 = vector.extract_strided_slice %214 {offsets = [0, 128], sizes = [8, 128], strides = [1, 1]} : vector<8x512xf32> to vector<8x128xf32>
    %222 = arith.negf %221 : vector<8x128xf32>
    %223 = math.exp %222 : vector<8x128xf32>
    %cst_77 = arith.constant 1.000000e+00 : f32
    %224 = vector.broadcast %cst_77 : f32 to vector<8x128xf32>
    %225 = arith.addf %224, %223 : vector<8x128xf32>
    %226 = arith.divf %224, %225 : vector<8x128xf32>
    %227 = vector.extract_strided_slice %214 {offsets = [0, 256], sizes = [8, 128], strides = [1, 1]} : vector<8x512xf32> to vector<8x128xf32>
    %228 = arith.negf %227 : vector<8x128xf32>
    %229 = math.exp %228 : vector<8x128xf32>
    %cst_78 = arith.constant 1.000000e+00 : f32
    %230 = vector.broadcast %cst_78 : f32 to vector<8x128xf32>
    %231 = arith.addf %230, %229 : vector<8x128xf32>
    %232 = arith.divf %230, %231 : vector<8x128xf32>
    %233 = vector.extract_strided_slice %214 {offsets = [0, 384], sizes = [8, 128], strides = [1, 1]} : vector<8x512xf32> to vector<8x128xf32>
    %234 = math.tanh %233 : vector<8x128xf32>
    %235 = arith.mulf %158, %220 : vector<8x128xf32>
    %236 = arith.mulf %234, %226 : vector<8x128xf32>
    %237 = arith.addf %235, %236 : vector<8x128xf32>
    %238 = math.tanh %237 : vector<8x128xf32>
    %239 = arith.mulf %232, %238 : vector<8x128xf32>
    %240 = vector.broadcast %208 : vector<8x1xf32> to vector<8x128xf32>
    %241 = arith.mulf %239, %240 : vector<8x128xf32>
    %cst_79 = arith.constant 1.000000e+00 : f32
    %242 = vector.broadcast %cst_79 : f32 to vector<8x1xf32>
    %243 = arith.subf %242, %208 : vector<8x1xf32>
    %244 = vector.broadcast %243 : vector<8x1xf32> to vector<8x128xf32>
    %245 = arith.mulf %244, %151 : vector<8x128xf32>
    %246 = arith.addf %241, %245 : vector<8x128xf32>
    %247 = vector.broadcast %208 : vector<8x1xf32> to vector<8x128xf32>
    %248 = arith.mulf %237, %247 : vector<8x128xf32>
    %cst_80 = arith.constant 1.000000e+00 : f32
    %249 = vector.broadcast %cst_80 : f32 to vector<8x1xf32>
    %250 = arith.subf %249, %208 : vector<8x1xf32>
    %251 = vector.broadcast %250 : vector<8x1xf32> to vector<8x128xf32>
    %252 = arith.mulf %251, %158 : vector<8x128xf32>
    %253 = arith.addf %248, %252 : vector<8x128xf32>
    %254 = vector.broadcast %12 : vector<1x128xf32> to vector<8x128xf32>
    %255 = arith.mulf %253, %254 : vector<8x128xf32>
    %cst_81 = arith.constant dense<0.000000e+00> : vector<8xf32>
    %256 = vector.multi_reduction <add>, %255, %cst_81 [1] : vector<8x128xf32> to vector<8xf32>
    %257 = vector.shape_cast %256 : vector<8xf32> to vector<8x1xf32>
    %258 = vector.broadcast %13 : f32 to vector<8x1xf32>
    %259 = arith.addf %257, %258 : vector<8x1xf32>
    %260 = arith.negf %259 : vector<8x1xf32>
    %261 = math.exp %260 : vector<8x1xf32>
    %cst_82 = arith.constant 1.000000e+00 : f32
    %262 = vector.broadcast %cst_82 : f32 to vector<8x1xf32>
    %263 = arith.addf %262, %261 : vector<8x1xf32>
    %264 = arith.divf %262, %263 : vector<8x1xf32>
    %265 = arith.mulf %264, %208 : vector<8x1xf32>
    %266 = arith.addf %179, %264 : vector<8x1xf32>
    %cst_83 = arith.constant 0.000000e+00 : f32
    %cst_84 = arith.constant 1.000000e+00 : f32
    %267 = vector.broadcast %cst_83 : f32 to vector<8x1xf32>
    %268 = arith.maximumf %267, %266 : vector<8x1xf32>
    %269 = vector.broadcast %cst_84 : f32 to vector<8x1xf32>
    %270 = arith.minimumf %269, %268 : vector<8x1xf32>
    %cst_85 = arith.constant 1.000000e+00 : f32
    %271 = vector.broadcast %cst_85 : f32 to vector<8x1xf32>
    %272 = arith.subf %271, %208 : vector<8x1xf32>
    %273 = arith.mulf %270, %272 : vector<8x1xf32>
    %274 = arith.addf %265, %273 : vector<8x1xf32>
    %275 = arith.index_cast %c2_i32_70 : i32 to index
    %c0_86 = arith.constant 0 : index
    %c0_87 = arith.constant 0 : index
    %276 = vector.load %arg11[%275, %c0_86, %c0_87] : memref<8x8x128xf32, #tpu.memory_space<vmem>>, vector<1x8x128xf32>
    %277 = vector.shape_cast %276 : vector<1x8x128xf32> to vector<8x128xf32>
    %278 = vector.shape_cast %246 : vector<8x128xf32> to vector<1x8x128xf32>
    tpu.vector_store %arg11[%275, %c0_86, %c0_87], %278 {strides = array<i32>} : memref<8x8x128xf32, #tpu.memory_space<vmem>>, vector<1x8x128xf32>,
    %279 = arith.index_cast %c2_i32_70 : i32 to index
    %c0_88 = arith.constant 0 : index
    %c0_89 = arith.constant 0 : index
    %280 = vector.load %arg12[%279, %c0_88, %c0_89] : memref<8x8x128xf32, #tpu.memory_space<vmem>>, vector<1x8x128xf32>
    %281 = vector.shape_cast %280 : vector<1x8x128xf32> to vector<8x128xf32>
    %282 = vector.shape_cast %253 : vector<8x128xf32> to vector<1x8x128xf32>
    tpu.vector_store %arg12[%279, %c0_88, %c0_89], %282 {strides = array<i32>} : memref<8x8x128xf32, #tpu.memory_space<vmem>>, vector<1x8x128xf32>,
    %c0_i32_90 = arith.constant 0 : i32
    %283 = vector.broadcast %c0_i32_90 : i32 to vector<8x128xi32>
    %284 = arith.cmpi eq, %14, %283 : vector<8x128xi32>
    %c1_i32_91 = arith.constant 1 : i32
    %285 = vector.broadcast %c1_i32_91 : i32 to vector<8x128xi32>
    %286 = arith.cmpi eq, %14, %285 : vector<8x128xi32>
    %c2_i32_92 = arith.constant 2 : i32
    %287 = vector.broadcast %c2_i32_92 : i32 to vector<8x128xi32>
    %288 = arith.cmpi eq, %14, %287 : vector<8x128xi32>
    %cst_93 = arith.constant 0.000000e+00 : f32
    %289 = vector.shape_cast %264 : vector<8x1xf32> to vector<8x1xf32>
    %290 = vector.broadcast %289 : vector<8x1xf32> to vector<8x128xf32>
    %291 = vector.broadcast %cst_93 : f32 to vector<8x128xf32>
    %292 = arith.select %288, %290, %291 : vector<8x128xi1>, vector<8x128xf32>
    %293 = vector.shape_cast %274 : vector<8x1xf32> to vector<8x1xf32>
    %294 = vector.broadcast %293 : vector<8x1xf32> to vector<8x128xf32>
    %295 = arith.select %286, %294, %292 : vector<8x128xi1>, vector<8x128xf32>
    %296 = vector.shape_cast %208 : vector<8x1xf32> to vector<8x1xf32>
    %297 = vector.broadcast %296 : vector<8x1xf32> to vector<8x128xf32>
    %298 = arith.select %284, %297, %295 : vector<8x128xi1>, vector<8x128xf32>
    %299 = arith.index_cast %c2_i32_70 : i32 to index
    %c0_94 = arith.constant 0 : index
    %c0_95 = arith.constant 0 : index
    %300 = vector.load %arg13[%299, %c0_94, %c0_95] : memref<8x8x128xf32, #tpu.memory_space<vmem>>, vector<1x8x128xf32>
    %301 = vector.shape_cast %300 : vector<1x8x128xf32> to vector<8x128xf32>
    %302 = vector.shape_cast %298 : vector<8x128xf32> to vector<1x8x128xf32>
    tpu.vector_store %arg13[%299, %c0_94, %c0_95], %302 {strides = array<i32>} : memref<8x8x128xf32, #tpu.memory_space<vmem>>, vector<1x8x128xf32>,
    %c3_i32 = arith.constant 3 : i32
    %303 = math.roundeven %274 : vector<8x1xf32>
    %304 = arith.index_cast %c3_i32 : i32 to index
    %c0_96 = arith.constant 0 : index
    %c0_97 = arith.constant 0 : index
    %305 = vector.load %arg17[%304, %c0_96, %c0_97] : memref<8x8x512xf32, #tpu.memory_space<vmem>>, vector<1x8x512xf32>
    %306 = vector.shape_cast %305 : vector<1x8x512xf32> to vector<8x512xf32>
    %c0_98 = arith.constant 0 : index
    %c0_99 = arith.constant 0 : index
    %307 = vector.load %arg7[%c0_98, %c0_99] : memref<128x512xf32, #tpu.memory_space<vmem>>, vector<128x512xf32>
    %cst_100 = arith.constant dense<0.000000e+00> : vector<8x512xf32>
    %308 = tpu.matmul %246, %307, %cst_100 {dimension_numbers = #tpu.dot_dimension_numbers<[1], [0], [0], [1], [0, 0, 1, 1], [], []>} : vector<8x128xf32>, vector<128x512xf32>, vector<8x512xf32> -> vector<8x512xf32>
    %309 = arith.addf %306, %308 : vector<8x512xf32>
    %310 = vector.extract_strided_slice %309 {offsets = [0, 0], sizes = [8, 128], strides = [1, 1]} : vector<8x512xf32> to vector<8x128xf32>
    %311 = arith.negf %310 : vector<8x128xf32>
    %312 = math.exp %311 : vector<8x128xf32>
    %cst_101 = arith.constant 1.000000e+00 : f32
    %313 = vector.broadcast %cst_101 : f32 to vector<8x128xf32>
    %314 = arith.addf %313, %312 : vector<8x128xf32>
    %315 = arith.divf %313, %314 : vector<8x128xf32>
    %316 = vector.extract_strided_slice %309 {offsets = [0, 128], sizes = [8, 128], strides = [1, 1]} : vector<8x512xf32> to vector<8x128xf32>
    %317 = arith.negf %316 : vector<8x128xf32>
    %318 = math.exp %317 : vector<8x128xf32>
    %cst_102 = arith.constant 1.000000e+00 : f32
    %319 = vector.broadcast %cst_102 : f32 to vector<8x128xf32>
    %320 = arith.addf %319, %318 : vector<8x128xf32>
    %321 = arith.divf %319, %320 : vector<8x128xf32>
    %322 = vector.extract_strided_slice %309 {offsets = [0, 256], sizes = [8, 128], strides = [1, 1]} : vector<8x512xf32> to vector<8x128xf32>
    %323 = arith.negf %322 : vector<8x128xf32>
    %324 = math.exp %323 : vector<8x128xf32>
    %cst_103 = arith.constant 1.000000e+00 : f32
    %325 = vector.broadcast %cst_103 : f32 to vector<8x128xf32>
    %326 = arith.addf %325, %324 : vector<8x128xf32>
    %327 = arith.divf %325, %326 : vector<8x128xf32>
    %328 = vector.extract_strided_slice %309 {offsets = [0, 384], sizes = [8, 128], strides = [1, 1]} : vector<8x512xf32> to vector<8x128xf32>
    %329 = math.tanh %328 : vector<8x128xf32>
    %330 = arith.mulf %253, %315 : vector<8x128xf32>
    %331 = arith.mulf %329, %321 : vector<8x128xf32>
    %332 = arith.addf %330, %331 : vector<8x128xf32>
    %333 = math.tanh %332 : vector<8x128xf32>
    %334 = arith.mulf %327, %333 : vector<8x128xf32>
    %335 = vector.broadcast %303 : vector<8x1xf32> to vector<8x128xf32>
    %336 = arith.mulf %334, %335 : vector<8x128xf32>
    %cst_104 = arith.constant 1.000000e+00 : f32
    %337 = vector.broadcast %cst_104 : f32 to vector<8x1xf32>
    %338 = arith.subf %337, %303 : vector<8x1xf32>
    %339 = vector.broadcast %338 : vector<8x1xf32> to vector<8x128xf32>
    %340 = arith.mulf %339, %246 : vector<8x128xf32>
    %341 = arith.addf %336, %340 : vector<8x128xf32>
    %342 = vector.broadcast %303 : vector<8x1xf32> to vector<8x128xf32>
    %343 = arith.mulf %332, %342 : vector<8x128xf32>
    %cst_105 = arith.constant 1.000000e+00 : f32
    %344 = vector.broadcast %cst_105 : f32 to vector<8x1xf32>
    %345 = arith.subf %344, %303 : vector<8x1xf32>
    %346 = vector.broadcast %345 : vector<8x1xf32> to vector<8x128xf32>
    %347 = arith.mulf %346, %253 : vector<8x128xf32>
    %348 = arith.addf %343, %347 : vector<8x128xf32>
    %349 = vector.broadcast %12 : vector<1x128xf32> to vector<8x128xf32>
    %350 = arith.mulf %348, %349 : vector<8x128xf32>
    %cst_106 = arith.constant dense<0.000000e+00> : vector<8xf32>
    %351 = vector.multi_reduction <add>, %350, %cst_106 [1] : vector<8x128xf32> to vector<8xf32>
    %352 = vector.shape_cast %351 : vector<8xf32> to vector<8x1xf32>
    %353 = vector.broadcast %13 : f32 to vector<8x1xf32>
    %354 = arith.addf %352, %353 : vector<8x1xf32>
    %355 = arith.negf %354 : vector<8x1xf32>
    %356 = math.exp %355 : vector<8x1xf32>
    %cst_107 = arith.constant 1.000000e+00 : f32
    %357 = vector.broadcast %cst_107 : f32 to vector<8x1xf32>
    %358 = arith.addf %357, %356 : vector<8x1xf32>
    %359 = arith.divf %357, %358 : vector<8x1xf32>
    %360 = arith.mulf %359, %303 : vector<8x1xf32>
    %361 = arith.addf %274, %359 : vector<8x1xf32>
    %cst_108 = arith.constant 0.000000e+00 : f32
    %cst_109 = arith.constant 1.000000e+00 : f32
    %362 = vector.broadcast %cst_108 : f32 to vector<8x1xf32>
    %363 = arith.maximumf %362, %361 : vector<8x1xf32>
    %364 = vector.broadcast %cst_109 : f32 to vector<8x1xf32>
    %365 = arith.minimumf %364, %363 : vector<8x1xf32>
    %cst_110 = arith.constant 1.000000e+00 : f32
    %366 = vector.broadcast %cst_110 : f32 to vector<8x1xf32>
    %367 = arith.subf %366, %303 : vector<8x1xf32>
    %368 = arith.mulf %365, %367 : vector<8x1xf32>
    %369 = arith.addf %360, %368 : vector<8x1xf32>
    %370 = arith.index_cast %c3_i32 : i32 to index
    %c0_111 = arith.constant 0 : index
    %c0_112 = arith.constant 0 : index
    %371 = vector.load %arg11[%370, %c0_111, %c0_112] : memref<8x8x128xf32, #tpu.memory_space<vmem>>, vector<1x8x128xf32>
    %372 = vector.shape_cast %371 : vector<1x8x128xf32> to vector<8x128xf32>
    %373 = vector.shape_cast %341 : vector<8x128xf32> to vector<1x8x128xf32>
    tpu.vector_store %arg11[%370, %c0_111, %c0_112], %373 {strides = array<i32>} : memref<8x8x128xf32, #tpu.memory_space<vmem>>, vector<1x8x128xf32>,
    %374 = arith.index_cast %c3_i32 : i32 to index
    %c0_113 = arith.constant 0 : index
    %c0_114 = arith.constant 0 : index
    %375 = vector.load %arg12[%374, %c0_113, %c0_114] : memref<8x8x128xf32, #tpu.memory_space<vmem>>, vector<1x8x128xf32>
    %376 = vector.shape_cast %375 : vector<1x8x128xf32> to vector<8x128xf32>
    %377 = vector.shape_cast %348 : vector<8x128xf32> to vector<1x8x128xf32>
    tpu.vector_store %arg12[%374, %c0_113, %c0_114], %377 {strides = array<i32>} : memref<8x8x128xf32, #tpu.memory_space<vmem>>, vector<1x8x128xf32>,
    %c0_i32_115 = arith.constant 0 : i32
    %378 = vector.broadcast %c0_i32_115 : i32 to vector<8x128xi32>
    %379 = arith.cmpi eq, %14, %378 : vector<8x128xi32>
    %c1_i32_116 = arith.constant 1 : i32
    %380 = vector.broadcast %c1_i32_116 : i32 to vector<8x128xi32>
    %381 = arith.cmpi eq, %14, %380 : vector<8x128xi32>
    %c2_i32_117 = arith.constant 2 : i32
    %382 = vector.broadcast %c2_i32_117 : i32 to vector<8x128xi32>
    %383 = arith.cmpi eq, %14, %382 : vector<8x128xi32>
    %cst_118 = arith.constant 0.000000e+00 : f32
    %384 = vector.shape_cast %359 : vector<8x1xf32> to vector<8x1xf32>
    %385 = vector.broadcast %384 : vector<8x1xf32> to vector<8x128xf32>
    %386 = vector.broadcast %cst_118 : f32 to vector<8x128xf32>
    %387 = arith.select %383, %385, %386 : vector<8x128xi1>, vector<8x128xf32>
    %388 = vector.shape_cast %369 : vector<8x1xf32> to vector<8x1xf32>
    %389 = vector.broadcast %388 : vector<8x1xf32> to vector<8x128xf32>
    %390 = arith.select %381, %389, %387 : vector<8x128xi1>, vector<8x128xf32>
    %391 = vector.shape_cast %303 : vector<8x1xf32> to vector<8x1xf32>
    %392 = vector.broadcast %391 : vector<8x1xf32> to vector<8x128xf32>
    %393 = arith.select %379, %392, %390 : vector<8x128xi1>, vector<8x128xf32>
    %394 = arith.index_cast %c3_i32 : i32 to index
    %c0_119 = arith.constant 0 : index
    %c0_120 = arith.constant 0 : index
    %395 = vector.load %arg13[%394, %c0_119, %c0_120] : memref<8x8x128xf32, #tpu.memory_space<vmem>>, vector<1x8x128xf32>
    %396 = vector.shape_cast %395 : vector<1x8x128xf32> to vector<8x128xf32>
    %397 = vector.shape_cast %393 : vector<8x128xf32> to vector<1x8x128xf32>
    tpu.vector_store %arg13[%394, %c0_119, %c0_120], %397 {strides = array<i32>} : memref<8x8x128xf32, #tpu.memory_space<vmem>>, vector<1x8x128xf32>,
    %c4_i32 = arith.constant 4 : i32
    %398 = math.roundeven %369 : vector<8x1xf32>
    %399 = arith.index_cast %c4_i32 : i32 to index
    %c0_121 = arith.constant 0 : index
    %c0_122 = arith.constant 0 : index
    %400 = vector.load %arg17[%399, %c0_121, %c0_122] : memref<8x8x512xf32, #tpu.memory_space<vmem>>, vector<1x8x512xf32>
    %401 = vector.shape_cast %400 : vector<1x8x512xf32> to vector<8x512xf32>
    %c0_123 = arith.constant 0 : index
    %c0_124 = arith.constant 0 : index
    %402 = vector.load %arg7[%c0_123, %c0_124] : memref<128x512xf32, #tpu.memory_space<vmem>>, vector<128x512xf32>
    %cst_125 = arith.constant dense<0.000000e+00> : vector<8x512xf32>
    %403 = tpu.matmul %341, %402, %cst_125 {dimension_numbers = #tpu.dot_dimension_numbers<[1], [0], [0], [1], [0, 0, 1, 1], [], []>} : vector<8x128xf32>, vector<128x512xf32>, vector<8x512xf32> -> vector<8x512xf32>
    %404 = arith.addf %401, %403 : vector<8x512xf32>
    %405 = vector.extract_strided_slice %404 {offsets = [0, 0], sizes = [8, 128], strides = [1, 1]} : vector<8x512xf32> to vector<8x128xf32>
    %406 = arith.negf %405 : vector<8x128xf32>
    %407 = math.exp %406 : vector<8x128xf32>
    %cst_126 = arith.constant 1.000000e+00 : f32
    %408 = vector.broadcast %cst_126 : f32 to vector<8x128xf32>
    %409 = arith.addf %408, %407 : vector<8x128xf32>
    %410 = arith.divf %408, %409 : vector<8x128xf32>
    %411 = vector.extract_strided_slice %404 {offsets = [0, 128], sizes = [8, 128], strides = [1, 1]} : vector<8x512xf32> to vector<8x128xf32>
    %412 = arith.negf %411 : vector<8x128xf32>
    %413 = math.exp %412 : vector<8x128xf32>
    %cst_127 = arith.constant 1.000000e+00 : f32
    %414 = vector.broadcast %cst_127 : f32 to vector<8x128xf32>
    %415 = arith.addf %414, %413 : vector<8x128xf32>
    %416 = arith.divf %414, %415 : vector<8x128xf32>
    %417 = vector.extract_strided_slice %404 {offsets = [0, 256], sizes = [8, 128], strides = [1, 1]} : vector<8x512xf32> to vector<8x128xf32>
    %418 = arith.negf %417 : vector<8x128xf32>
    %419 = math.exp %418 : vector<8x128xf32>
    %cst_128 = arith.constant 1.000000e+00 : f32
    %420 = vector.broadcast %cst_128 : f32 to vector<8x128xf32>
    %421 = arith.addf %420, %419 : vector<8x128xf32>
    %422 = arith.divf %420, %421 : vector<8x128xf32>
    %423 = vector.extract_strided_slice %404 {offsets = [0, 384], sizes = [8, 128], strides = [1, 1]} : vector<8x512xf32> to vector<8x128xf32>
    %424 = math.tanh %423 : vector<8x128xf32>
    %425 = arith.mulf %348, %410 : vector<8x128xf32>
    %426 = arith.mulf %424, %416 : vector<8x128xf32>
    %427 = arith.addf %425, %426 : vector<8x128xf32>
    %428 = math.tanh %427 : vector<8x128xf32>
    %429 = arith.mulf %422, %428 : vector<8x128xf32>
    %430 = vector.broadcast %398 : vector<8x1xf32> to vector<8x128xf32>
    %431 = arith.mulf %429, %430 : vector<8x128xf32>
    %cst_129 = arith.constant 1.000000e+00 : f32
    %432 = vector.broadcast %cst_129 : f32 to vector<8x1xf32>
    %433 = arith.subf %432, %398 : vector<8x1xf32>
    %434 = vector.broadcast %433 : vector<8x1xf32> to vector<8x128xf32>
    %435 = arith.mulf %434, %341 : vector<8x128xf32>
    %436 = arith.addf %431, %435 : vector<8x128xf32>
    %437 = vector.broadcast %398 : vector<8x1xf32> to vector<8x128xf32>
    %438 = arith.mulf %427, %437 : vector<8x128xf32>
    %cst_130 = arith.constant 1.000000e+00 : f32
    %439 = vector.broadcast %cst_130 : f32 to vector<8x1xf32>
    %440 = arith.subf %439, %398 : vector<8x1xf32>
    %441 = vector.broadcast %440 : vector<8x1xf32> to vector<8x128xf32>
    %442 = arith.mulf %441, %348 : vector<8x128xf32>
    %443 = arith.addf %438, %442 : vector<8x128xf32>
    %444 = vector.broadcast %12 : vector<1x128xf32> to vector<8x128xf32>
    %445 = arith.mulf %443, %444 : vector<8x128xf32>
    %cst_131 = arith.constant dense<0.000000e+00> : vector<8xf32>
    %446 = vector.multi_reduction <add>, %445, %cst_131 [1] : vector<8x128xf32> to vector<8xf32>
    %447 = vector.shape_cast %446 : vector<8xf32> to vector<8x1xf32>
    %448 = vector.broadcast %13 : f32 to vector<8x1xf32>
    %449 = arith.addf %447, %448 : vector<8x1xf32>
    %450 = arith.negf %449 : vector<8x1xf32>
    %451 = math.exp %450 : vector<8x1xf32>
    %cst_132 = arith.constant 1.000000e+00 : f32
    %452 = vector.broadcast %cst_132 : f32 to vector<8x1xf32>
    %453 = arith.addf %452, %451 : vector<8x1xf32>
    %454 = arith.divf %452, %453 : vector<8x1xf32>
    %455 = arith.mulf %454, %398 : vector<8x1xf32>
    %456 = arith.addf %369, %454 : vector<8x1xf32>
    %cst_133 = arith.constant 0.000000e+00 : f32
    %cst_134 = arith.constant 1.000000e+00 : f32
    %457 = vector.broadcast %cst_133 : f32 to vector<8x1xf32>
    %458 = arith.maximumf %457, %456 : vector<8x1xf32>
    %459 = vector.broadcast %cst_134 : f32 to vector<8x1xf32>
    %460 = arith.minimumf %459, %458 : vector<8x1xf32>
    %cst_135 = arith.constant 1.000000e+00 : f32
    %461 = vector.broadcast %cst_135 : f32 to vector<8x1xf32>
    %462 = arith.subf %461, %398 : vector<8x1xf32>
    %463 = arith.mulf %460, %462 : vector<8x1xf32>
    %464 = arith.addf %455, %463 : vector<8x1xf32>
    %465 = arith.index_cast %c4_i32 : i32 to index
    %c0_136 = arith.constant 0 : index
    %c0_137 = arith.constant 0 : index
    %466 = vector.load %arg11[%465, %c0_136, %c0_137] : memref<8x8x128xf32, #tpu.memory_space<vmem>>, vector<1x8x128xf32>
    %467 = vector.shape_cast %466 : vector<1x8x128xf32> to vector<8x128xf32>
    %468 = vector.shape_cast %436 : vector<8x128xf32> to vector<1x8x128xf32>
    tpu.vector_store %arg11[%465, %c0_136, %c0_137], %468 {strides = array<i32>} : memref<8x8x128xf32, #tpu.memory_space<vmem>>, vector<1x8x128xf32>,
    %469 = arith.index_cast %c4_i32 : i32 to index
    %c0_138 = arith.constant 0 : index
    %c0_139 = arith.constant 0 : index
    %470 = vector.load %arg12[%469, %c0_138, %c0_139] : memref<8x8x128xf32, #tpu.memory_space<vmem>>, vector<1x8x128xf32>
    %471 = vector.shape_cast %470 : vector<1x8x128xf32> to vector<8x128xf32>
    %472 = vector.shape_cast %443 : vector<8x128xf32> to vector<1x8x128xf32>
    tpu.vector_store %arg12[%469, %c0_138, %c0_139], %472 {strides = array<i32>} : memref<8x8x128xf32, #tpu.memory_space<vmem>>, vector<1x8x128xf32>,
    %c0_i32_140 = arith.constant 0 : i32
    %473 = vector.broadcast %c0_i32_140 : i32 to vector<8x128xi32>
    %474 = arith.cmpi eq, %14, %473 : vector<8x128xi32>
    %c1_i32_141 = arith.constant 1 : i32
    %475 = vector.broadcast %c1_i32_141 : i32 to vector<8x128xi32>
    %476 = arith.cmpi eq, %14, %475 : vector<8x128xi32>
    %c2_i32_142 = arith.constant 2 : i32
    %477 = vector.broadcast %c2_i32_142 : i32 to vector<8x128xi32>
    %478 = arith.cmpi eq, %14, %477 : vector<8x128xi32>
    %cst_143 = arith.constant 0.000000e+00 : f32
    %479 = vector.shape_cast %454 : vector<8x1xf32> to vector<8x1xf32>
    %480 = vector.broadcast %479 : vector<8x1xf32> to vector<8x128xf32>
    %481 = vector.broadcast %cst_143 : f32 to vector<8x128xf32>
    %482 = arith.select %478, %480, %481 : vector<8x128xi1>, vector<8x128xf32>
    %483 = vector.shape_cast %464 : vector<8x1xf32> to vector<8x1xf32>
    %484 = vector.broadcast %483 : vector<8x1xf32> to vector<8x128xf32>
    %485 = arith.select %476, %484, %482 : vector<8x128xi1>, vector<8x128xf32>
    %486 = vector.shape_cast %398 : vector<8x1xf32> to vector<8x1xf32>
    %487 = vector.broadcast %486 : vector<8x1xf32> to vector<8x128xf32>
    %488 = arith.select %474, %487, %485 : vector<8x128xi1>, vector<8x128xf32>
    %489 = arith.index_cast %c4_i32 : i32 to index
    %c0_144 = arith.constant 0 : index
    %c0_145 = arith.constant 0 : index
    %490 = vector.load %arg13[%489, %c0_144, %c0_145] : memref<8x8x128xf32, #tpu.memory_space<vmem>>, vector<1x8x128xf32>
    %491 = vector.shape_cast %490 : vector<1x8x128xf32> to vector<8x128xf32>
    %492 = vector.shape_cast %488 : vector<8x128xf32> to vector<1x8x128xf32>
    tpu.vector_store %arg13[%489, %c0_144, %c0_145], %492 {strides = array<i32>} : memref<8x8x128xf32, #tpu.memory_space<vmem>>, vector<1x8x128xf32>,
    %c5_i32 = arith.constant 5 : i32
    %493 = math.roundeven %464 : vector<8x1xf32>
    %494 = arith.index_cast %c5_i32 : i32 to index
    %c0_146 = arith.constant 0 : index
    %c0_147 = arith.constant 0 : index
    %495 = vector.load %arg17[%494, %c0_146, %c0_147] : memref<8x8x512xf32, #tpu.memory_space<vmem>>, vector<1x8x512xf32>
    %496 = vector.shape_cast %495 : vector<1x8x512xf32> to vector<8x512xf32>
    %c0_148 = arith.constant 0 : index
    %c0_149 = arith.constant 0 : index
    %497 = vector.load %arg7[%c0_148, %c0_149] : memref<128x512xf32, #tpu.memory_space<vmem>>, vector<128x512xf32>
    %cst_150 = arith.constant dense<0.000000e+00> : vector<8x512xf32>
    %498 = tpu.matmul %436, %497, %cst_150 {dimension_numbers = #tpu.dot_dimension_numbers<[1], [0], [0], [1], [0, 0, 1, 1], [], []>} : vector<8x128xf32>, vector<128x512xf32>, vector<8x512xf32> -> vector<8x512xf32>
    %499 = arith.addf %496, %498 : vector<8x512xf32>
    %500 = vector.extract_strided_slice %499 {offsets = [0, 0], sizes = [8, 128], strides = [1, 1]} : vector<8x512xf32> to vector<8x128xf32>
    %501 = arith.negf %500 : vector<8x128xf32>
    %502 = math.exp %501 : vector<8x128xf32>
    %cst_151 = arith.constant 1.000000e+00 : f32
    %503 = vector.broadcast %cst_151 : f32 to vector<8x128xf32>
    %504 = arith.addf %503, %502 : vector<8x128xf32>
    %505 = arith.divf %503, %504 : vector<8x128xf32>
    %506 = vector.extract_strided_slice %499 {offsets = [0, 128], sizes = [8, 128], strides = [1, 1]} : vector<8x512xf32> to vector<8x128xf32>
    %507 = arith.negf %506 : vector<8x128xf32>
    %508 = math.exp %507 : vector<8x128xf32>
    %cst_152 = arith.constant 1.000000e+00 : f32
    %509 = vector.broadcast %cst_152 : f32 to vector<8x128xf32>
    %510 = arith.addf %509, %508 : vector<8x128xf32>
    %511 = arith.divf %509, %510 : vector<8x128xf32>
    %512 = vector.extract_strided_slice %499 {offsets = [0, 256], sizes = [8, 128], strides = [1, 1]} : vector<8x512xf32> to vector<8x128xf32>
    %513 = arith.negf %512 : vector<8x128xf32>
    %514 = math.exp %513 : vector<8x128xf32>
    %cst_153 = arith.constant 1.000000e+00 : f32
    %515 = vector.broadcast %cst_153 : f32 to vector<8x128xf32>
    %516 = arith.addf %515, %514 : vector<8x128xf32>
    %517 = arith.divf %515, %516 : vector<8x128xf32>
    %518 = vector.extract_strided_slice %499 {offsets = [0, 384], sizes = [8, 128], strides = [1, 1]} : vector<8x512xf32> to vector<8x128xf32>
    %519 = math.tanh %518 : vector<8x128xf32>
    %520 = arith.mulf %443, %505 : vector<8x128xf32>
    %521 = arith.mulf %519, %511 : vector<8x128xf32>
    %522 = arith.addf %520, %521 : vector<8x128xf32>
    %523 = math.tanh %522 : vector<8x128xf32>
    %524 = arith.mulf %517, %523 : vector<8x128xf32>
    %525 = vector.broadcast %493 : vector<8x1xf32> to vector<8x128xf32>
    %526 = arith.mulf %524, %525 : vector<8x128xf32>
    %cst_154 = arith.constant 1.000000e+00 : f32
    %527 = vector.broadcast %cst_154 : f32 to vector<8x1xf32>
    %528 = arith.subf %527, %493 : vector<8x1xf32>
    %529 = vector.broadcast %528 : vector<8x1xf32> to vector<8x128xf32>
    %530 = arith.mulf %529, %436 : vector<8x128xf32>
    %531 = arith.addf %526, %530 : vector<8x128xf32>
    %532 = vector.broadcast %493 : vector<8x1xf32> to vector<8x128xf32>
    %533 = arith.mulf %522, %532 : vector<8x128xf32>
    %cst_155 = arith.constant 1.000000e+00 : f32
    %534 = vector.broadcast %cst_155 : f32 to vector<8x1xf32>
    %535 = arith.subf %534, %493 : vector<8x1xf32>
    %536 = vector.broadcast %535 : vector<8x1xf32> to vector<8x128xf32>
    %537 = arith.mulf %536, %443 : vector<8x128xf32>
    %538 = arith.addf %533, %537 : vector<8x128xf32>
    %539 = vector.broadcast %12 : vector<1x128xf32> to vector<8x128xf32>
    %540 = arith.mulf %538, %539 : vector<8x128xf32>
    %cst_156 = arith.constant dense<0.000000e+00> : vector<8xf32>
    %541 = vector.multi_reduction <add>, %540, %cst_156 [1] : vector<8x128xf32> to vector<8xf32>
    %542 = vector.shape_cast %541 : vector<8xf32> to vector<8x1xf32>
    %543 = vector.broadcast %13 : f32 to vector<8x1xf32>
    %544 = arith.addf %542, %543 : vector<8x1xf32>
    %545 = arith.negf %544 : vector<8x1xf32>
    %546 = math.exp %545 : vector<8x1xf32>
    %cst_157 = arith.constant 1.000000e+00 : f32
    %547 = vector.broadcast %cst_157 : f32 to vector<8x1xf32>
    %548 = arith.addf %547, %546 : vector<8x1xf32>
    %549 = arith.divf %547, %548 : vector<8x1xf32>
    %550 = arith.mulf %549, %493 : vector<8x1xf32>
    %551 = arith.addf %464, %549 : vector<8x1xf32>
    %cst_158 = arith.constant 0.000000e+00 : f32
    %cst_159 = arith.constant 1.000000e+00 : f32
    %552 = vector.broadcast %cst_158 : f32 to vector<8x1xf32>
    %553 = arith.maximumf %552, %551 : vector<8x1xf32>
    %554 = vector.broadcast %cst_159 : f32 to vector<8x1xf32>
    %555 = arith.minimumf %554, %553 : vector<8x1xf32>
    %cst_160 = arith.constant 1.000000e+00 : f32
    %556 = vector.broadcast %cst_160 : f32 to vector<8x1xf32>
    %557 = arith.subf %556, %493 : vector<8x1xf32>
    %558 = arith.mulf %555, %557 : vector<8x1xf32>
    %559 = arith.addf %550, %558 : vector<8x1xf32>
    %560 = arith.index_cast %c5_i32 : i32 to index
    %c0_161 = arith.constant 0 : index
    %c0_162 = arith.constant 0 : index
    %561 = vector.load %arg11[%560, %c0_161, %c0_162] : memref<8x8x128xf32, #tpu.memory_space<vmem>>, vector<1x8x128xf32>
    %562 = vector.shape_cast %561 : vector<1x8x128xf32> to vector<8x128xf32>
    %563 = vector.shape_cast %531 : vector<8x128xf32> to vector<1x8x128xf32>
    tpu.vector_store %arg11[%560, %c0_161, %c0_162], %563 {strides = array<i32>} : memref<8x8x128xf32, #tpu.memory_space<vmem>>, vector<1x8x128xf32>,
    %564 = arith.index_cast %c5_i32 : i32 to index
    %c0_163 = arith.constant 0 : index
    %c0_164 = arith.constant 0 : index
    %565 = vector.load %arg12[%564, %c0_163, %c0_164] : memref<8x8x128xf32, #tpu.memory_space<vmem>>, vector<1x8x128xf32>
    %566 = vector.shape_cast %565 : vector<1x8x128xf32> to vector<8x128xf32>
    %567 = vector.shape_cast %538 : vector<8x128xf32> to vector<1x8x128xf32>
    tpu.vector_store %arg12[%564, %c0_163, %c0_164], %567 {strides = array<i32>} : memref<8x8x128xf32, #tpu.memory_space<vmem>>, vector<1x8x128xf32>,
    %c0_i32_165 = arith.constant 0 : i32
    %568 = vector.broadcast %c0_i32_165 : i32 to vector<8x128xi32>
    %569 = arith.cmpi eq, %14, %568 : vector<8x128xi32>
    %c1_i32_166 = arith.constant 1 : i32
    %570 = vector.broadcast %c1_i32_166 : i32 to vector<8x128xi32>
    %571 = arith.cmpi eq, %14, %570 : vector<8x128xi32>
    %c2_i32_167 = arith.constant 2 : i32
    %572 = vector.broadcast %c2_i32_167 : i32 to vector<8x128xi32>
    %573 = arith.cmpi eq, %14, %572 : vector<8x128xi32>
    %cst_168 = arith.constant 0.000000e+00 : f32
    %574 = vector.shape_cast %549 : vector<8x1xf32> to vector<8x1xf32>
    %575 = vector.broadcast %574 : vector<8x1xf32> to vector<8x128xf32>
    %576 = vector.broadcast %cst_168 : f32 to vector<8x128xf32>
    %577 = arith.select %573, %575, %576 : vector<8x128xi1>, vector<8x128xf32>
    %578 = vector.shape_cast %559 : vector<8x1xf32> to vector<8x1xf32>
    %579 = vector.broadcast %578 : vector<8x1xf32> to vector<8x128xf32>
    %580 = arith.select %571, %579, %577 : vector<8x128xi1>, vector<8x128xf32>
    %581 = vector.shape_cast %493 : vector<8x1xf32> to vector<8x1xf32>
    %582 = vector.broadcast %581 : vector<8x1xf32> to vector<8x128xf32>
    %583 = arith.select %569, %582, %580 : vector<8x128xi1>, vector<8x128xf32>
    %584 = arith.index_cast %c5_i32 : i32 to index
    %c0_169 = arith.constant 0 : index
    %c0_170 = arith.constant 0 : index
    %585 = vector.load %arg13[%584, %c0_169, %c0_170] : memref<8x8x128xf32, #tpu.memory_space<vmem>>, vector<1x8x128xf32>
    %586 = vector.shape_cast %585 : vector<1x8x128xf32> to vector<8x128xf32>
    %587 = vector.shape_cast %583 : vector<8x128xf32> to vector<1x8x128xf32>
    tpu.vector_store %arg13[%584, %c0_169, %c0_170], %587 {strides = array<i32>} : memref<8x8x128xf32, #tpu.memory_space<vmem>>, vector<1x8x128xf32>,
    %c6_i32 = arith.constant 6 : i32
    %588 = math.roundeven %559 : vector<8x1xf32>
    %589 = arith.index_cast %c6_i32 : i32 to index
    %c0_171 = arith.constant 0 : index
    %c0_172 = arith.constant 0 : index
    %590 = vector.load %arg17[%589, %c0_171, %c0_172] : memref<8x8x512xf32, #tpu.memory_space<vmem>>, vector<1x8x512xf32>
    %591 = vector.shape_cast %590 : vector<1x8x512xf32> to vector<8x512xf32>
    %c0_173 = arith.constant 0 : index
    %c0_174 = arith.constant 0 : index
    %592 = vector.load %arg7[%c0_173, %c0_174] : memref<128x512xf32, #tpu.memory_space<vmem>>, vector<128x512xf32>
    %cst_175 = arith.constant dense<0.000000e+00> : vector<8x512xf32>
    %593 = tpu.matmul %531, %592, %cst_175 {dimension_numbers = #tpu.dot_dimension_numbers<[1], [0], [0], [1], [0, 0, 1, 1], [], []>} : vector<8x128xf32>, vector<128x512xf32>, vector<8x512xf32> -> vector<8x512xf32>
    %594 = arith.addf %591, %593 : vector<8x512xf32>
    %595 = vector.extract_strided_slice %594 {offsets = [0, 0], sizes = [8, 128], strides = [1, 1]} : vector<8x512xf32> to vector<8x128xf32>
    %596 = arith.negf %595 : vector<8x128xf32>
    %597 = math.exp %596 : vector<8x128xf32>
    %cst_176 = arith.constant 1.000000e+00 : f32
    %598 = vector.broadcast %cst_176 : f32 to vector<8x128xf32>
    %599 = arith.addf %598, %597 : vector<8x128xf32>
    %600 = arith.divf %598, %599 : vector<8x128xf32>
    %601 = vector.extract_strided_slice %594 {offsets = [0, 128], sizes = [8, 128], strides = [1, 1]} : vector<8x512xf32> to vector<8x128xf32>
    %602 = arith.negf %601 : vector<8x128xf32>
    %603 = math.exp %602 : vector<8x128xf32>
    %cst_177 = arith.constant 1.000000e+00 : f32
    %604 = vector.broadcast %cst_177 : f32 to vector<8x128xf32>
    %605 = arith.addf %604, %603 : vector<8x128xf32>
    %606 = arith.divf %604, %605 : vector<8x128xf32>
    %607 = vector.extract_strided_slice %594 {offsets = [0, 256], sizes = [8, 128], strides = [1, 1]} : vector<8x512xf32> to vector<8x128xf32>
    %608 = arith.negf %607 : vector<8x128xf32>
    %609 = math.exp %608 : vector<8x128xf32>
    %cst_178 = arith.constant 1.000000e+00 : f32
    %610 = vector.broadcast %cst_178 : f32 to vector<8x128xf32>
    %611 = arith.addf %610, %609 : vector<8x128xf32>
    %612 = arith.divf %610, %611 : vector<8x128xf32>
    %613 = vector.extract_strided_slice %594 {offsets = [0, 384], sizes = [8, 128], strides = [1, 1]} : vector<8x512xf32> to vector<8x128xf32>
    %614 = math.tanh %613 : vector<8x128xf32>
    %615 = arith.mulf %538, %600 : vector<8x128xf32>
    %616 = arith.mulf %614, %606 : vector<8x128xf32>
    %617 = arith.addf %615, %616 : vector<8x128xf32>
    %618 = math.tanh %617 : vector<8x128xf32>
    %619 = arith.mulf %612, %618 : vector<8x128xf32>
    %620 = vector.broadcast %588 : vector<8x1xf32> to vector<8x128xf32>
    %621 = arith.mulf %619, %620 : vector<8x128xf32>
    %cst_179 = arith.constant 1.000000e+00 : f32
    %622 = vector.broadcast %cst_179 : f32 to vector<8x1xf32>
    %623 = arith.subf %622, %588 : vector<8x1xf32>
    %624 = vector.broadcast %623 : vector<8x1xf32> to vector<8x128xf32>
    %625 = arith.mulf %624, %531 : vector<8x128xf32>
    %626 = arith.addf %621, %625 : vector<8x128xf32>
    %627 = vector.broadcast %588 : vector<8x1xf32> to vector<8x128xf32>
    %628 = arith.mulf %617, %627 : vector<8x128xf32>
    %cst_180 = arith.constant 1.000000e+00 : f32
    %629 = vector.broadcast %cst_180 : f32 to vector<8x1xf32>
    %630 = arith.subf %629, %588 : vector<8x1xf32>
    %631 = vector.broadcast %630 : vector<8x1xf32> to vector<8x128xf32>
    %632 = arith.mulf %631, %538 : vector<8x128xf32>
    %633 = arith.addf %628, %632 : vector<8x128xf32>
    %634 = vector.broadcast %12 : vector<1x128xf32> to vector<8x128xf32>
    %635 = arith.mulf %633, %634 : vector<8x128xf32>
    %cst_181 = arith.constant dense<0.000000e+00> : vector<8xf32>
    %636 = vector.multi_reduction <add>, %635, %cst_181 [1] : vector<8x128xf32> to vector<8xf32>
    %637 = vector.shape_cast %636 : vector<8xf32> to vector<8x1xf32>
    %638 = vector.broadcast %13 : f32 to vector<8x1xf32>
    %639 = arith.addf %637, %638 : vector<8x1xf32>
    %640 = arith.negf %639 : vector<8x1xf32>
    %641 = math.exp %640 : vector<8x1xf32>
    %cst_182 = arith.constant 1.000000e+00 : f32
    %642 = vector.broadcast %cst_182 : f32 to vector<8x1xf32>
    %643 = arith.addf %642, %641 : vector<8x1xf32>
    %644 = arith.divf %642, %643 : vector<8x1xf32>
    %645 = arith.mulf %644, %588 : vector<8x1xf32>
    %646 = arith.addf %559, %644 : vector<8x1xf32>
    %cst_183 = arith.constant 0.000000e+00 : f32
    %cst_184 = arith.constant 1.000000e+00 : f32
    %647 = vector.broadcast %cst_183 : f32 to vector<8x1xf32>
    %648 = arith.maximumf %647, %646 : vector<8x1xf32>
    %649 = vector.broadcast %cst_184 : f32 to vector<8x1xf32>
    %650 = arith.minimumf %649, %648 : vector<8x1xf32>
    %cst_185 = arith.constant 1.000000e+00 : f32
    %651 = vector.broadcast %cst_185 : f32 to vector<8x1xf32>
    %652 = arith.subf %651, %588 : vector<8x1xf32>
    %653 = arith.mulf %650, %652 : vector<8x1xf32>
    %654 = arith.addf %645, %653 : vector<8x1xf32>
    %655 = arith.index_cast %c6_i32 : i32 to index
    %c0_186 = arith.constant 0 : index
    %c0_187 = arith.constant 0 : index
    %656 = vector.load %arg11[%655, %c0_186, %c0_187] : memref<8x8x128xf32, #tpu.memory_space<vmem>>, vector<1x8x128xf32>
    %657 = vector.shape_cast %656 : vector<1x8x128xf32> to vector<8x128xf32>
    %658 = vector.shape_cast %626 : vector<8x128xf32> to vector<1x8x128xf32>
    tpu.vector_store %arg11[%655, %c0_186, %c0_187], %658 {strides = array<i32>} : memref<8x8x128xf32, #tpu.memory_space<vmem>>, vector<1x8x128xf32>,
    %659 = arith.index_cast %c6_i32 : i32 to index
    %c0_188 = arith.constant 0 : index
    %c0_189 = arith.constant 0 : index
    %660 = vector.load %arg12[%659, %c0_188, %c0_189] : memref<8x8x128xf32, #tpu.memory_space<vmem>>, vector<1x8x128xf32>
    %661 = vector.shape_cast %660 : vector<1x8x128xf32> to vector<8x128xf32>
    %662 = vector.shape_cast %633 : vector<8x128xf32> to vector<1x8x128xf32>
    tpu.vector_store %arg12[%659, %c0_188, %c0_189], %662 {strides = array<i32>} : memref<8x8x128xf32, #tpu.memory_space<vmem>>, vector<1x8x128xf32>,
    %c0_i32_190 = arith.constant 0 : i32
    %663 = vector.broadcast %c0_i32_190 : i32 to vector<8x128xi32>
    %664 = arith.cmpi eq, %14, %663 : vector<8x128xi32>
    %c1_i32_191 = arith.constant 1 : i32
    %665 = vector.broadcast %c1_i32_191 : i32 to vector<8x128xi32>
    %666 = arith.cmpi eq, %14, %665 : vector<8x128xi32>
    %c2_i32_192 = arith.constant 2 : i32
    %667 = vector.broadcast %c2_i32_192 : i32 to vector<8x128xi32>
    %668 = arith.cmpi eq, %14, %667 : vector<8x128xi32>
    %cst_193 = arith.constant 0.000000e+00 : f32
    %669 = vector.shape_cast %644 : vector<8x1xf32> to vector<8x1xf32>
    %670 = vector.broadcast %669 : vector<8x1xf32> to vector<8x128xf32>
    %671 = vector.broadcast %cst_193 : f32 to vector<8x128xf32>
    %672 = arith.select %668, %670, %671 : vector<8x128xi1>, vector<8x128xf32>
    %673 = vector.shape_cast %654 : vector<8x1xf32> to vector<8x1xf32>
    %674 = vector.broadcast %673 : vector<8x1xf32> to vector<8x128xf32>
    %675 = arith.select %666, %674, %672 : vector<8x128xi1>, vector<8x128xf32>
    %676 = vector.shape_cast %588 : vector<8x1xf32> to vector<8x1xf32>
    %677 = vector.broadcast %676 : vector<8x1xf32> to vector<8x128xf32>
    %678 = arith.select %664, %677, %675 : vector<8x128xi1>, vector<8x128xf32>
    %679 = arith.index_cast %c6_i32 : i32 to index
    %c0_194 = arith.constant 0 : index
    %c0_195 = arith.constant 0 : index
    %680 = vector.load %arg13[%679, %c0_194, %c0_195] : memref<8x8x128xf32, #tpu.memory_space<vmem>>, vector<1x8x128xf32>
    %681 = vector.shape_cast %680 : vector<1x8x128xf32> to vector<8x128xf32>
    %682 = vector.shape_cast %678 : vector<8x128xf32> to vector<1x8x128xf32>
    tpu.vector_store %arg13[%679, %c0_194, %c0_195], %682 {strides = array<i32>} : memref<8x8x128xf32, #tpu.memory_space<vmem>>, vector<1x8x128xf32>,
    %c7_i32 = arith.constant 7 : i32
    %683 = math.roundeven %654 : vector<8x1xf32>
    %684 = arith.index_cast %c7_i32 : i32 to index
    %c0_196 = arith.constant 0 : index
    %c0_197 = arith.constant 0 : index
    %685 = vector.load %arg17[%684, %c0_196, %c0_197] : memref<8x8x512xf32, #tpu.memory_space<vmem>>, vector<1x8x512xf32>
    %686 = vector.shape_cast %685 : vector<1x8x512xf32> to vector<8x512xf32>
    %c0_198 = arith.constant 0 : index
    %c0_199 = arith.constant 0 : index
    %687 = vector.load %arg7[%c0_198, %c0_199] : memref<128x512xf32, #tpu.memory_space<vmem>>, vector<128x512xf32>
    %cst_200 = arith.constant dense<0.000000e+00> : vector<8x512xf32>
    %688 = tpu.matmul %626, %687, %cst_200 {dimension_numbers = #tpu.dot_dimension_numbers<[1], [0], [0], [1], [0, 0, 1, 1], [], []>} : vector<8x128xf32>, vector<128x512xf32>, vector<8x512xf32> -> vector<8x512xf32>
    %689 = arith.addf %686, %688 : vector<8x512xf32>
    %690 = vector.extract_strided_slice %689 {offsets = [0, 0], sizes = [8, 128], strides = [1, 1]} : vector<8x512xf32> to vector<8x128xf32>
    %691 = arith.negf %690 : vector<8x128xf32>
    %692 = math.exp %691 : vector<8x128xf32>
    %cst_201 = arith.constant 1.000000e+00 : f32
    %693 = vector.broadcast %cst_201 : f32 to vector<8x128xf32>
    %694 = arith.addf %693, %692 : vector<8x128xf32>
    %695 = arith.divf %693, %694 : vector<8x128xf32>
    %696 = vector.extract_strided_slice %689 {offsets = [0, 128], sizes = [8, 128], strides = [1, 1]} : vector<8x512xf32> to vector<8x128xf32>
    %697 = arith.negf %696 : vector<8x128xf32>
    %698 = math.exp %697 : vector<8x128xf32>
    %cst_202 = arith.constant 1.000000e+00 : f32
    %699 = vector.broadcast %cst_202 : f32 to vector<8x128xf32>
    %700 = arith.addf %699, %698 : vector<8x128xf32>
    %701 = arith.divf %699, %700 : vector<8x128xf32>
    %702 = vector.extract_strided_slice %689 {offsets = [0, 256], sizes = [8, 128], strides = [1, 1]} : vector<8x512xf32> to vector<8x128xf32>
    %703 = arith.negf %702 : vector<8x128xf32>
    %704 = math.exp %703 : vector<8x128xf32>
    %cst_203 = arith.constant 1.000000e+00 : f32
    %705 = vector.broadcast %cst_203 : f32 to vector<8x128xf32>
    %706 = arith.addf %705, %704 : vector<8x128xf32>
    %707 = arith.divf %705, %706 : vector<8x128xf32>
    %708 = vector.extract_strided_slice %689 {offsets = [0, 384], sizes = [8, 128], strides = [1, 1]} : vector<8x512xf32> to vector<8x128xf32>
    %709 = math.tanh %708 : vector<8x128xf32>
    %710 = arith.mulf %633, %695 : vector<8x128xf32>
    %711 = arith.mulf %709, %701 : vector<8x128xf32>
    %712 = arith.addf %710, %711 : vector<8x128xf32>
    %713 = math.tanh %712 : vector<8x128xf32>
    %714 = arith.mulf %707, %713 : vector<8x128xf32>
    %715 = vector.broadcast %683 : vector<8x1xf32> to vector<8x128xf32>
    %716 = arith.mulf %714, %715 : vector<8x128xf32>
    %cst_204 = arith.constant 1.000000e+00 : f32
    %717 = vector.broadcast %cst_204 : f32 to vector<8x1xf32>
    %718 = arith.subf %717, %683 : vector<8x1xf32>
    %719 = vector.broadcast %718 : vector<8x1xf32> to vector<8x128xf32>
    %720 = arith.mulf %719, %626 : vector<8x128xf32>
    %721 = arith.addf %716, %720 : vector<8x128xf32>
    %722 = vector.broadcast %683 : vector<8x1xf32> to vector<8x128xf32>
    %723 = arith.mulf %712, %722 : vector<8x128xf32>
    %cst_205 = arith.constant 1.000000e+00 : f32
    %724 = vector.broadcast %cst_205 : f32 to vector<8x1xf32>
    %725 = arith.subf %724, %683 : vector<8x1xf32>
    %726 = vector.broadcast %725 : vector<8x1xf32> to vector<8x128xf32>
    %727 = arith.mulf %726, %633 : vector<8x128xf32>
    %728 = arith.addf %723, %727 : vector<8x128xf32>
    %729 = vector.broadcast %12 : vector<1x128xf32> to vector<8x128xf32>
    %730 = arith.mulf %728, %729 : vector<8x128xf32>
    %cst_206 = arith.constant dense<0.000000e+00> : vector<8xf32>
    %731 = vector.multi_reduction <add>, %730, %cst_206 [1] : vector<8x128xf32> to vector<8xf32>
    %732 = vector.shape_cast %731 : vector<8xf32> to vector<8x1xf32>
    %733 = vector.broadcast %13 : f32 to vector<8x1xf32>
    %734 = arith.addf %732, %733 : vector<8x1xf32>
    %735 = arith.negf %734 : vector<8x1xf32>
    %736 = math.exp %735 : vector<8x1xf32>
    %cst_207 = arith.constant 1.000000e+00 : f32
    %737 = vector.broadcast %cst_207 : f32 to vector<8x1xf32>
    %738 = arith.addf %737, %736 : vector<8x1xf32>
    %739 = arith.divf %737, %738 : vector<8x1xf32>
    %740 = arith.mulf %739, %683 : vector<8x1xf32>
    %741 = arith.addf %654, %739 : vector<8x1xf32>
    %cst_208 = arith.constant 0.000000e+00 : f32
    %cst_209 = arith.constant 1.000000e+00 : f32
    %742 = vector.broadcast %cst_208 : f32 to vector<8x1xf32>
    %743 = arith.maximumf %742, %741 : vector<8x1xf32>
    %744 = vector.broadcast %cst_209 : f32 to vector<8x1xf32>
    %745 = arith.minimumf %744, %743 : vector<8x1xf32>
    %cst_210 = arith.constant 1.000000e+00 : f32
    %746 = vector.broadcast %cst_210 : f32 to vector<8x1xf32>
    %747 = arith.subf %746, %683 : vector<8x1xf32>
    %748 = arith.mulf %745, %747 : vector<8x1xf32>
    %749 = arith.addf %740, %748 : vector<8x1xf32>
    %750 = arith.index_cast %c7_i32 : i32 to index
    %c0_211 = arith.constant 0 : index
    %c0_212 = arith.constant 0 : index
    %751 = vector.load %arg11[%750, %c0_211, %c0_212] : memref<8x8x128xf32, #tpu.memory_space<vmem>>, vector<1x8x128xf32>
    %752 = vector.shape_cast %751 : vector<1x8x128xf32> to vector<8x128xf32>
    %753 = vector.shape_cast %721 : vector<8x128xf32> to vector<1x8x128xf32>
    tpu.vector_store %arg11[%750, %c0_211, %c0_212], %753 {strides = array<i32>} : memref<8x8x128xf32, #tpu.memory_space<vmem>>, vector<1x8x128xf32>,
    %754 = arith.index_cast %c7_i32 : i32 to index
    %c0_213 = arith.constant 0 : index
    %c0_214 = arith.constant 0 : index
    %755 = vector.load %arg12[%754, %c0_213, %c0_214] : memref<8x8x128xf32, #tpu.memory_space<vmem>>, vector<1x8x128xf32>
    %756 = vector.shape_cast %755 : vector<1x8x128xf32> to vector<8x128xf32>
    %757 = vector.shape_cast %728 : vector<8x128xf32> to vector<1x8x128xf32>
    tpu.vector_store %arg12[%754, %c0_213, %c0_214], %757 {strides = array<i32>} : memref<8x8x128xf32, #tpu.memory_space<vmem>>, vector<1x8x128xf32>,
    %c0_i32_215 = arith.constant 0 : i32
    %758 = vector.broadcast %c0_i32_215 : i32 to vector<8x128xi32>
    %759 = arith.cmpi eq, %14, %758 : vector<8x128xi32>
    %c1_i32_216 = arith.constant 1 : i32
    %760 = vector.broadcast %c1_i32_216 : i32 to vector<8x128xi32>
    %761 = arith.cmpi eq, %14, %760 : vector<8x128xi32>
    %c2_i32_217 = arith.constant 2 : i32
    %762 = vector.broadcast %c2_i32_217 : i32 to vector<8x128xi32>
    %763 = arith.cmpi eq, %14, %762 : vector<8x128xi32>
    %cst_218 = arith.constant 0.000000e+00 : f32
    %764 = vector.shape_cast %739 : vector<8x1xf32> to vector<8x1xf32>
    %765 = vector.broadcast %764 : vector<8x1xf32> to vector<8x128xf32>
    %766 = vector.broadcast %cst_218 : f32 to vector<8x128xf32>
    %767 = arith.select %763, %765, %766 : vector<8x128xi1>, vector<8x128xf32>
    %768 = vector.shape_cast %749 : vector<8x1xf32> to vector<8x1xf32>
    %769 = vector.broadcast %768 : vector<8x1xf32> to vector<8x128xf32>
    %770 = arith.select %761, %769, %767 : vector<8x128xi1>, vector<8x128xf32>
    %771 = vector.shape_cast %683 : vector<8x1xf32> to vector<8x1xf32>
    %772 = vector.broadcast %771 : vector<8x1xf32> to vector<8x128xf32>
    %773 = arith.select %759, %772, %770 : vector<8x128xi1>, vector<8x128xf32>
    %774 = arith.index_cast %c7_i32 : i32 to index
    %c0_219 = arith.constant 0 : index
    %c0_220 = arith.constant 0 : index
    %775 = vector.load %arg13[%774, %c0_219, %c0_220] : memref<8x8x128xf32, #tpu.memory_space<vmem>>, vector<1x8x128xf32>
    %776 = vector.shape_cast %775 : vector<1x8x128xf32> to vector<8x128xf32>
    %777 = vector.shape_cast %773 : vector<8x128xf32> to vector<1x8x128xf32>
    tpu.vector_store %arg13[%774, %c0_219, %c0_220], %777 {strides = array<i32>} : memref<8x8x128xf32, #tpu.memory_space<vmem>>, vector<1x8x128xf32>,
    %c8_i32 = arith.constant 8 : i32
    %c0_221 = arith.constant 0 : index
    %c0_222 = arith.constant 0 : index
    %778 = vector.load %arg14[%c0_221, %c0_222] : memref<8x128xf32, #tpu.memory_space<vmem>>, vector<8x128xf32>
    tpu.vector_store %arg14[%c0_221, %c0_222], %721 {strides = array<i32>} : memref<8x128xf32, #tpu.memory_space<vmem>>, vector<8x128xf32>,
    %c0_223 = arith.constant 0 : index
    %c0_224 = arith.constant 0 : index
    %779 = vector.load %arg15[%c0_223, %c0_224] : memref<8x128xf32, #tpu.memory_space<vmem>>, vector<8x128xf32>
    tpu.vector_store %arg15[%c0_223, %c0_224], %728 {strides = array<i32>} : memref<8x128xf32, #tpu.memory_space<vmem>>, vector<8x128xf32>,
    %c0_225 = arith.constant 0 : index
    %c0_226 = arith.constant 0 : index
    %780 = vector.load %arg16[%c0_225, %c0_226] : memref<8x1xf32, #tpu.memory_space<vmem>>, vector<8x1xf32>
    tpu.vector_store %arg16[%c0_225, %c0_226], %749 {strides = array<i32>} : memref<8x1xf32, #tpu.memory_space<vmem>>, vector<8x1xf32>,
    return
  }
  func.func @transform_0(%arg0: i32, %arg1: i32) -> (i32, i32, i32) {
    %c0_i32 = arith.constant 0 : i32
    %c0_i32_0 = arith.constant 0 : i32
    return %arg1, %arg0, %c0_i32 : i32, i32, i32
  }
  func.func @transform_1(%arg0: i32, %arg1: i32) -> (i32, i32) {
    %c0_i32 = arith.constant 0 : i32
    %c0_i32_0 = arith.constant 0 : i32
    return %arg0, %c0_i32 : i32, i32
  }
  func.func @transform_2(%arg0: i32, %arg1: i32) -> (i32, i32) {
    %c0_i32 = arith.constant 0 : i32
    %c0_i32_0 = arith.constant 0 : i32
    return %arg0, %c0_i32 : i32, i32
  }
  func.func @transform_3(%arg0: i32, %arg1: i32) -> (i32, i32) {
    %c0_i32 = arith.constant 0 : i32
    %c0_i32_0 = arith.constant 0 : i32
    return %arg0, %c0_i32 : i32, i32
  }
  func.func @transform_4(%arg0: i32, %arg1: i32) -> (i32, i32) {
    %c0_i32 = arith.constant 0 : i32
    %c0_i32_0 = arith.constant 0 : i32
    %c0_i32_1 = arith.constant 0 : i32
    return %c0_i32, %c0_i32_0 : i32, i32
  }
  func.func @transform_5(%arg0: i32, %arg1: i32) -> (i32, i32) {
    %c0_i32 = arith.constant 0 : i32
    %c0_i32_0 = arith.constant 0 : i32
    %c0_i32_1 = arith.constant 0 : i32
    return %c0_i32, %c0_i32_0 : i32, i32
  }
  func.func @transform_6(%arg0: i32, %arg1: i32) -> (i32, i32) {
    %c0_i32 = arith.constant 0 : i32
    %c0_i32_0 = arith.constant 0 : i32
    %c0_i32_1 = arith.constant 0 : i32
    return %c0_i32, %c0_i32_0 : i32, i32
  }
  func.func @transform_7(%arg0: i32, %arg1: i32) -> (i32, i32) {
    %c0_i32 = arith.constant 0 : i32
    %c0_i32_0 = arith.constant 0 : i32
    %c0_i32_1 = arith.constant 0 : i32
    return %c0_i32, %c0_i32_0 : i32, i32
  }
  func.func @transform_8(%arg0: i32, %arg1: i32) -> (i32, i32) {
    %c0_i32 = arith.constant 0 : i32
    %c0_i32_0 = arith.constant 0 : i32
    %c0_i32_1 = arith.constant 0 : i32
    return %c0_i32, %c0_i32_0 : i32, i32
  }
  func.func @transform_9(%arg0: i32, %arg1: i32) -> (i32, i32, i32) {
    %c0_i32 = arith.constant 0 : i32
    %c0_i32_0 = arith.constant 0 : i32
    return %arg1, %arg0, %c0_i32 : i32, i32, i32
  }
  func.func @transform_10(%arg0: i32, %arg1: i32) -> (i32, i32, i32) {
    %c0_i32 = arith.constant 0 : i32
    %c0_i32_0 = arith.constant 0 : i32
    return %arg1, %arg0, %c0_i32 : i32, i32, i32
  }
  func.func @transform_11(%arg0: i32, %arg1: i32) -> (i32, i32, i32) {
    %c0_i32 = arith.constant 0 : i32
    %c0_i32_0 = arith.constant 0 : i32
    return %arg1, %arg0, %c0_i32 : i32, i32, i32
  }
}

</mosaic_0001>

<bundles_post_ra>
// kernel: tpu_custom_call.1
= control target key start
LH: loop header
LB: loop body
LE: loop exit
PB: predicated region body
PF: predicated region fallthrough
CT: control target
= control target key end

     0   :  { %18 = vsyncpa [#allocation8], 0  ;;  %s4859_s0 = inlined_call_operand.hbm [shape: f32[8,8,128], index: 0, kind: input, shape index: {}]   ;;  %s4860_s1 = inlined_call_operand.vmem [shape: f32[8,128], index: 1, kind: input, shape index: {}]   ;;  %s4861_s2 = inlined_call_operand.vmem [shape: f32[8,128], index: 2, kind: input, shape index: {}]   ;;  %s4862_s3 = inlined_call_operand.vmem [shape: f32[8,1], index: 3, kind: input, shape index: {}]   ;;  %s4863_s4 = inlined_call_operand.hbm [shape: f32[128,512], index: 4, kind: input, shape index: {}]   ;;  %s4864_s5 = inlined_call_operand.hbm [shape: f32[128,512], index: 5, kind: input, shape index: {}]   ;;  %s4865_s6 = inlined_call_operand.vmem [shape: f32[1,512], index: 6, kind: input, shape index: {}]   ;;  %s4866_s7 = inlined_call_operand.vmem [shape: f32[1,128], index: 7, kind: input, shape index: {}]   ;;  %s4867_s8 = inlined_call_operand.<no memory space> [shape: f32[1,1], index: 8, kind: input, shape index: {}]   ;;  %s4868_s9 = inlined_call_operand.hbm [shape: f32[8,8,128], index: 9, kind: output, shape index: {0}]   ;;  %s4869_s10 = inlined_call_operand.hbm [shape: f32[8,8,128], index: 10, kind: output, shape index: {1}]   ;;  %s4870_s11 = inlined_call_operand.hbm [shape: f32[8,8,128], index: 11, kind: output, shape index: {2}]  }
   0x1   :  { %19 = vsyncpa [#allocation11], 0 }
   0x2   :  { %20 = vsyncpa [#allocation9], 0 }
   0x3   :  { %21 = vsyncpa [#allocation15], 0  ;;  %s3800_s17 = smov [#allocation10]   ;;  %s3660_s21 = scalar_lea.hbm %s4863_s4, 8192 }
   0x4   :  { %s45_s18 = sshll.u32 %s3800_s17, 4  ;;  %p3661_p0 = scmp.ne.s32.totalorder %s4863_s4, %s3660_s21  ;;  %s46_s18 = int_to_ptr.vmem [resolvable:$true] %s45_s18 }
   0x5   :  { %p3664_p1 = scmp.lt.u32.totalorder %s3660_s21, %s4863_s4 }
   0x7   :  { %p3666_p2 = pnand %p3664_p1, %p3661_p0 }
   0x9   :  { %3669 = shalt.err (!%p3666_p2)
}
   0xa   :  { %s3670_s26 = scalar_lea.vmem %s46_s18, 8192  ;;  %p3675_p4 = scmp.lt.s32.totalorder %s46_s18, %s46_s18 }
   0xb   :  { %p3671_p3 = scmp.ne.s32.totalorder %s46_s18, %s3670_s26  ;;  %p3676_p5 = scmp.lt.s32.totalorder %s3670_s26, %s3670_s26 }
   0xd   :  { %p3677_p6 = por %p3676_p5, %p3675_p4 }
   0xf   :  { %p3678_p7 = pnand %p3677_p6, %p3671_p3 }
  0x11   :  { %3681 = shalt.err (!%p3678_p7)
}
  0x12   :  { %s3801_s27 = smov 512   ;;  %s3802_s28 = smov 32  }
  0x13   :  { %51 = dma.hbm_to_vmem [thread:$0]  %s4863_s4, 8192, %s46_s18, [#allocation11], %s3801_s27, %s3801_s27, %s3802_s28  }
  0x14   :  { %s3803_s12 = smov [#allocation7]   ;;  %s3682_s16 = scalar_lea.hbm %s4859_s0, 1024 }
  0x15   :  { %s27_s13 = sshll.u32 %s3803_s12, 4  ;;  %p3683_p8 = scmp.ne.s32.totalorder %s4859_s0, %s3682_s16  ;;  %s28_s13 = int_to_ptr.vmem [resolvable:$true] %s27_s13 }
  0x16   :  { %p3686_p9 = scmp.lt.u32.totalorder %s3682_s16, %s4859_s0 }
  0x18   :  { %p3688_p10 = pnand %p3686_p9, %p3683_p8 }
  0x1a   :  { %3691 = shalt.err (!%p3688_p10)
}
  0x1b   :  { %s3692_s22 = scalar_lea.vmem %s28_s13, 1024  ;;  %p3697_p12 = scmp.lt.s32.totalorder %s28_s13, %s28_s13 }
  0x1c   :  { %p3693_p11 = scmp.ne.s32.totalorder %s28_s13, %s3692_s22  ;;  %p3698_p13 = scmp.lt.s32.totalorder %s3692_s22, %s3692_s22 }
  0x1e   :  { %p3699_p0 = por %p3698_p13, %p3697_p12 }
  0x20   :  { %p3700_p1 = pnand %p3699_p0, %p3693_p11 }
  0x22   :  { %3703 = shalt.err (!%p3700_p1)
}
  0x23   :  { %s3804_s4 = smov 128   ;;  %s3805_s18 = smov 8  }
  0x24   :  { %33 = dma.hbm_to_vmem [thread:$0]  %s4859_s0, 1024, %s28_s13, [#allocation8], %s3804_s4, %s3804_s4, %s3805_s18  }
  0x25   :  { %s3806_s25 = smov [#allocation12]   ;;  %s3704_s12 = scalar_lea.hbm %s4864_s5, 8192 }
  0x26   :  { %s57_s26 = sshll.u32 %s3806_s25, 4  ;;  %p3705_p2 = scmp.ne.s32.totalorder %s4864_s5, %s3704_s12  ;;  %s58_s26 = int_to_ptr.vmem [resolvable:$true] %s57_s26 }
  0x27   :  { %p3708_p3 = scmp.lt.u32.totalorder %s3704_s12, %s4864_s5 }
  0x29   :  { %p3710_p4 = pnand %p3708_p3, %p3705_p2 }
  0x2b   :  { %3713 = shalt.err (!%p3710_p4)
}
  0x2c   :  { %s3714_s19 = scalar_lea.vmem %s58_s26, 8192  ;;  %p3719_p6 = scmp.lt.s32.totalorder %s58_s26, %s58_s26 }
  0x2d   :  { %p3715_p5 = scmp.ne.s32.totalorder %s58_s26, %s3714_s19  ;;  %p3720_p7 = scmp.lt.s32.totalorder %s3714_s19, %s3714_s19 }
  0x2f   :  { %p3721_p8 = por %p3720_p7, %p3719_p6 }
  0x31   :  { %p3722_p9 = pnand %p3721_p8, %p3715_p5 }
  0x33   :  { %3725 = shalt.err (!%p3722_p9)
}
  0x34   :  { %63 = dma.hbm_to_vmem [thread:$0]  %s4864_s5, 8192, %s58_s26, [#allocation11], %s3801_s27, %s3801_s27, %s3802_s28  }
  0x35   :  { %3792 = dma.done.wait [#allocation8], 1024  }
  0x36   :  { %3793 = vsyncadd [#allocation8], 4294966272 }
  0x37   :  { %3794 = dma.done.wait [#allocation11], 16384  }
  0x38   :  { %3795 = vsyncadd [#allocation11], 4294950912  ;;  %v4873_v0 = vmov 0.0   ;;  %v3808_v1 = vmov 0   ;;  %v99_v2 = vld [vmem:[#allocation10 + $0x8] sm:$0xff]  ;;  %v101_v4 = vld [vmem:[#allocation10 + $0x18] sm:$0xff] }
  0x39   :  { %248 = vmatprep.mubr.f32.mxu0 %v4873_v0  ;;  %361 = vmatprep.mubr.f32.mxu1 %v4873_v0  ;;  %v103_v3 = vld [vmem:[#allocation10 + $0x28] sm:$0xff]  ;;  %v105_v6 = vld [vmem:[#allocation10 + $0x38] sm:$0xff]  ;;  %v98_v7 = vld [vmem:[#allocation10] sm:$0xff]  ;;  %vm88_vm0 = vcmask 7168   ;;  %s3810_s29 = smov [#allocation13]  }
  0x3a   :  { %3497 = vset.pattern.permute.xlu0 %v3808_v1  ;;  %3498 = vset.pattern.permute.xlu1 %v3808_v1  ;;  %v2837_v5 = vpack.c.bf16 %v103_v3, %v99_v2  ;;  %v102_v8 = vld [vmem:[#allocation10 + $0x20] sm:$0xff]  ;;  %v2869_v9 = vpack.c.bf16 %v105_v6, %v101_v4  ;;  %v100_v11 = vld [vmem:[#allocation10 + $0x10] sm:$0xff]  ;;  %v107_v13 = vld [vmem:[#allocation10 + $0x48] sm:$0xff]  ;;  %s2760_s30 = sshll.u32 %s3810_s29, 4  ;;  %s4800_s30 = int_to_ptr.vmem [resolvable:$true] %s2760_s30 }
  0x3b   :  { %v2839_v10 = vpack.c.bf16 %v102_v8, %v98_v7  ;;  %v104_v12 = vld [vmem:[#allocation10 + $0x30] sm:$0xff]  ;;  %v111_v15 = vld [vmem:[#allocation10 + $0x68] sm:$0xff]  ;;  %v109_v16 = vld [vmem:[#allocation10 + $0x58] sm:$0xff] }
  0x3c   :  { %2838 = vmatprep.subr.bf16.mxu0 %v2837_v5  ;;  %v2871_v14 = vpack.c.bf16 %v104_v12, %v100_v11  ;;  %v113_v17 = vld [vmem:[#allocation10 + $0x78] sm:$0xff]  ;;  %2870 = vmatprep.subr.bf16.mxu1 %v2869_v9  ;;  %v2841_v18 = vpack.c.bf16 %v111_v15, %v107_v13  ;;  %v106_v20 = vld [vmem:[#allocation10 + $0x40] sm:$0xff]  ;;  %v108_v22 = vld [vmem:[#allocation10 + $0x50] sm:$0xff] }
  0x3d   :  { %2840 = vmatpush1.bf16.msra.mxu0 %v2839_v10  ;;  %v2873_v19 = vpack.c.bf16 %v113_v17, %v109_v16  ;;  %v110_v21 = vld [vmem:[#allocation10 + $0x60] sm:$0xff]  ;;  %v112_v24 = vld [vmem:[#allocation10 + $0x70] sm:$0xff]  ;;  %v115_v25 = vld [vmem:[#allocation10 + $0x88] sm:$0xff] }
  0x3e   :  { %2872 = vmatpush1.bf16.msra.mxu1 %v2871_v14  ;;  %v2843_v23 = vpack.c.bf16 %v110_v21, %v106_v20  ;;  %v119_v26 = vld [vmem:[#allocation10 + $0xa8] sm:$0xff]  ;;  %2842 = vmatprep.subr.bf16.mxu0 %v2841_v18  ;;  %v2875_v27 = vpack.c.bf16 %v112_v24, %v108_v22  ;;  %v117_v29 = vld [vmem:[#allocation10 + $0x98] sm:$0xff]  ;;  %v114_v31 = vld [vmem:[#allocation10 + $0x80] sm:$0xff] }
  0x3f   :  { %2874 = vmatprep.subr.bf16.mxu1 %v2873_v19  ;;  %v2845_v28 = vpack.c.bf16 %v119_v26, %v115_v25  ;;  %v121_v30 = vld [vmem:[#allocation10 + $0xb8] sm:$0xff]  ;;  %v118_v33 = vld [vmem:[#allocation10 + $0xa0] sm:$0xff]  ;;  %v116_v34 = vld [vmem:[#allocation10 + $0x90] sm:$0xff] }
  0x40   :  { %v2877_v32 = vpack.c.bf16 %v121_v30, %v117_v29  ;;  %v120_v35 = vld [vmem:[#allocation10 + $0xb0] sm:$0xff]  ;;  %v2847_v36 = vpack.c.bf16 %v118_v33, %v114_v31  ;;  %v123_v37 = vld [vmem:[#allocation10 + $0xc8] sm:$0xff]  ;;  %v125_v39 = vld [vmem:[#allocation10 + $0xd8] sm:$0xff] }
  0x41   :  { %2844 = vmatpush1.bf16.msra.mxu0 %v2843_v23  ;;  %v127_v38 = vld [vmem:[#allocation10 + $0xe8] sm:$0xff]  ;;  %v2879_v40 = vpack.c.bf16 %v120_v35, %v116_v34  ;;  %v129_v42 = vld [vmem:[#allocation10 + $0xf8] sm:$0xff]  ;;  %v122_v43 = vld [vmem:[#allocation10 + $0xc0] sm:$0xff] }
  0x42   :  { %2876 = vmatpush1.bf16.msra.mxu1 %v2875_v27  ;;  %2846 = vmatprep.subr.bf16.mxu0 %v2845_v28  ;;  %v2849_v41 = vpack.c.bf16 %v127_v38, %v123_v37  ;;  %v126_v44 = vld [vmem:[#allocation10 + $0xe0] sm:$0xff]  ;;  %v2881_v45 = vpack.c.bf16 %v129_v42, %v125_v39  ;;  %v124_v46 = vld [vmem:[#allocation10 + $0xd0] sm:$0xff]  ;;  %v131_v48 = vld [vmem:[#allocation10 + $0x108] sm:$0xff] }
  0x43   :  { %2878 = vmatprep.subr.bf16.mxu1 %v2877_v32  ;;  %v128_v47 = vld [vmem:[#allocation10 + $0xf0] sm:$0xff]  ;;  %v135_v49 = vld [vmem:[#allocation10 + $0x128] sm:$0xff]  ;;  %v133_v50 = vld [vmem:[#allocation10 + $0x118] sm:$0xff]  ;;  %v2851_v52 = vpack.c.bf16 %v126_v44, %v122_v43 }
  0x44   :  { %v137_v51 = vld [vmem:[#allocation10 + $0x138] sm:$0xff]  ;;  %v2883_v53 = vpack.c.bf16 %v128_v47, %v124_v46  ;;  %v2853_v54 = vpack.c.bf16 %v135_v49, %v131_v48  ;;  %v130_v55 = vld [vmem:[#allocation10 + $0x100] sm:$0xff]  ;;  %v132_v57 = vld [vmem:[#allocation10 + $0x110] sm:$0xff] }
  0x45   :  { %2848 = vmatpush1.bf16.msra.mxu0 %v2847_v36  ;;  %v134_v56 = vld [vmem:[#allocation10 + $0x120] sm:$0xff]  ;;  %v2885_v58 = vpack.c.bf16 %v137_v51, %v133_v50  ;;  %v136_v59 = vld [vmem:[#allocation10 + $0x130] sm:$0xff]  ;;  %v139_v60 = vld [vmem:[#allocation10 + $0x148] sm:$0xff] }
  0x46   :  { %2880 = vmatpush1.bf16.msra.mxu1 %v2879_v40  ;;  %2850 = vmatprep.subr.bf16.mxu0 %v2849_v41  ;;  %v143_v61 = vld [vmem:[#allocation10 + $0x168] sm:$0xff]  ;;  %v141_v62 = vld [vmem:[#allocation10 + $0x158] sm:$0xff]  ;;  %v2855_v1 = vpack.c.bf16 %v134_v56, %v130_v55  ;;  %v2887_v2 = vpack.c.bf16 %v136_v59, %v132_v57  ;;  %v138_v4 = vld [vmem:[#allocation10 + $0x140] sm:$0xff] }
  0x47   :  { %2882 = vmatprep.subr.bf16.mxu1 %v2881_v45  ;;  %v145_v63 = vld [vmem:[#allocation10 + $0x178] sm:$0xff]  ;;  %v2857_v3 = vpack.c.bf16 %v143_v61, %v139_v60  ;;  %v142_v5 = vld [vmem:[#allocation10 + $0x160] sm:$0xff]  ;;  %v140_v6 = vld [vmem:[#allocation10 + $0x150] sm:$0xff] }
  0x48   :  { %v2889_v7 = vpack.c.bf16 %v145_v63, %v141_v62  ;;  %v144_v8 = vld [vmem:[#allocation10 + $0x170] sm:$0xff]  ;;  %v147_v9 = vld [vmem:[#allocation10 + $0x188] sm:$0xff]  ;;  %v149_v11 = vld [vmem:[#allocation10 + $0x198] sm:$0xff]  ;;  %v2859_v13 = vpack.c.bf16 %v142_v5, %v138_v4 }
  0x49   :  { %2852 = vmatpush1.bf16.msra.mxu0 %v2851_v52  ;;  %v151_v10 = vld [vmem:[#allocation10 + $0x1a8] sm:$0xff]  ;;  %v153_v12 = vld [vmem:[#allocation10 + $0x1b8] sm:$0xff]  ;;  %v2891_v14 = vpack.c.bf16 %v144_v8, %v140_v6  ;;  %v146_v16 = vld [vmem:[#allocation10 + $0x180] sm:$0xff] }
  0x4a   :  { %2884 = vmatpush1.bf16.msra.mxu1 %v2883_v53  ;;  %2854 = vmatprep.subr.bf16.mxu0 %v2853_v54  ;;  %v2861_v15 = vpack.c.bf16 %v151_v10, %v147_v9  ;;  %v150_v17 = vld [vmem:[#allocation10 + $0x1a0] sm:$0xff]  ;;  %v148_v18 = vld [vmem:[#allocation10 + $0x190] sm:$0xff]  ;;  %v2893_v19 = vpack.c.bf16 %v153_v12, %v149_v11  ;;  %v155_v21 = vld [vmem:[#allocation10 + $0x1c8] sm:$0xff] }
  0x4b   :  { %2886 = vmatprep.subr.bf16.mxu1 %v2885_v58  ;;  %v152_v20 = vld [vmem:[#allocation10 + $0x1b0] sm:$0xff]  ;;  %v159_v22 = vld [vmem:[#allocation10 + $0x1e8] sm:$0xff]  ;;  %v157_v23 = vld [vmem:[#allocation10 + $0x1d8] sm:$0xff]  ;;  %v2863_v25 = vpack.c.bf16 %v150_v17, %v146_v16 }
  0x4c   :  { %v161_v24 = vld [vmem:[#allocation10 + $0x1f8] sm:$0xff]  ;;  %v2895_v26 = vpack.c.bf16 %v152_v20, %v148_v18  ;;  %v2865_v27 = vpack.c.bf16 %v159_v22, %v155_v21  ;;  %v154_v28 = vld [vmem:[#allocation10 + $0x1c0] sm:$0xff]  ;;  %v156_v30 = vld [vmem:[#allocation10 + $0x1d0] sm:$0xff] }
  0x4d   :  { %2856 = vmatpush1.bf16.msra.mxu0 %v2855_v1  ;;  %v158_v29 = vld [vmem:[#allocation10 + $0x1e0] sm:$0xff]  ;;  %v2897_v31 = vpack.c.bf16 %v161_v24, %v157_v23  ;;  %v160_v32 = vld [vmem:[#allocation10 + $0x1f0] sm:$0xff]  ;;  %v455_v33 = vld [vmem:[#allocation12 + $0x8] sm:$0xff] }
  0x4e   :  { %2888 = vmatpush1.bf16.msra.mxu1 %v2887_v2  ;;  %2858 = vmatprep.subr.bf16.mxu0 %v2857_v3  ;;  %v459_v34 = vld [vmem:[#allocation12 + $0x28] sm:$0xff]  ;;  %v457_v35 = vld [vmem:[#allocation12 + $0x18] sm:$0xff]  ;;  %v2867_v37 = vpack.c.bf16 %v158_v29, %v154_v28  ;;  %v2899_v38 = vpack.c.bf16 %v160_v32, %v156_v30  ;;  %v454_v40 = vld [vmem:[#allocation12] sm:$0xff] }
  0x4f   :  { %2890 = vmatprep.subr.bf16.mxu1 %v2889_v7  ;;  %v461_v36 = vld [vmem:[#allocation12 + $0x38] sm:$0xff]  ;;  %v3919_v39 = vpack.c.bf16 %v459_v34, %v455_v33  ;;  %v458_v41 = vld [vmem:[#allocation12 + $0x20] sm:$0xff]  ;;  %v456_v43 = vld [vmem:[#allocation12 + $0x10] sm:$0xff] }
  0x50   :  { %v3921_v42 = vpack.c.bf16 %v461_v36, %v457_v35  ;;  %v460_v44 = vld [vmem:[#allocation12 + $0x30] sm:$0xff]  ;;  %v463_v45 = vld [vmem:[#allocation12 + $0x48] sm:$0xff]  ;;  %v90_v47 = vld [vmem:[#allocation7] sm:$0xff]  ;;  %v3923_v48 = vpack.c.bf16 %v458_v41, %v454_v40 }
  0x51   :  { %2860 = vmatpush1.bf16.msra.mxu0 %v2859_v13  ;;  %v467_v46 = vld [vmem:[#allocation12 + $0x68] sm:$0xff]  ;;  %v465_v49 = vld [vmem:[#allocation12 + $0x58] sm:$0xff]  ;;  %v3926_v51 = vpack.c.bf16 %v460_v44, %v456_v43  ;;  %v462_v52 = vld [vmem:[#allocation12 + $0x40] sm:$0xff] }
  0x52   :  { %2892 = vmatpush1.bf16.msra.mxu1 %v2891_v14  ;;  %2862 = vmatprep.subr.bf16.mxu0 %v2861_v15  ;;  %v469_v50 = vld [vmem:[#allocation12 + $0x78] sm:$0xff]  ;;  %v466_v53 = vld [vmem:[#allocation12 + $0x60] sm:$0xff]  ;;  %v3929_v54 = vpack.c.bf16 %v467_v46, %v463_v45  ;;  %v464_v55 = vld [vmem:[#allocation12 + $0x50] sm:$0xff] }
  0x53   :  { %2894 = vmatprep.subr.bf16.mxu1 %v2893_v19  ;;  %v468_v56 = vld [vmem:[#allocation12 + $0x70] sm:$0xff]  ;;  %v3931_v57 = vpack.c.bf16 %v469_v50, %v465_v49  ;;  %v471_v58 = vld [vmem:[#allocation12 + $0x88] sm:$0xff]  ;;  %v3934_v61 = vpack.c.bf16 %v466_v53, %v462_v52  ;;  %v473_v62 = vld [vmem:[#allocation12 + $0x98] sm:$0xff] }
  0x54   :  { %v475_v59 = vld [vmem:[#allocation12 + $0xa8] sm:$0xff]  ;;  %v477_v63 = vld [vmem:[#allocation12 + $0xb8] sm:$0xff]  ;;  %v3938_v1 = vpack.c.bf16 %v468_v56, %v464_v55  ;;  %v470_v2 = vld [vmem:[#allocation12 + $0x80] sm:$0xff] }
  0x55   :  { %2864 = vmatpush1.bf16.msra.mxu0 %v2863_v25  ;;  %v91_v60 = vld [vmem:[#allocation7 + $0x8] sm:$0xff]  ;;  %v474_v3 = vld [vmem:[#allocation12 + $0xa0] sm:$0xff]  ;;  %v3942_v4 = vpack.c.bf16 %v475_v59, %v471_v58  ;;  %v472_v5 = vld [vmem:[#allocation12 + $0x90] sm:$0xff]  ;;  %v3945_v7 = vpack.c.bf16 %v477_v63, %v473_v62 }
  0x56   :  { %2896 = vmatpush1.bf16.msra.mxu1 %v2895_v26  ;;  %2866 = vmatprep.subr.bf16.mxu0 %v2865_v27  ;;  %v476_v6 = vld [vmem:[#allocation12 + $0xb0] sm:$0xff]  ;;  %v479_v8 = vld [vmem:[#allocation12 + $0xc8] sm:$0xff]  ;;  %v3948_v11 = vpack.c.bf16 %v474_v3, %v470_v2  ;;  %v481_v12 = vld [vmem:[#allocation12 + $0xd8] sm:$0xff] }
  0x57   :  { %2898 = vmatprep.subr.bf16.mxu1 %v2897_v31  ;;  %v483_v9 = vld [vmem:[#allocation12 + $0xe8] sm:$0xff]  ;;  %v92_v10 = vld [vmem:[#allocation7 + $0x10] sm:$0xff]  ;;  %v485_v13 = vld [vmem:[#allocation12 + $0xf8] sm:$0xff]  ;;  %v3952_v14 = vpack.c.bf16 %v476_v6, %v472_v5 }
  0x58   :  { %v478_v15 = vld [vmem:[#allocation12 + $0xc0] sm:$0xff]  ;;  %v3956_v17 = vpack.c.bf16 %v483_v9, %v479_v8  ;;  %v480_v18 = vld [vmem:[#allocation12 + $0xd0] sm:$0xff]  ;;  %v3959_v20 = vpack.c.bf16 %v485_v13, %v481_v12  ;;  %v487_v21 = vld [vmem:[#allocation12 + $0x108] sm:$0xff] }
  0x59   :  { %2868 = vmatpush1.bf16.msra.mxu0 %v2867_v37  ;;  %v482_v16 = vld [vmem:[#allocation12 + $0xe0] sm:$0xff]  ;;  %v484_v19 = vld [vmem:[#allocation12 + $0xf0] sm:$0xff]  ;;  %v491_v22 = vld [vmem:[#allocation12 + $0x128] sm:$0xff] }
  0x5a   :  { %2900 = vmatpush1.bf16.msra.mxu1 %v2899_v38  ;;  %2902 = vmatprep.subr.bf16.mxu0 %v3919_v39  ;;  %v93_v23 = vld [vmem:[#allocation7 + $0x18] sm:$0xff]  ;;  %v3962_v24 = vpack.c.bf16 %v482_v16, %v478_v15  ;;  %v3966_v27 = vpack.c.bf16 %v484_v19, %v480_v18  ;;  %v486_v28 = vld [vmem:[#allocation12 + $0x100] sm:$0xff]  ;;  %v3973_v31 = vpack.c.bf16 %v491_v22, %v487_v21  ;;  %v488_v32 = vld [vmem:[#allocation12 + $0x110] sm:$0xff] }
  0x5b   :  { %2934 = vmatprep.subr.bf16.mxu1 %v3921_v42  ;;  %v489_v25 = vld [vmem:[#allocation12 + $0x118] sm:$0xff]  ;;  %v490_v29 = vld [vmem:[#allocation12 + $0x120] sm:$0xff]  ;;  %v492_v33 = vld [vmem:[#allocation12 + $0x130] sm:$0xff] }
  0x5c   :  { %249 = vmatmul.mubr.f32.vlgmr.msra.gmra.mrb[0].mxu0 %v90_v47  ;;  %v493_v26 = vld [vmem:[#allocation12 + $0x138] sm:$0xff]  ;;  %v495_v35 = vld [vmem:[#allocation12 + $0x148] sm:$0xff]  ;;  %v94_v37 = vld [vmem:[#allocation7 + $0x20] sm:$0xff]  ;;  %v3980_v38 = vpack.c.bf16 %v490_v29, %v486_v28  ;;  %v3984_v43 = vpack.c.bf16 %v492_v33, %v488_v32 }
  0x5d   :  { %362 = vmatmul.mubr.f32.vlgmr.msra.gmra.mrb[0].mxu1 %v90_v47  ;;  %2904 = vmatpush1.bf16.msra.mxu0 %v3923_v48  ;;  %v87_v30 = vld [vmem:[%s4862_s3] sm:$0xff]  ;;  %v3977_v34 = vpack.c.bf16 %v493_v26, %v489_v25  ;;  %v499_v36 = vld [vmem:[#allocation12 + $0x168] sm:$0xff]  ;;  %v494_v44 = vld [vmem:[#allocation12 + $0x140] sm:$0xff] }
  0x5e   :  { %2936 = vmatpush1.bf16.msra.mxu1 %v3926_v51  ;;  %254 = vmatprep.mubr.f32.mxu0 %v4873_v0  ;;  %89 = vst.msk [vmem:[#allocation4] sm:$0xff] %vm88_vm0, %v87_v30  ;;  %v497_v40 = vld [vmem:[#allocation12 + $0x158] sm:$0xff]  ;;  %v498_v45 = vld [vmem:[#allocation12 + $0x160] sm:$0xff]  ;;  %v3988_v46 = vpack.c.bf16 %v499_v36, %v495_v35  ;;  %v496_v47 = vld [vmem:[#allocation12 + $0x150] sm:$0xff]  ;;  %v4871_v36 = vlaneseq }
  0x5f   :  { %367 = vmatprep.mubr.f32.mxu1 %v4873_v0  ;;  %2906 = vmatprep.subr.bf16.mxu0 %v3929_v54  ;;  %v501_v41 = vld [vmem:[#allocation12 + $0x178] sm:$0xff]  ;;  %v500_v49 = vld [vmem:[#allocation12 + $0x170] sm:$0xff]  ;;  %v503_v52 = vld [vmem:[#allocation12 + $0x188] sm:$0xff]  ;;  %v3994_v56 = vpack.c.bf16 %v498_v45, %v494_v44 }
  0x60   :  { %255 = vmatmul.mubr.f32.gmra.mrb[2].mxu0 %v91_v60  ;;  %2938 = vmatprep.subr.bf16.mxu1 %v3931_v57  ;;  %v3991_v50 = vpack.c.bf16 %v501_v41, %v497_v40  ;;  %v507_v53 = vld [vmem:[#allocation12 + $0x1a8] sm:$0xff]  ;;  %v505_v58 = vld [vmem:[#allocation12 + $0x198] sm:$0xff]  ;;  %v502_v62 = vld [vmem:[#allocation12 + $0x180] sm:$0xff] }
  0x61   :  { %368 = vmatmul.mubr.f32.gmra.mrb[2].mxu1 %v91_v60  ;;  %2908 = vmatpush1.bf16.msra.mxu0 %v3934_v61  ;;  %v95_v55 = vld [vmem:[#allocation7 + $0x28] sm:$0xff]  ;;  %v509_v59 = vld [vmem:[#allocation12 + $0x1b8] sm:$0xff]  ;;  %v3998_v60 = vpack.c.bf16 %v500_v49, %v496_v47  ;;  %v506_v63 = vld [vmem:[#allocation12 + $0x1a0] sm:$0xff]  ;;  %v4002_v2 = vpack.c.bf16 %v507_v53, %v503_v52 }
  0x62   :  { %2940 = vmatpush1.bf16.msra.mxu1 %v3938_v1  ;;  %260 = vmatprep.mubr.f32.mxu0 %v4873_v0  ;;  %v504_v3 = vld [vmem:[#allocation12 + $0x190] sm:$0xff]  ;;  %v4005_v6 = vpack.c.bf16 %v509_v59, %v505_v58  ;;  %v511_v8 = vld [vmem:[#allocation12 + $0x1c8] sm:$0xff]  ;;  %v4008_v12 = vpack.c.bf16 %v506_v63, %v502_v62  ;;  %v513_v13 = vld [vmem:[#allocation12 + $0x1d8] sm:$0xff] }
  0x63   :  { %373 = vmatprep.mubr.f32.mxu1 %v4873_v0  ;;  %2910 = vmatprep.subr.bf16.mxu0 %v3942_v4  ;;  %v508_v5 = vld [vmem:[#allocation12 + $0x1b0] sm:$0xff]  ;;  %v515_v9 = vld [vmem:[#allocation12 + $0x1e8] sm:$0xff]  ;;  %v517_v15 = vld [vmem:[#allocation12 + $0x1f8] sm:$0xff] }
  0x64   :  { %261 = vmatmul.mubr.f32.gmra.mrb[4].mxu0 %v92_v10  ;;  %2942 = vmatprep.subr.bf16.mxu1 %v3945_v7  ;;  %v4012_v16 = vpack.c.bf16 %v508_v5, %v504_v3  ;;  %v510_v18 = vld [vmem:[#allocation12 + $0x1c0] sm:$0xff]  ;;  %v4016_v21 = vpack.c.bf16 %v515_v9, %v511_v8  ;;  %v512_v22 = vld [vmem:[#allocation12 + $0x1d0] sm:$0xff]  ;;  %v4019_v25 = vpack.c.bf16 %v517_v15, %v513_v13  ;;  %v97_v28 = vld [vmem:[#allocation7 + $0x38] sm:$0xff] }
  0x65   :  { %374 = vmatmul.mubr.f32.gmra.mrb[4].mxu1 %v92_v10  ;;  %2912 = vmatpush1.bf16.msra.mxu0 %v3948_v11  ;;  %v96_v10 = vld [vmem:[#allocation7 + $0x30] sm:$0xff]  ;;  %v514_v19 = vld [vmem:[#allocation12 + $0x1e0] sm:$0xff]  ;;  %v4021_v26 = vld [vmem:[#allocation4] sm:$0xff] }
  0x66   :  { %2944 = vmatpush1.bf16.msra.mxu1 %v3952_v14  ;;  %266 = vmatprep.mubr.f32.mxu0 %v4873_v0  ;;  %v4024_v29 = vpack.c.bf16 %v514_v19, %v510_v18  ;;  %v4033_v32 = vround.rtne.f32 %v4021_v26  ;;  %v4040_v33 = vld [vmem:[%s4860_s1] sm:$0xff] }
  0x67   :  { %379 = vmatprep.mubr.f32.mxu1 %v4873_v0  ;;  %2914 = vmatprep.subr.bf16.mxu0 %v3956_v17  ;;  %v162_v41 = vld [vmem:[%s4865_s6] sm:$0xf] }
  0x68   :  { %267 = vmatmul.mubr.f32.gmra.mrb[6].mxu0 %v93_v23  ;;  %2946 = vmatprep.subr.bf16.mxu1 %v3959_v20  ;;  %v694_v35 = vsub.f32 1.0, %v4033_v32 }
  0x69   :  { %380 = vmatmul.mubr.f32.gmra.mrb[6].mxu1 %v93_v23  ;;  %2916 = vmatpush1.bf16.msra.mxu0 %v3962_v24  ;;  %v516_v23 = vld [vmem:[#allocation12 + $0x1f0] sm:$0xff] }
  0x6a   :  { %2948 = vmatpush1.bf16.msra.mxu1 %v3966_v27  ;;  %272 = vmatprep.mubr.f32.mxu0 %v4873_v0  ;;  %v4028_v30 = vpack.c.bf16 %v516_v23, %v512_v22  ;;  %v85_v23 = vld [vmem:[%s4861_s2] sm:$0xff] }
  0x6b   :  { %385 = vmatprep.mubr.f32.mxu1 %v4873_v0  ;;  %2918 = vmatprep.subr.bf16.mxu0 %v3973_v31 }
  0x6c   :  { %273 = vmatmul.mubr.f32.gmra.mrb[8].mxu0 %v94_v37  ;;  %2950 = vmatprep.subr.bf16.mxu1 %v3977_v34 }
  0x6d   :  { %386 = vmatmul.mubr.f32.gmra.mrb[8].mxu1 %v94_v37  ;;  %2920 = vmatpush1.bf16.msra.mxu0 %v3980_v38  ;;  %v165_v37 = vshrl.u32 %v4871_v36, 7 }
  0x6e   :  { %2952 = vmatpush1.bf16.msra.mxu1 %v3984_v43  ;;  %278 = vmatprep.mubr.f32.mxu0 %v4873_v0 }
  0x6f   :  { %391 = vmatprep.mubr.f32.mxu1 %v4873_v0  ;;  %2922 = vmatprep.subr.bf16.mxu0 %v3988_v46  ;;  %v166_v40 = vsub.s32 0, %v165_v37  ;;  %v170_v44 = vsub.s32 1, %v165_v37  ;;  %v174_v53 = vsub.s32 2, %v165_v37  ;;  %v178_v3 = vsub.s32 3, %v165_v37 }
  0x70   :  { %279 = vmatmul.mubr.f32.gmra.mrb[10].mxu0 %v95_v55  ;;  %2954 = vmatprep.subr.bf16.mxu1 %v3991_v50 }
  0x71   :  { %392 = vmatmul.mubr.f32.gmra.mrb[10].mxu1 %v95_v55  ;;  %2924 = vmatpush1.bf16.msra.mxu0 %v3994_v56  ;;  %v4091_v45 = vrot.slane %v162_v41, %v166_v40  ;;  %v4093_v47 = vrot.slane %v162_v41, %v170_v44  ;;  %v4097_v63 = vrot.slane %v162_v41, %v174_v53 }
  0x72   :  { %2956 = vmatpush1.bf16.msra.mxu1 %v3998_v60  ;;  %284 = vmatprep.mubr.f32.mxu0 %v4873_v0  ;;  %v4100_v8 = vrot.slane %v162_v41, %v178_v3 }
  0x73   :  { %397 = vmatprep.mubr.f32.mxu1 %v4873_v0  ;;  %2926 = vmatprep.subr.bf16.mxu0 %v4002_v2 }
  0x74   :  { %285 = vmatmul.mubr.f32.gmra.mrb[12].mxu0 %v96_v10  ;;  %2958 = vmatprep.subr.bf16.mxu1 %v4005_v6 }
  0x75   :  { %398 = vmatmul.mubr.f32.gmra.mrb[12].mxu1 %v96_v10  ;;  %2928 = vmatpush1.bf16.msra.mxu0 %v4008_v12 }
  0x76   :  { %2960 = vmatpush1.bf16.msra.mxu1 %v4012_v16  ;;  %290 = vmatprep.mubr.f32.mxu0 %v4873_v0 }
  0x77   :  { %403 = vmatprep.mubr.f32.mxu1 %v4873_v0  ;;  %2930 = vmatprep.subr.bf16.mxu0 %v4016_v21 }
  0x78   :  { %291 = vmatmul.mubr.f32.gmra.mrb[14].mxu0 %v97_v28  ;;  %2962 = vmatprep.subr.bf16.mxu1 %v4019_v25 }
  0x79   :  { %404 = vmatmul.mubr.f32.gmra.mrb[14].mxu1 %v97_v28  ;;  %2932 = vmatpush1.bf16.msra.mxu0 %v4024_v29 }
  0x7a   :  { %2964 = vmatpush1.bf16.msra.mxu1 %v4028_v30  ;;  %582 = vmatprep.mubr.f32.mxu0 %v4873_v0 }
  0x7b   :  { %653 = vmatprep.mubr.f32.mxu1 %v4873_v0  ;;  %690 = vperm.xlu0 %3497, %v4033_v32  }
  0x7c   :  { %583 = vmatmul.mubr.f32.vlgmr.msra.gmra.mrb[0].mxu0 %v4040_v33  ;;  %2966 = vmatprep.subr.bf16.mxu0 %v3919_v39 }
  0x7d   :  { %654 = vmatmul.mubr.f32.vlgmr.msra.gmra.mrb[0].mxu1 %v4040_v33  ;;  %2998 = vmatprep.subr.bf16.mxu1 %v3921_v42 }
  0x7e   :  { %2968 = vmatpush1.bf16.msra.mxu0 %v3923_v48  ;;  %3000 = vmatpush1.bf16.msra.mxu1 %v3926_v51 }
  0x7f   :  { %697 = vperm.xlu0 %3497, %v694_v35   ;;  %2970 = vmatprep.subr.bf16.mxu0 %v3929_v54 }
  0x80   :  { %3002 = vmatprep.subr.bf16.mxu1 %v3931_v57  ;;  %876 = vmatprep.mubr.f32.mxu0 %v4873_v0 }
  0x81   :  { %947 = vmatprep.mubr.f32.mxu1 %v4873_v0 }
  0x82   :  { %2972 = vmatpush1.bf16.msra.mxu0 %v3934_v61  ;;  %3004 = vmatpush1.bf16.msra.mxu1 %v3938_v1 }
  0x83   :  { %2974 = vmatprep.subr.bf16.mxu0 %v3942_v4  ;;  %3006 = vmatprep.subr.bf16.mxu1 %v3945_v7 }
  0x86   :  { %2976 = vmatpush1.bf16.msra.mxu0 %v3948_v11  ;;  %3008 = vmatpush1.bf16.msra.mxu1 %v3952_v14 }
  0x87   :  { %2978 = vmatprep.subr.bf16.mxu0 %v3956_v17  ;;  %3010 = vmatprep.subr.bf16.mxu1 %v3959_v20 }
  0x8a   :  { %2980 = vmatpush1.bf16.msra.mxu0 %v3962_v24  ;;  %3012 = vmatpush1.bf16.msra.mxu1 %v3966_v27 }
  0x8b   :  { %2982 = vmatprep.subr.bf16.mxu0 %v3973_v31  ;;  %3014 = vmatprep.subr.bf16.mxu1 %v3977_v34 }
  0x8e   :  { %2984 = vmatpush1.bf16.msra.mxu0 %v3980_v38  ;;  %3016 = vmatpush1.bf16.msra.mxu1 %v3984_v43 }
  0x8f   :  { %2986 = vmatprep.subr.bf16.mxu0 %v3988_v46  ;;  %3018 = vmatprep.subr.bf16.mxu1 %v3991_v50 }
  0x92   :  { %2988 = vmatpush1.bf16.msra.mxu0 %v3994_v56  ;;  %3020 = vmatpush1.bf16.msra.mxu1 %v3998_v60 }
  0x93   :  { %2990 = vmatprep.subr.bf16.mxu0 %v4002_v2  ;;  %3022 = vmatprep.subr.bf16.mxu1 %v4005_v6 }
  0x96   :  { %2992 = vmatpush1.bf16.msra.mxu0 %v4008_v12  ;;  %3024 = vmatpush1.bf16.msra.mxu1 %v4012_v16 }
  0x97   :  { %2994 = vmatprep.subr.bf16.mxu0 %v4016_v21  ;;  %3026 = vmatprep.subr.bf16.mxu1 %v4019_v25 }
  0x9a   :  { %2996 = vmatpush1.bf16.msra.mxu0 %v4024_v29  ;;  %3028 = vmatpush1.bf16.msra.mxu1 %v4028_v30 }
  0x9b   :  { %3030 = vmatprep.subr.bf16.mxu0 %v3919_v39  ;;  %3062 = vmatprep.subr.bf16.mxu1 %v3921_v42 }
  0xfa   :  { %v4103_v22 = vpop.permute.xlu0 %690 }
  0xfe   :  { %v698_v53 = vpop.permute.xlu0 %697 }
 0x14f   :  { %v584_v49 = vpop.f32.mrb[0].mxu0 }
 0x150   :  { %v3413_v52 = vadd.f32 %v584_v49, %v4091_v45  ;;  %v655_v39 = vpop.f32.mrb[0].mxu1  ;;  %v586_v55 = vpop.f32.mrb[1].mxu0 }
 0x151   :  { %v3414_v42 = vadd.f32 %v586_v55, %v4093_v47  ;;  %v657_v58 = vpop.f32.mrb[1].mxu1  ;;  %v3429_v5 = vadd.f32 %v655_v39, %v4097_v63 }
 0x152   :  { %v2804_v59 = vmul.f32 -1.442695, %v3413_v52  ;;  %v3430_v13 = vadd.f32 %v657_v58, %v4100_v8  ;;  %v4112_v58 = vld [vmem:[%s4866_s7] ss:$0 sm:$0xff] }
 0x153   :  { %v2805_v62 = vmul.f32 -1.442695, %v3414_v42  ;;  %v2806_v9 = vmul.f32 -1.442695, %v3429_v5  ;;  %v703_v42 = vmul.f32 %v698_v53, %v85_v23 }
 0x154   :  { %3499 = vpow2.f32 %v2804_v59 }
 0x155   :  { %3501 = vpow2.f32 %v2805_v62 }
 0x156   :  { %3503 = vpow2.f32 %v2806_v9 }
 0x15e   :  { %v3500_v10 = vpop.eup %3499 }
 0x15f   :  { %v667_v15 = vadd.f32 1.0, %v3500_v10  ;;  %v3502_v18 = vpop.eup %3501  ;;  %v700_v10 = vmul.f32 %v698_v53, %v4040_v33 }
 0x160   :  { %v673_v19 = vadd.f32 1.0, %v3502_v18  ;;  %v3504_v28 = vpop.eup %3503 }
 0x161   :  { %3505 = vrcp.f32 %v667_v15  ;;  %v679_v49 = vadd.f32 1.0, %v3504_v28 }
 0x162   :  { %3507 = vtanh.f32 %v3430_v13 }
 0x163   :  { %3509 = vrcp.f32 %v673_v19 }
 0x164   :  { %3511 = vrcp.f32 %v679_v49 }
 0x16b   :  { %v3506_v37 = vpop.eup %3505 }
 0x16c   :  { %v3508_v40 = vpop.eup %3507  ;;  %v683_v41 = vmul.f32 %v3506_v37, %v85_v23 }
 0x16d   :  { %v3510_v44 = vpop.eup %3509 }
 0x16e   :  { %v684_v52 = vmul.f32 %v3510_v44, %v3508_v40  ;;  %v3512_v3 = vpop.eup %3511 }
 0x170   :  { %v685_v39 = vadd.f32 %v684_v52, %v683_v41 }
 0x172   :  { %3513 = vtanh.f32 %v685_v39  ;;  %v702_v55 = vmul.f32 %v4103_v22, %v685_v39 }
 0x174   :  { %v4114_v59 = vadd.f32 %v703_v42, %v702_v55 }
 0x176   :  { %729 = vst [vmem:[#allocation14] sm:$0xff] %v4114_v59  ;;  %v711_v62 = vmul.f32 %v4112_v58, %v4114_v59 }
 0x178   :  { %712 = vadd.xlane.f32.xlu1 %v711_v62 }
 0x17c   :  { %v3514_v5 = vpop.eup %3513 }
 0x17d   :  { %v687_v9 = vmul.f32 %v3514_v5, %v3512_v3  ;;  %v1327_v5 = vld [vmem:[#allocation12 + $0x28] sm:$0xff] }
 0x17f   :  { %v693_v13 = vmul.f32 %v4103_v22, %v687_v9  ;;  %v1325_v9 = vld [vmem:[#allocation12 + $0x18] sm:$0xff] }
 0x181   :  { %v4121_v15 = vadd.f32 %v700_v10, %v693_v13  ;;  %v1329_v13 = vld [vmem:[#allocation12 + $0x38] sm:$0xff] }
 0x183   :  { %728 = vst [vmem:[#allocation13] sm:$0xff] %v4121_v15  ;;  %877 = vmatmul.mubr.f32.vlgmr.msra.gmra.mrb[2].mxu0 %v4121_v15  ;;  %948 = vmatmul.mubr.f32.vlgmr.msra.gmra.mrb[2].mxu1 %v4121_v15 }
 0x184   :  { %3032 = vmatpush1.bf16.msra.mxu0 %v3923_v48  ;;  %3064 = vmatpush1.bf16.msra.mxu1 %v3926_v51  ;;  %v4161_v48 = vstv %s4867_s8 }
 0x185   :  { %3034 = vmatprep.subr.bf16.mxu0 %v3929_v54  ;;  %3066 = vmatprep.subr.bf16.mxu1 %v3931_v57 }
 0x186   :  { %1163 = vmatprep.mubr.f32.mxu0 %v4873_v0  ;;  %1234 = vmatprep.mubr.f32.mxu1 %v4873_v0 }
 0x188   :  { %3036 = vmatpush1.bf16.msra.mxu0 %v3934_v61  ;;  %3068 = vmatpush1.bf16.msra.mxu1 %v3938_v1 }
 0x189   :  { %3038 = vmatprep.subr.bf16.mxu0 %v3942_v4  ;;  %3070 = vmatprep.subr.bf16.mxu1 %v3945_v7 }
 0x18c   :  { %3040 = vmatpush1.bf16.msra.mxu0 %v3948_v11  ;;  %3072 = vmatpush1.bf16.msra.mxu1 %v3952_v14 }
 0x18d   :  { %3042 = vmatprep.subr.bf16.mxu0 %v3956_v17  ;;  %3074 = vmatprep.subr.bf16.mxu1 %v3959_v20 }
 0x190   :  { %3044 = vmatpush1.bf16.msra.mxu0 %v3962_v24  ;;  %3076 = vmatpush1.bf16.msra.mxu1 %v3966_v27 }
 0x191   :  { %3046 = vmatprep.subr.bf16.mxu0 %v3973_v31  ;;  %3078 = vmatprep.subr.bf16.mxu1 %v3977_v34 }
 0x194   :  { %3048 = vmatpush1.bf16.msra.mxu0 %v3980_v38  ;;  %3080 = vmatpush1.bf16.msra.mxu1 %v3984_v43 }
 0x195   :  { %3050 = vmatprep.subr.bf16.mxu0 %v3988_v46  ;;  %3082 = vmatprep.subr.bf16.mxu1 %v3991_v50 }
 0x198   :  { %3052 = vmatpush1.bf16.msra.mxu0 %v3994_v56  ;;  %3084 = vmatpush1.bf16.msra.mxu1 %v3998_v60 }
 0x199   :  { %3054 = vmatprep.subr.bf16.mxu0 %v4002_v2  ;;  %3086 = vmatprep.subr.bf16.mxu1 %v4005_v6 }
 0x19c   :  { %3056 = vmatpush1.bf16.msra.mxu0 %v4008_v12  ;;  %3088 = vmatpush1.bf16.msra.mxu1 %v4012_v16 }
 0x19d   :  { %3058 = vmatprep.subr.bf16.mxu0 %v4016_v21  ;;  %3090 = vmatprep.subr.bf16.mxu1 %v4019_v25 }
 0x1a0   :  { %3060 = vmatpush1.bf16.msra.mxu0 %v4024_v29  ;;  %3092 = vmatpush1.bf16.msra.mxu1 %v4028_v30 }
 0x205   :  { %v713_v51 = vpop.xlane.xlu1 %712 }
 0x206   :  { %v715_v54 = vadd.f32 %v4161_v48, %v713_v51  ;;  %v1326_v51 = vld [vmem:[#allocation12 + $0x20] sm:$0xff] }
 0x208   :  { %v2808_v57 = vmul.f32 -1.442695, %v715_v54  ;;  %v4206_v54 = vpack.c.bf16 %v1329_v13, %v1325_v9 }
 0x20a   :  { %3515 = vpow2.f32 %v2808_v57  ;;  %3126 = vmatprep.subr.bf16.mxu1 %v4206_v54 }
 0x214   :  { %v3516_v61 = vpop.eup %3515 }
 0x215   :  { %v719_v1 = vadd.f32 1.0, %v3516_v61  ;;  %v1324_v61 = vld [vmem:[#allocation12 + $0x10] sm:$0xff] }
 0x217   :  { %3517 = vrcp.f32 %v719_v1  ;;  %v1328_v1 = vld [vmem:[#allocation12 + $0x30] sm:$0xff] }
 0x221   :  { %v4164_v4 = vpop.eup %3517 }
 0x222   :  { %v723_v7 = vadd.f32 %v4164_v4, %v4021_v26  ;;  %v722_v17 = vmul.f32 %v4164_v4, %v4033_v32 }
 0x224   :  { %v724_v11 = vmax.f32 %v723_v7, 0.0  ;;  %v1331_v7 = vld [vmem:[#allocation12 + $0x48] sm:$0xff] }
 0x226   :  { %v725_v14 = vmin.f32 %v724_v11, 1.0  ;;  %v4211_v11 = vpack.c.bf16 %v1328_v1, %v1324_v61  ;;  %v1358_v61 = vld [vmem:[#allocation12 + $0x120] sm:$0xff]  ;;  %v1356_v1 = vld [vmem:[#allocation12 + $0x110] sm:$0xff] }
 0x228   :  { %v726_v20 = vmul.f32 %v725_v14, %v694_v35  ;;  %v1335_v14 = vld [vmem:[#allocation12 + $0x68] sm:$0xff] }
 0x22a   :  { %v4172_v24 = vadd.f32 %v726_v20, %v722_v17  ;;  %v1333_v17 = vld [vmem:[#allocation12 + $0x58] sm:$0xff] }
 0x22b   :  { %v1337_v20 = vld [vmem:[#allocation12 + $0x78] sm:$0xff] }
 0x22c   :  { %v4175_v27 = vround.rtne.f32 %v4172_v24 }
 0x22e   :  { %984 = vperm.xlu1 %3498, %v4175_v27   ;;  %v988_v31 = vsub.f32 1.0, %v4175_v27 }
 0x230   :  { %991 = vperm.xlu0 %3497, %v988_v31  }
 0x256   :  { %v878_v34 = vpop.f32.mrb[2].mxu0  ;;  %v949_v38 = vpop.f32.mrb[2].mxu1 }
 0x257   :  { %v3415_v43 = vadd.f32 %v878_v34, %v4091_v45  ;;  %v880_v46 = vpop.f32.mrb[3].mxu0  ;;  %v951_v50 = vpop.f32.mrb[3].mxu1  ;;  %v3431_v6 = vadd.f32 %v949_v38, %v4097_v63  ;;  %v4215_v34 = vpack.c.bf16 %v1335_v14, %v1331_v7  ;;  %v4217_v38 = vpack.c.bf16 %v1337_v20, %v1333_v17  ;;  %v1360_v14 = vld [vmem:[#allocation12 + $0x130] sm:$0xff]  ;;  %v1363_v17 = vld [vmem:[#allocation12 + $0x148] sm:$0xff] }
 0x258   :  { %v3416_v56 = vadd.f32 %v880_v46, %v4093_v47  ;;  %v3432_v21 = vadd.f32 %v951_v50, %v4100_v8  ;;  %v1334_v46 = vld [vmem:[#allocation12 + $0x60] sm:$0xff]  ;;  %v1332_v50 = vld [vmem:[#allocation12 + $0x50] sm:$0xff]  ;;  %v1367_v20 = vld [vmem:[#allocation12 + $0x168] sm:$0xff] }
 0x259   :  { %v2809_v60 = vmul.f32 -1.442695, %v3415_v43  ;;  %v2811_v12 = vmul.f32 -1.442695, %v3431_v6  ;;  %v1330_v43 = vld [vmem:[#allocation12 + $0x40] sm:$0xff]  ;;  %v1343_v6 = vld [vmem:[#allocation12 + $0xa8] sm:$0xff] }
 0x25a   :  { %v2810_v2 = vmul.f32 -1.442695, %v3416_v56  ;;  %v4220_v56 = vpack.c.bf16 %v1334_v46, %v1330_v43  ;;  %v1365_v43 = vld [vmem:[#allocation12 + $0x158] sm:$0xff] }
 0x25b   :  { %3519 = vpow2.f32 %v2809_v60  ;;  %v1336_v60 = vld [vmem:[#allocation12 + $0x70] sm:$0xff]  ;;  %v1369_v46 = vld [vmem:[#allocation12 + $0x178] sm:$0xff] }
 0x25c   :  { %3521 = vpow2.f32 %v2810_v2  ;;  %v1339_v2 = vld [vmem:[#allocation12 + $0x88] sm:$0xff] }
 0x25d   :  { %3523 = vpow2.f32 %v2811_v12  ;;  %v4224_v12 = vpack.c.bf16 %v1336_v60, %v1332_v50  ;;  %v4259_v60 = vpack.c.bf16 %v1360_v14, %v1356_v1  ;;  %v1375_v1 = vld [vmem:[#allocation12 + $0x1a8] sm:$0xff]  ;;  %v1373_v14 = vld [vmem:[#allocation12 + $0x198] sm:$0xff] }
 0x265   :  { %v3520_v16 = vpop.eup %3519 }
 0x266   :  { %v961_v25 = vadd.f32 1.0, %v3520_v16  ;;  %v3522_v26 = vpop.eup %3521  ;;  %v4226_v16 = vpack.c.bf16 %v1343_v6, %v1339_v2  ;;  %v4261_v2 = vpack.c.bf16 %v1367_v20, %v1363_v17  ;;  %v1362_v6 = vld [vmem:[#allocation12 + $0x140] sm:$0xff]  ;;  %v1377_v20 = vld [vmem:[#allocation12 + $0x1b8] sm:$0xff] }
 0x267   :  { %v967_v29 = vadd.f32 1.0, %v3522_v26  ;;  %v3524_v30 = vpop.eup %3523  ;;  %v1338_v26 = vld [vmem:[#allocation12 + $0x80] sm:$0xff] }
 0x268   :  { %3525 = vrcp.f32 %v961_v25  ;;  %v973_v19 = vadd.f32 1.0, %v3524_v30  ;;  %v1345_v25 = vld [vmem:[#allocation12 + $0xb8] sm:$0xff]  ;;  %v1342_v30 = vld [vmem:[#allocation12 + $0xa0] sm:$0xff] }
 0x269   :  { %3527 = vtanh.f32 %v3432_v21  ;;  %v1341_v21 = vld [vmem:[#allocation12 + $0x98] sm:$0xff] }
 0x26a   :  { %3529 = vrcp.f32 %v967_v29  ;;  %v4228_v29 = vpack.c.bf16 %v1345_v25, %v1341_v21  ;;  %v1366_v21 = vld [vmem:[#allocation12 + $0x160] sm:$0xff]  ;;  %v4264_v25 = vpack.c.bf16 %v1369_v46, %v1365_v43 }
 0x26b   :  { %3531 = vrcp.f32 %v973_v19  ;;  %v1351_v19 = vld [vmem:[#allocation12 + $0xe8] sm:$0xff]  ;;  %v1370_v43 = vld [vmem:[#allocation12 + $0x180] sm:$0xff] }
 0x26c   :  { %v1374_v46 = vld [vmem:[#allocation12 + $0x1a0] sm:$0xff] }
 0x272   :  { %v3526_v32 = vpop.eup %3525 }
 0x273   :  { %v3528_v33 = vpop.eup %3527  ;;  %v977_v35 = vmul.f32 %v3526_v32, %v4114_v59  ;;  %v1340_v32 = vld [vmem:[#allocation12 + $0x90] sm:$0xff] }
 0x274   :  { %v3530_v18 = vpop.eup %3529 }
 0x275   :  { %v978_v23 = vmul.f32 %v3530_v18, %v3528_v33  ;;  %v3532_v37 = vpop.eup %3531  ;;  %v1344_v33 = vld [vmem:[#allocation12 + $0xb0] sm:$0xff]  ;;  %v1347_v18 = vld [vmem:[#allocation12 + $0xc8] sm:$0xff] }
 0x277   :  { %v979_v28 = vadd.f32 %v978_v23, %v977_v35  ;;  %v4231_v35 = vpack.c.bf16 %v1342_v30, %v1338_v26  ;;  %v1349_v23 = vld [vmem:[#allocation12 + $0xd8] sm:$0xff]  ;;  %v1364_v26 = vld [vmem:[#allocation12 + $0x150] sm:$0xff] }
 0x278   :  { %v1368_v30 = vld [vmem:[#allocation12 + $0x170] sm:$0xff] }
 0x279   :  { %3533 = vtanh.f32 %v979_v28 }
 0x283   :  { %v3534_v40 = vpop.eup %3533 }
 0x284   :  { %v981_v41 = vmul.f32 %v3534_v40, %v3532_v37  ;;  %v4237_v37 = vpack.c.bf16 %v1351_v19, %v1347_v18  ;;  %v1353_v40 = vld [vmem:[#allocation12 + $0xf8] sm:$0xff] }
 0x2ad   :  { %v4186_v44 = vpop.permute.xlu1 %984 }
 0x2ae   :  { %v987_v52 = vmul.f32 %v4186_v44, %v981_v41  ;;  %v996_v53 = vmul.f32 %v4186_v44, %v979_v28  ;;  %v4235_v28 = vpack.c.bf16 %v1344_v33, %v1340_v32  ;;  %v1346_v41 = vld [vmem:[#allocation12 + $0xc0] sm:$0xff]  ;;  %v4267_v32 = vpack.c.bf16 %v1366_v21, %v1362_v6 }
 0x2af   :  { %v992_v49 = vpop.permute.xlu0 %991  ;;  %v4271_v33 = vpack.c.bf16 %v1368_v30, %v1364_v26  ;;  %v4294_v21 = vpack.c.bf16 %v1377_v20, %v1373_v14  ;;  %v1376_v26 = vld [vmem:[#allocation12 + $0x1b0] sm:$0xff] }
 0x2b0   :  { %v994_v39 = vmul.f32 %v992_v49, %v4121_v15  ;;  %v997_v55 = vmul.f32 %v992_v49, %v4114_v59  ;;  %v1323_v59 = vld [vmem:[#allocation12 + $0x8] sm:$0xff]  ;;  %v1322_v15 = vld [vmem:[#allocation12] sm:$0xff] }
 0x2b1   :  { %v4204_v10 = vpack.c.bf16 %v1327_v5, %v1323_v59  ;;  %v4208_v57 = vpack.c.bf16 %v1326_v51, %v1322_v15  ;;  %v1350_v49 = vld [vmem:[#allocation12 + $0xe0] sm:$0xff]  ;;  %v1357_v59 = vld [vmem:[#allocation12 + $0x118] sm:$0xff] }
 0x2b2   :  { %v4192_v42 = vadd.f32 %v994_v39, %v987_v52  ;;  %v4194_v62 = vadd.f32 %v997_v55, %v996_v53  ;;  %v4240_v52 = vpack.c.bf16 %v1353_v40, %v1349_v23  ;;  %v1348_v53 = vld [vmem:[#allocation12 + $0xd0] sm:$0xff]  ;;  %v1355_v55 = vld [vmem:[#allocation12 + $0x108] sm:$0xff]  ;;  %v1361_v5 = vld [vmem:[#allocation12 + $0x138] sm:$0xff]  ;;  %v4243_v9 = vpack.c.bf16 %v1350_v49, %v1346_v41 }
 0x2b3   :  { %3094 = vmatprep.subr.bf16.mxu0 %v4204_v10  ;;  %v1352_v39 = vld [vmem:[#allocation12 + $0xf0] sm:$0xff]  ;;  %v1354_v51 = vld [vmem:[#allocation12 + $0x100] sm:$0xff]  ;;  %v4252_v7 = vpack.c.bf16 %v1361_v5, %v1357_v59 }
 0x2b4   :  { %1016 = vst [vmem:[#allocation13 + $0x8] sm:$0xff] %v4192_v42  ;;  %1018 = vst [vmem:[#allocation14 + $0x8] sm:$0xff] %v4194_v62  ;;  %1164 = vmatmul.mubr.f32.vlgmr.msra.gmra.mrb[4].mxu0 %v4192_v42  ;;  %1235 = vmatmul.mubr.f32.vlgmr.msra.gmra.mrb[4].mxu1 %v4192_v42  ;;  %v999_v3 = vmul.f32 %v4112_v58, %v4194_v62  ;;  %v4247_v13 = vpack.c.bf16 %v1352_v39, %v1348_v53 }
 0x2b5   :  { %1450 = vmatprep.mubr.f32.mxu0 %v4873_v0  ;;  %1521 = vmatprep.mubr.f32.mxu1 %v4873_v0  ;;  %v4255_v50 = vpack.c.bf16 %v1358_v61, %v1354_v51  ;;  %v1371_v61 = vld [vmem:[#allocation12 + $0x188] sm:$0xff] }
 0x2b6   :  { %1000 = vadd.xlane.f32.xlu0 %v999_v3  ;;  %3096 = vmatpush1.bf16.msra.mxu0 %v4208_v57  ;;  %v1359_v3 = vld [vmem:[#allocation12 + $0x128] sm:$0xff]  ;;  %v4291_v17 = vpack.c.bf16 %v1375_v1, %v1371_v61  ;;  %v1384_v61 = vld [vmem:[#allocation12 + $0x1f0] sm:$0xff] }
 0x2b7   :  { %3128 = vmatpush1.bf16.msra.mxu1 %v4211_v11  ;;  %3098 = vmatprep.subr.bf16.mxu0 %v4215_v34  ;;  %v4249_v15 = vpack.c.bf16 %v1359_v3, %v1355_v55 }
 0x2b8   :  { %3130 = vmatprep.subr.bf16.mxu1 %v4217_v38 }
 0x2ba   :  { %3100 = vmatpush1.bf16.msra.mxu0 %v4220_v56 }
 0x2bb   :  { %3132 = vmatpush1.bf16.msra.mxu1 %v4224_v12  ;;  %3102 = vmatprep.subr.bf16.mxu0 %v4226_v16 }
 0x2bc   :  { %3134 = vmatprep.subr.bf16.mxu1 %v4228_v29 }
 0x2be   :  { %3104 = vmatpush1.bf16.msra.mxu0 %v4231_v35 }
 0x2bf   :  { %3136 = vmatpush1.bf16.msra.mxu1 %v4235_v28  ;;  %3106 = vmatprep.subr.bf16.mxu0 %v4237_v37 }
 0x2c0   :  { %3138 = vmatprep.subr.bf16.mxu1 %v4240_v52 }
 0x2c2   :  { %3108 = vmatpush1.bf16.msra.mxu0 %v4243_v9 }
 0x2c3   :  { %3140 = vmatpush1.bf16.msra.mxu1 %v4247_v13  ;;  %3110 = vmatprep.subr.bf16.mxu0 %v4249_v15 }
 0x2c4   :  { %3142 = vmatprep.subr.bf16.mxu1 %v4252_v7 }
 0x2c6   :  { %3112 = vmatpush1.bf16.msra.mxu0 %v4255_v50 }
 0x2c7   :  { %3144 = vmatpush1.bf16.msra.mxu1 %v4259_v60  ;;  %3114 = vmatprep.subr.bf16.mxu0 %v4261_v2 }
 0x2c8   :  { %3146 = vmatprep.subr.bf16.mxu1 %v4264_v25 }
 0x2ca   :  { %3116 = vmatpush1.bf16.msra.mxu0 %v4267_v32 }
 0x2cb   :  { %3148 = vmatpush1.bf16.msra.mxu1 %v4271_v33  ;;  %3118 = vmatprep.subr.bf16.mxu0 %v4291_v17 }
 0x2cc   :  { %3150 = vmatprep.subr.bf16.mxu1 %v4294_v21 }
 0x343   :  { %v1001_v18 = vpop.xlane.xlu0 %1000 }
 0x344   :  { %v1002_v19 = vadd.f32 %v1001_v18, %v4161_v48  ;;  %v1379_v18 = vld [vmem:[#allocation12 + $0x1c8] sm:$0xff] }
 0x346   :  { %v2812_v23 = vmul.f32 -1.442695, %v1002_v19  ;;  %v1383_v19 = vld [vmem:[#allocation12 + $0x1e8] sm:$0xff] }
 0x348   :  { %3535 = vpow2.f32 %v2812_v23  ;;  %v1381_v23 = vld [vmem:[#allocation12 + $0x1d8] sm:$0xff] }
 0x352   :  { %v3536_v40 = vpop.eup %3535 }
 0x353   :  { %v1006_v41 = vadd.f32 1.0, %v3536_v40  ;;  %v4306_v40 = vpack.c.bf16 %v1383_v19, %v1379_v18 }
 0x355   :  { %3537 = vrcp.f32 %v1006_v41  ;;  %v1385_v41 = vld [vmem:[#allocation12 + $0x1f8] sm:$0xff] }
 0x35f   :  { %v4277_v49 = vpop.eup %3537 }
 0x360   :  { %v1010_v53 = vadd.f32 %v4277_v49, %v4172_v24  ;;  %v1009_v3 = vmul.f32 %v4277_v49, %v4175_v27  ;;  %v4296_v27 = vpack.c.bf16 %v1374_v46, %v1370_v43 }
 0x362   :  { %v1011_v39 = vmax.f32 %v1010_v53, 0.0  ;;  %3120 = vmatpush1.bf16.msra.mxu0 %v4296_v27  ;;  %v1378_v53 = vld [vmem:[#allocation12 + $0x1c0] sm:$0xff] }
 0x363   :  { %3122 = vmatprep.subr.bf16.mxu0 %v4306_v40 }
 0x364   :  { %v1012_v55 = vmin.f32 %v1011_v39, 1.0  ;;  %v1382_v39 = vld [vmem:[#allocation12 + $0x1e0] sm:$0xff] }
 0x366   :  { %v1013_v59 = vmul.f32 %v1012_v55, %v988_v31  ;;  %v1372_v31 = vld [vmem:[#allocation12 + $0x190] sm:$0xff]  ;;  %v4308_v55 = vpack.c.bf16 %v1385_v41, %v1381_v23 }
 0x367   :  { %v4299_v30 = vpack.c.bf16 %v1376_v26, %v1372_v31 }
 0x368   :  { %v4285_v5 = vadd.f32 %v1013_v59, %v1009_v3  ;;  %v4310_v3 = vpack.c.bf16 %v1382_v39, %v1378_v53  ;;  %v1380_v59 = vld [vmem:[#allocation12 + $0x1d0] sm:$0xff] }
 0x369   :  { %3152 = vmatpush1.bf16.msra.mxu1 %v4299_v30  ;;  %v4313_v1 = vpack.c.bf16 %v1384_v61, %v1380_v59 }
 0x36a   :  { %v4288_v51 = vround.rtne.f32 %v4285_v5  ;;  %3154 = vmatprep.subr.bf16.mxu1 %v4308_v55  ;;  %3124 = vmatpush1.bf16.msra.mxu0 %v4310_v3 }
 0x36b   :  { %3158 = vmatprep.subr.bf16.mxu0 %v4204_v10 }
 0x36c   :  { %1271 = vperm.xlu1 %3498, %v4288_v51   ;;  %v4872_v6 = vsub.f32 1.0, %v4288_v51 }
 0x36d   :  { %3156 = vmatpush1.bf16.msra.mxu1 %v4313_v1 }
 0x36e   :  { %3190 = vmatprep.subr.bf16.mxu1 %v4206_v54 }
 0x370   :  { %1278 = vperm.xlu1 %3498, %v4872_v6  }
 0x387   :  { %v1165_v14 = vpop.f32.mrb[4].mxu0  ;;  %v1236_v20 = vpop.f32.mrb[4].mxu1 }
 0x388   :  { %v3417_v43 = vadd.f32 %v1165_v14, %v4091_v45  ;;  %v1167_v46 = vpop.f32.mrb[5].mxu0  ;;  %v1238_v31 = vpop.f32.mrb[5].mxu1  ;;  %v3433_v23 = vadd.f32 %v1236_v20, %v4097_v63 }
 0x389   :  { %v3418_v26 = vadd.f32 %v1167_v46, %v4093_v47  ;;  %v3434_v39 = vadd.f32 %v1238_v31, %v4100_v8 }
 0x38a   :  { %v2813_v18 = vmul.f32 -1.442695, %v3417_v43  ;;  %v2815_v41 = vmul.f32 -1.442695, %v3433_v23 }
 0x38b   :  { %v2814_v19 = vmul.f32 -1.442695, %v3418_v26 }
 0x38c   :  { %3539 = vpow2.f32 %v2813_v18 }
 0x38d   :  { %3541 = vpow2.f32 %v2814_v19 }
 0x38e   :  { %3543 = vpow2.f32 %v2815_v41 }
 0x396   :  { %v3540_v53 = vpop.eup %3539 }
 0x397   :  { %v1248_v59 = vadd.f32 1.0, %v3540_v53  ;;  %v3542_v61 = vpop.eup %3541 }
 0x398   :  { %v1254_v36 = vadd.f32 1.0, %v3542_v61  ;;  %v3544_v14 = vpop.eup %3543 }
 0x399   :  { %3545 = vrcp.f32 %v1248_v59  ;;  %v1260_v18 = vadd.f32 1.0, %v3544_v14 }
 0x39a   :  { %3547 = vtanh.f32 %v3434_v39 }
 0x39b   :  { %3549 = vrcp.f32 %v1254_v36 }
 0x39c   :  { %3551 = vrcp.f32 %v1260_v18 }
 0x3a3   :  { %v3546_v6 = vpop.eup %3545 }
 0x3a4   :  { %v3548_v46 = vpop.eup %3547  ;;  %v1264_v43 = vmul.f32 %v3546_v6, %v4194_v62 }
 0x3a5   :  { %v3550_v26 = vpop.eup %3549 }
 0x3a6   :  { %v1265_v19 = vmul.f32 %v3550_v26, %v3548_v46  ;;  %v3552_v23 = vpop.eup %3551 }
 0x3a8   :  { %v1266_v20 = vadd.f32 %v1265_v19, %v1264_v43 }
 0x3aa   :  { %3553 = vtanh.f32 %v1266_v20 }
 0x3b4   :  { %v3554_v31 = vpop.eup %3553 }
 0x3b5   :  { %v1268_v53 = vmul.f32 %v3554_v31, %v3552_v23 }
 0x3eb   :  { %v4325_v0 = vpop.permute.xlu1 %1271 }
 0x3ec   :  { %4884 = vst [vmem:[#allocation21_spill] sm:$0xff] %v4325_v0  ;;  %v1274_v39 = vmul.f32 %v4325_v0, %v1268_v53  ;;  %v1283_v36 = vmul.f32 %v4325_v0, %v1266_v20 }
 0x3ef   :  { %v1279_v41 = vpop.permute.xlu1 %1278 }
 0x3f0   :  { %v1281_v59 = vmul.f32 %v1279_v41, %v4192_v42  ;;  %v1284_v6 = vmul.f32 %v1279_v41, %v4194_v62  ;;  %v4885_v42 = vmov 0.0  }
 0x3f2   :  { %v4331_v61 = vadd.f32 %v1281_v59, %v1274_v39  ;;  %v4333_v14 = vadd.f32 %v1284_v6, %v1283_v36 }
 0x3f4   :  { %1303 = vst [vmem:[#allocation13 + $0x10] sm:$0xff] %v4331_v61  ;;  %1305 = vst [vmem:[#allocation14 + $0x10] sm:$0xff] %v4333_v14  ;;  %1451 = vmatmul.mubr.f32.vlgmr.msra.gmra.mrb[6].mxu0 %v4331_v61  ;;  %1522 = vmatmul.mubr.f32.vlgmr.msra.gmra.mrb[6].mxu1 %v4331_v61  ;;  %v1286_v46 = vmul.f32 %v4112_v58, %v4333_v14 }
 0x3f5   :  { %3160 = vmatpush1.bf16.msra.mxu0 %v4208_v57  ;;  %3192 = vmatpush1.bf16.msra.mxu1 %v4211_v11 }
 0x3f6   :  { %1287 = vadd.xlane.f32.xlu1 %v1286_v46  ;;  %3162 = vmatprep.subr.bf16.mxu0 %v4215_v34 }
 0x3f7   :  { %3194 = vmatprep.subr.bf16.mxu1 %v4217_v38  ;;  %1737 = vmatprep.mubr.f32.mxu0 %v4885_v42 }
 0x3f8   :  { %1808 = vmatprep.mubr.f32.mxu1 %v4885_v42 }
 0x3f9   :  { %3164 = vmatpush1.bf16.msra.mxu0 %v4220_v56  ;;  %3196 = vmatpush1.bf16.msra.mxu1 %v4224_v12 }
 0x3fa   :  { %3166 = vmatprep.subr.bf16.mxu0 %v4226_v16  ;;  %3198 = vmatprep.subr.bf16.mxu1 %v4228_v29 }
 0x3fd   :  { %3168 = vmatpush1.bf16.msra.mxu0 %v4231_v35  ;;  %3200 = vmatpush1.bf16.msra.mxu1 %v4235_v28 }
 0x3fe   :  { %3170 = vmatprep.subr.bf16.mxu0 %v4237_v37  ;;  %3202 = vmatprep.subr.bf16.mxu1 %v4240_v52 }
 0x401   :  { %3172 = vmatpush1.bf16.msra.mxu0 %v4243_v9  ;;  %3204 = vmatpush1.bf16.msra.mxu1 %v4247_v13 }
 0x402   :  { %3174 = vmatprep.subr.bf16.mxu0 %v4249_v15  ;;  %3206 = vmatprep.subr.bf16.mxu1 %v4252_v7 }
 0x405   :  { %3176 = vmatpush1.bf16.msra.mxu0 %v4255_v50  ;;  %3208 = vmatpush1.bf16.msra.mxu1 %v4259_v60 }
 0x406   :  { %3178 = vmatprep.subr.bf16.mxu0 %v4261_v2  ;;  %3210 = vmatprep.subr.bf16.mxu1 %v4264_v25 }
 0x409   :  { %3180 = vmatpush1.bf16.msra.mxu0 %v4267_v32  ;;  %3212 = vmatpush1.bf16.msra.mxu1 %v4271_v33 }
 0x40a   :  { %3182 = vmatprep.subr.bf16.mxu0 %v4291_v17  ;;  %3214 = vmatprep.subr.bf16.mxu1 %v4294_v21 }
 0x40d   :  { %3184 = vmatpush1.bf16.msra.mxu0 %v4296_v27  ;;  %3216 = vmatpush1.bf16.msra.mxu1 %v4299_v30 }
 0x40e   :  { %3186 = vmatprep.subr.bf16.mxu0 %v4306_v40  ;;  %3218 = vmatprep.subr.bf16.mxu1 %v4308_v55 }
 0x411   :  { %3188 = vmatpush1.bf16.msra.mxu0 %v4310_v3  ;;  %3220 = vmatpush1.bf16.msra.mxu1 %v4313_v1 }
 0x412   :  { %3222 = vmatprep.subr.bf16.mxu0 %v4204_v10  ;;  %3254 = vmatprep.subr.bf16.mxu1 %v4206_v54  ;;  %v4887_v54 = vsub.f32 1.0, %v4288_v51 }
 0x483   :  { %v1288_v62 = vpop.xlane.xlu1 %1287 }
 0x484   :  { %v1289_v43 = vadd.f32 %v1288_v62, %v4161_v48 }
 0x486   :  { %v2816_v26 = vmul.f32 -1.442695, %v1289_v43 }
 0x488   :  { %3555 = vpow2.f32 %v2816_v26 }
 0x492   :  { %v3556_v18 = vpop.eup %3555 }
 0x493   :  { %v1293_v19 = vadd.f32 1.0, %v3556_v18 }
 0x495   :  { %3557 = vrcp.f32 %v1293_v19 }
 0x49f   :  { %v4376_v20 = vpop.eup %3557 }
 0x4a0   :  { %4886 = vst [vmem:[#allocation22_spill] sm:$0xff] %v4376_v20  ;;  %v1297_v23 = vadd.f32 %v4376_v20, %v4285_v5  ;;  %v1296_v10 = vmul.f32 %v4376_v20, %v4288_v51 }
 0x4a2   :  { %v1298_v31 = vmax.f32 %v1297_v23, 0.0 }
 0x4a4   :  { %v1299_v53 = vmin.f32 %v1298_v31, 1.0 }
 0x4a6   :  { %v1300_v41 = vmul.f32 %v1299_v53, %v4887_v54 }
 0x4a8   :  { %v4384_v39 = vadd.f32 %v1300_v41, %v1296_v10 }
 0x4aa   :  { %v4387_v36 = vround.rtne.f32 %v4384_v39 }
 0x4ac   :  { %1558 = vperm.xlu0 %3497, %v4387_v36   ;;  %v4875_v59 = vsub.f32 1.0, %v4387_v36 }
 0x4b0   :  { %1565 = vperm.xlu0 %3497, %v4875_v59  }
 0x4c7   :  { %v1452_v6 = vpop.f32.mrb[6].mxu0  ;;  %v1523_v46 = vpop.f32.mrb[6].mxu1 }
 0x4c8   :  { %v3419_v62 = vadd.f32 %v1452_v6, %v4091_v45  ;;  %v1454_v43 = vpop.f32.mrb[7].mxu0  ;;  %v1525_v26 = vpop.f32.mrb[7].mxu1  ;;  %v3435_v23 = vadd.f32 %v1523_v46, %v4097_v63 }
 0x4c9   :  { %v3420_v51 = vadd.f32 %v1454_v43, %v4093_v47  ;;  %v3436_v10 = vadd.f32 %v1525_v26, %v4100_v8 }
 0x4ca   :  { %v2817_v18 = vmul.f32 -1.442695, %v3419_v62  ;;  %v2819_v31 = vmul.f32 -1.442695, %v3435_v23 }
 0x4cb   :  { %v2818_v19 = vmul.f32 -1.442695, %v3420_v51 }
 0x4cc   :  { %3559 = vpow2.f32 %v2817_v18 }
 0x4cd   :  { %3561 = vpow2.f32 %v2818_v19 }
 0x4ce   :  { %3563 = vpow2.f32 %v2819_v31 }
 0x4d6   :  { %v3560_v53 = vpop.eup %3559 }
 0x4d7   :  { %v1535_v54 = vadd.f32 1.0, %v3560_v53  ;;  %v3562_v41 = vpop.eup %3561 }
 0x4d8   :  { %v1541_v59 = vadd.f32 1.0, %v3562_v41  ;;  %v3564_v6 = vpop.eup %3563 }
 0x4d9   :  { %3565 = vrcp.f32 %v1535_v54  ;;  %v1547_v18 = vadd.f32 1.0, %v3564_v6 }
 0x4da   :  { %3567 = vtanh.f32 %v3436_v10 }
 0x4db   :  { %3569 = vrcp.f32 %v1541_v59 }
 0x4dc   :  { %3571 = vrcp.f32 %v1547_v18 }
 0x4e3   :  { %v3566_v0 = vpop.eup %3565 }
 0x4e4   :  { %v3568_v43 = vpop.eup %3567  ;;  %v1551_v62 = vmul.f32 %v3566_v0, %v4333_v14 }
 0x4e5   :  { %v3570_v51 = vpop.eup %3569 }
 0x4e6   :  { %v1552_v19 = vmul.f32 %v3570_v51, %v3568_v43  ;;  %v3572_v23 = vpop.eup %3571 }
 0x4e8   :  { %v1553_v46 = vadd.f32 %v1552_v19, %v1551_v62 }
 0x4ea   :  { %3573 = vtanh.f32 %v1553_v46 }
 0x4f4   :  { %v3574_v26 = vpop.eup %3573 }
 0x4f5   :  { %v1555_v53 = vmul.f32 %v3574_v26, %v3572_v23 }
 0x52b   :  { %v4398_v20 = vpop.permute.xlu0 %1558 }
 0x52c   :  { %4888 = vst [vmem:[#allocation23_spill] sm:$0xff] %v4398_v20  ;;  %v1561_v10 = vmul.f32 %v4398_v20, %v1555_v53  ;;  %v1570_v59 = vmul.f32 %v4398_v20, %v1553_v46 }
 0x52f   :  { %v1566_v31 = vpop.permute.xlu0 %1565 }
 0x530   :  { %v1568_v54 = vmul.f32 %v1566_v31, %v4331_v61  ;;  %v1571_v0 = vmul.f32 %v1566_v31, %v4333_v14 }
 0x532   :  { %v4404_v41 = vadd.f32 %v1568_v54, %v1561_v10  ;;  %v4406_v6 = vadd.f32 %v1571_v0, %v1570_v59 }
 0x534   :  { %1590 = vst [vmem:[#allocation13 + $0x18] sm:$0xff] %v4404_v41  ;;  %1592 = vst [vmem:[#allocation14 + $0x18] sm:$0xff] %v4406_v6  ;;  %1738 = vmatmul.mubr.f32.vlgmr.msra.gmra.mrb[8].mxu0 %v4404_v41  ;;  %1809 = vmatmul.mubr.f32.vlgmr.msra.gmra.mrb[8].mxu1 %v4404_v41  ;;  %v1573_v43 = vmul.f32 %v4112_v58, %v4406_v6 }
 0x535   :  { %3224 = vmatpush1.bf16.msra.mxu0 %v4208_v57  ;;  %3256 = vmatpush1.bf16.msra.mxu1 %v4211_v11 }
 0x536   :  { %1574 = vadd.xlane.f32.xlu1 %v1573_v43  ;;  %3226 = vmatprep.subr.bf16.mxu0 %v4215_v34 }
 0x537   :  { %3258 = vmatprep.subr.bf16.mxu1 %v4217_v38  ;;  %2024 = vmatprep.mubr.f32.mxu0 %v4885_v42 }
 0x538   :  { %2095 = vmatprep.mubr.f32.mxu1 %v4885_v42 }
 0x539   :  { %3228 = vmatpush1.bf16.msra.mxu0 %v4220_v56  ;;  %3260 = vmatpush1.bf16.msra.mxu1 %v4224_v12 }
 0x53a   :  { %3230 = vmatprep.subr.bf16.mxu0 %v4226_v16  ;;  %3262 = vmatprep.subr.bf16.mxu1 %v4228_v29 }
 0x53d   :  { %3232 = vmatpush1.bf16.msra.mxu0 %v4231_v35  ;;  %3264 = vmatpush1.bf16.msra.mxu1 %v4235_v28 }
 0x53e   :  { %3234 = vmatprep.subr.bf16.mxu0 %v4237_v37  ;;  %3266 = vmatprep.subr.bf16.mxu1 %v4240_v52  ;;  %v4890_v37 = vsub.f32 1.0, %v4387_v36 }
 0x541   :  { %3236 = vmatpush1.bf16.msra.mxu0 %v4243_v9  ;;  %3268 = vmatpush1.bf16.msra.mxu1 %v4247_v13 }
 0x542   :  { %3238 = vmatprep.subr.bf16.mxu0 %v4249_v15  ;;  %3270 = vmatprep.subr.bf16.mxu1 %v4252_v7 }
 0x545   :  { %3240 = vmatpush1.bf16.msra.mxu0 %v4255_v50  ;;  %3272 = vmatpush1.bf16.msra.mxu1 %v4259_v60 }
 0x546   :  { %3242 = vmatprep.subr.bf16.mxu0 %v4261_v2  ;;  %3274 = vmatprep.subr.bf16.mxu1 %v4264_v25 }
 0x549   :  { %3244 = vmatpush1.bf16.msra.mxu0 %v4267_v32  ;;  %3276 = vmatpush1.bf16.msra.mxu1 %v4271_v33 }
 0x54a   :  { %3246 = vmatprep.subr.bf16.mxu0 %v4291_v17  ;;  %3278 = vmatprep.subr.bf16.mxu1 %v4294_v21 }
 0x54d   :  { %3248 = vmatpush1.bf16.msra.mxu0 %v4296_v27  ;;  %3280 = vmatpush1.bf16.msra.mxu1 %v4299_v30 }
 0x54e   :  { %3250 = vmatprep.subr.bf16.mxu0 %v4306_v40  ;;  %3282 = vmatprep.subr.bf16.mxu1 %v4308_v55 }
 0x551   :  { %3252 = vmatpush1.bf16.msra.mxu0 %v4310_v3  ;;  %3284 = vmatpush1.bf16.msra.mxu1 %v4313_v1 }
 0x5c3   :  { %v1575_v57 = vpop.xlane.xlu1 %1574 }
 0x5c4   :  { %v1576_v11 = vadd.f32 %v1575_v57, %v4161_v48 }
 0x5c6   :  { %v2820_v34 = vmul.f32 -1.442695, %v1576_v11 }
 0x5c8   :  { %3575 = vpow2.f32 %v2820_v34 }
 0x5d2   :  { %v3576_v38 = vpop.eup %3575 }
 0x5d3   :  { %v1580_v56 = vadd.f32 1.0, %v3576_v38  ;;  %v2186_v38 = vld [vmem:[#allocation12 + $0x18] sm:$0xff] }
 0x5d5   :  { %3577 = vrcp.f32 %v1580_v56 }
 0x5df   :  { %v4447_v12 = vpop.eup %3577 }
 0x5e0   :  { %4889 = vst [vmem:[#allocation24_spill] sm:$0xff] %v4447_v12  ;;  %v1584_v16 = vadd.f32 %v4447_v12, %v4384_v39  ;;  %v1583_v28 = vmul.f32 %v4447_v12, %v4387_v36 }
 0x5e2   :  { %v1585_v29 = vmax.f32 %v1584_v16, 0.0  ;;  %v2190_v16 = vld [vmem:[#allocation12 + $0x38] sm:$0xff] }
 0x5e4   :  { %v1586_v35 = vmin.f32 %v1585_v29, 1.0  ;;  %v2183_v29 = vld [vmem:[#allocation12] sm:$0xff] }
 0x5e6   :  { %v1587_v52 = vmul.f32 %v1586_v35, %v4890_v37  ;;  %v2187_v35 = vld [vmem:[#allocation12 + $0x20] sm:$0xff] }
 0x5e7   :  { %v4491_v37 = vpack.c.bf16 %v2187_v35, %v2183_v29  ;;  %v2220_v29 = vld [vmem:[#allocation12 + $0x128] sm:$0xff]  ;;  %v2218_v35 = vld [vmem:[#allocation12 + $0x118] sm:$0xff] }
 0x5e8   :  { %v4455_v9 = vadd.f32 %v1587_v52, %v1583_v28  ;;  %v4489_v28 = vpack.c.bf16 %v2190_v16, %v2186_v38  ;;  %v2185_v52 = vld [vmem:[#allocation12 + $0x10] sm:$0xff]  ;;  %v2216_v16 = vld [vmem:[#allocation12 + $0x108] sm:$0xff] }
 0x5e9   :  { %v2213_v38 = vld [vmem:[#allocation12 + $0xf0] sm:$0xff] }
 0x5ea   :  { %4891 = vst [vmem:[#allocation25_spill] sm:$0xff] %v4455_v9  ;;  %v4458_v13 = vround.rtne.f32 %v4455_v9  ;;  %3318 = vmatprep.subr.bf16.mxu1 %v4489_v28 }
 0x5ec   :  { %1845 = vperm.xlu0 %3497, %v4458_v13   ;;  %v1849_v15 = vsub.f32 1.0, %v4458_v13 }
 0x5ee   :  { %1852 = vperm.xlu1 %3498, %v1849_v15  }
 0x607   :  { %v1739_v7 = vpop.f32.mrb[8].mxu0  ;;  %v1810_v50 = vpop.f32.mrb[8].mxu1 }
 0x608   :  { %v3421_v60 = vadd.f32 %v1739_v7, %v4091_v45  ;;  %v1741_v2 = vpop.f32.mrb[9].mxu0  ;;  %v1812_v25 = vpop.f32.mrb[9].mxu1  ;;  %v3437_v21 = vadd.f32 %v1810_v50, %v4097_v63  ;;  %v2189_v7 = vld [vmem:[#allocation12 + $0x30] sm:$0xff] }
 0x609   :  { %v3422_v32 = vadd.f32 %v1741_v2, %v4093_v47  ;;  %v3438_v40 = vadd.f32 %v1812_v25, %v4100_v8  ;;  %v4494_v50 = vpack.c.bf16 %v2189_v7, %v2185_v52  ;;  %v2194_v2 = vld [vmem:[#allocation12 + $0x58] sm:$0xff] }
 0x60a   :  { %v2821_v33 = vmul.f32 -1.442695, %v3421_v60  ;;  %v2823_v27 = vmul.f32 -1.442695, %v3437_v21  ;;  %v2196_v60 = vld [vmem:[#allocation12 + $0x68] sm:$0xff]  ;;  %v2198_v25 = vld [vmem:[#allocation12 + $0x78] sm:$0xff] }
 0x60b   :  { %v2822_v17 = vmul.f32 -1.442695, %v3422_v32  ;;  %v2195_v21 = vld [vmem:[#allocation12 + $0x60] sm:$0xff]  ;;  %v2222_v52 = vld [vmem:[#allocation12 + $0x138] sm:$0xff] }
 0x60c   :  { %3579 = vpow2.f32 %v2821_v33  ;;  %v4500_v33 = vpack.c.bf16 %v2198_v25, %v2194_v2  ;;  %v2215_v2 = vld [vmem:[#allocation12 + $0x100] sm:$0xff] }
 0x60d   :  { %3581 = vpow2.f32 %v2822_v17  ;;  %v2191_v17 = vld [vmem:[#allocation12 + $0x40] sm:$0xff] }
 0x60e   :  { %3583 = vpow2.f32 %v2823_v27  ;;  %v2193_v27 = vld [vmem:[#allocation12 + $0x50] sm:$0xff]  ;;  %v2219_v25 = vld [vmem:[#allocation12 + $0x120] sm:$0xff] }
 0x616   :  { %v3580_v30 = vpop.eup %3579 }
 0x617   :  { %v1822_v55 = vadd.f32 1.0, %v3580_v30  ;;  %v3582_v3 = vpop.eup %3581  ;;  %v4503_v30 = vpack.c.bf16 %v2195_v21, %v2191_v17  ;;  %v2217_v17 = vld [vmem:[#allocation12 + $0x110] sm:$0xff]  ;;  %v4535_v21 = vpack.c.bf16 %v2222_v52, %v2218_v35 }
 0x618   :  { %v1828_v1 = vadd.f32 1.0, %v3582_v3  ;;  %v3584_v61 = vpop.eup %3583  ;;  %v2204_v3 = vld [vmem:[#allocation12 + $0xa8] sm:$0xff] }
 0x619   :  { %3585 = vrcp.f32 %v1822_v55  ;;  %v1834_v18 = vadd.f32 1.0, %v3584_v61  ;;  %v2200_v55 = vld [vmem:[#allocation12 + $0x88] sm:$0xff] }
 0x61a   :  { %3587 = vtanh.f32 %v3438_v40  ;;  %v2197_v40 = vld [vmem:[#allocation12 + $0x70] sm:$0xff]  ;;  %v4509_v61 = vpack.c.bf16 %v2204_v3, %v2200_v55  ;;  %v2228_v55 = vld [vmem:[#allocation12 + $0x168] sm:$0xff]  ;;  %v2226_v3 = vld [vmem:[#allocation12 + $0x158] sm:$0xff] }
 0x61b   :  { %3589 = vrcp.f32 %v1828_v1  ;;  %v4507_v1 = vpack.c.bf16 %v2197_v40, %v2193_v27  ;;  %v2221_v27 = vld [vmem:[#allocation12 + $0x130] sm:$0xff]  ;;  %v2224_v40 = vld [vmem:[#allocation12 + $0x148] sm:$0xff] }
 0x61c   :  { %3591 = vrcp.f32 %v1834_v18  ;;  %v2203_v18 = vld [vmem:[#allocation12 + $0xa0] sm:$0xff] }
 0x623   :  { %v3586_v14 = vpop.eup %3585 }
 0x624   :  { %v3588_v36 = vpop.eup %3587  ;;  %v1838_v62 = vmul.f32 %v3586_v14, %v4406_v6  ;;  %v2202_v14 = vld [vmem:[#allocation12 + $0x98] sm:$0xff] }
 0x625   :  { %v3590_v51 = vpop.eup %3589 }
 0x626   :  { %v1839_v19 = vmul.f32 %v3590_v51, %v3588_v36  ;;  %v3592_v23 = vpop.eup %3591  ;;  %v2206_v36 = vld [vmem:[#allocation12 + $0xb8] sm:$0xff] }
 0x627   :  { %v4511_v51 = vpack.c.bf16 %v2206_v36, %v2202_v14  ;;  %v2230_v14 = vld [vmem:[#allocation12 + $0x178] sm:$0xff]  ;;  %v4538_v36 = vpack.c.bf16 %v2219_v25, %v2215_v2 }
 0x628   :  { %v1840_v46 = vadd.f32 %v1839_v19, %v1838_v62  ;;  %v2199_v62 = vld [vmem:[#allocation12 + $0x80] sm:$0xff]  ;;  %v2201_v19 = vld [vmem:[#allocation12 + $0x90] sm:$0xff] }
 0x62a   :  { %3593 = vtanh.f32 %v1840_v46 }
 0x634   :  { %v3594_v26 = vpop.eup %3593 }
 0x635   :  { %v1842_v53 = vmul.f32 %v3594_v26, %v3592_v23  ;;  %v4514_v23 = vpack.c.bf16 %v2203_v18, %v2199_v62  ;;  %v2208_v26 = vld [vmem:[#allocation12 + $0xc8] sm:$0xff]  ;;  %v4542_v62 = vpack.c.bf16 %v2221_v27, %v2217_v17  ;;  %v4544_v18 = vpack.c.bf16 %v2228_v55, %v2224_v40 }
 0x66b   :  { %v4469_v31 = vpop.permute.xlu0 %1845 }
 0x66c   :  { %4892 = vst [vmem:[#allocation26_spill] sm:$0xff] %v4469_v31  ;;  %v1848_v59 = vmul.f32 %v4469_v31, %v1842_v53  ;;  %v1857_v54 = vmul.f32 %v4469_v31, %v1840_v46  ;;  %v2205_v46 = vld [vmem:[#allocation12 + $0xb0] sm:$0xff]  ;;  %v2212_v53 = vld [vmem:[#allocation12 + $0xe8] sm:$0xff] }
 0x66d   :  { %v1853_v10 = vpop.permute.xlu1 %1852 }
 0x66e   :  { %v1855_v0 = vmul.f32 %v1853_v10, %v4404_v41  ;;  %v1858_v43 = vmul.f32 %v1853_v10, %v4406_v6  ;;  %v2184_v41 = vld [vmem:[#allocation12 + $0x8] sm:$0xff]  ;;  %v2210_v10 = vld [vmem:[#allocation12 + $0xd8] sm:$0xff] }
 0x66f   :  { %v2188_v6 = vld [vmem:[#allocation12 + $0x28] sm:$0xff] }
 0x670   :  { %v4475_v57 = vadd.f32 %v1855_v0, %v1848_v59  ;;  %v4477_v11 = vadd.f32 %v1858_v43, %v1857_v54  ;;  %v4487_v56 = vpack.c.bf16 %v2188_v6, %v2184_v41  ;;  %v4518_v59 = vpack.c.bf16 %v2205_v46, %v2201_v19  ;;  %v2214_v0 = vld [vmem:[#allocation12 + $0xf8] sm:$0xff]  ;;  %v2207_v43 = vld [vmem:[#allocation12 + $0xc0] sm:$0xff]  ;;  %v2209_v6 = vld [vmem:[#allocation12 + $0xd0] sm:$0xff] }
 0x671   :  { %v4520_v54 = vpack.c.bf16 %v2212_v53, %v2208_v26  ;;  %v4523_v41 = vpack.c.bf16 %v2214_v0, %v2210_v10  ;;  %v2223_v19 = vld [vmem:[#allocation12 + $0x140] sm:$0xff]  ;;  %v4547_v26 = vpack.c.bf16 %v2230_v14, %v2226_v3  ;;  %v2225_v53 = vld [vmem:[#allocation12 + $0x150] sm:$0xff]  ;;  %v2232_v3 = vld [vmem:[#allocation12 + $0x188] sm:$0xff] }
 0x672   :  { %1877 = vst [vmem:[#allocation13 + $0x20] sm:$0xff] %v4475_v57  ;;  %1879 = vst [vmem:[#allocation14 + $0x20] sm:$0xff] %v4477_v11  ;;  %2025 = vmatmul.mubr.f32.vlgmr.msra.gmra.mrb[10].mxu0 %v4475_v57  ;;  %2096 = vmatmul.mubr.f32.vlgmr.msra.gmra.mrb[10].mxu1 %v4475_v57  ;;  %v1860_v34 = vmul.f32 %v4112_v58, %v4477_v11  ;;  %v2192_v58 = vld [vmem:[#allocation12 + $0x48] sm:$0xff]  ;;  %v2227_v46 = vld [vmem:[#allocation12 + $0x160] sm:$0xff] }
 0x673   :  { %2311 = vmatprep.mubr.f32.mxu0 %v4885_v42  ;;  %2382 = vmatprep.mubr.f32.mxu1 %v4885_v42  ;;  %v4498_v32 = vpack.c.bf16 %v2196_v60, %v2192_v58  ;;  %v4530_v58 = vpack.c.bf16 %v2213_v38, %v2209_v6  ;;  %v4532_v60 = vpack.c.bf16 %v2220_v29, %v2216_v16  ;;  %v2229_v10 = vld [vmem:[#allocation12 + $0x170] sm:$0xff]  ;;  %v2236_v14 = vld [vmem:[#allocation12 + $0x1a8] sm:$0xff] }
 0x674   :  { %1861 = vadd.xlane.f32.xlu0 %v1860_v34  ;;  %3286 = vmatprep.subr.bf16.mxu0 %v4487_v56  ;;  %v2211_v34 = vld [vmem:[#allocation12 + $0xe0] sm:$0xff]  ;;  %v4550_v0 = vpack.c.bf16 %v2227_v46, %v2223_v19  ;;  %v2234_v19 = vld [vmem:[#allocation12 + $0x198] sm:$0xff]  ;;  %v4574_v46 = vpack.c.bf16 %v2236_v14, %v2232_v3 }
 0x675   :  { %3288 = vmatpush1.bf16.msra.mxu0 %v4491_v37  ;;  %3320 = vmatpush1.bf16.msra.mxu1 %v4494_v50  ;;  %v4526_v7 = vpack.c.bf16 %v2211_v34, %v2207_v43  ;;  %v4554_v43 = vpack.c.bf16 %v2229_v10, %v2225_v53  ;;  %v2238_v53 = vld [vmem:[#allocation12 + $0x1b8] sm:$0xff]  ;;  %v2231_v10 = vld [vmem:[#allocation12 + $0x180] sm:$0xff] }
 0x676   :  { %3290 = vmatprep.subr.bf16.mxu0 %v4498_v32  ;;  %3322 = vmatprep.subr.bf16.mxu1 %v4500_v33  ;;  %v2239_v3 = vld [vmem:[#allocation12 + $0x1c0] sm:$0xff] }
 0x677   :  { %v2243_v14 = vld [vmem:[#allocation12 + $0x1e0] sm:$0xff] }
 0x679   :  { %3292 = vmatpush1.bf16.msra.mxu0 %v4503_v30  ;;  %3324 = vmatpush1.bf16.msra.mxu1 %v4507_v1 }
 0x67a   :  { %3294 = vmatprep.subr.bf16.mxu0 %v4509_v61  ;;  %3326 = vmatprep.subr.bf16.mxu1 %v4511_v51 }
 0x67d   :  { %3296 = vmatpush1.bf16.msra.mxu0 %v4514_v23  ;;  %3328 = vmatpush1.bf16.msra.mxu1 %v4518_v59 }
 0x67e   :  { %3298 = vmatprep.subr.bf16.mxu0 %v4520_v54  ;;  %3330 = vmatprep.subr.bf16.mxu1 %v4523_v41 }
 0x681   :  { %3300 = vmatpush1.bf16.msra.mxu0 %v4526_v7  ;;  %3332 = vmatpush1.bf16.msra.mxu1 %v4530_v58 }
 0x682   :  { %3302 = vmatprep.subr.bf16.mxu0 %v4532_v60  ;;  %3334 = vmatprep.subr.bf16.mxu1 %v4535_v21 }
 0x685   :  { %3304 = vmatpush1.bf16.msra.mxu0 %v4538_v36  ;;  %3336 = vmatpush1.bf16.msra.mxu1 %v4542_v62 }
 0x686   :  { %3306 = vmatprep.subr.bf16.mxu0 %v4544_v18  ;;  %3338 = vmatprep.subr.bf16.mxu1 %v4547_v26 }
 0x689   :  { %3308 = vmatpush1.bf16.msra.mxu0 %v4550_v0  ;;  %3340 = vmatpush1.bf16.msra.mxu1 %v4554_v43 }
 0x68a   :  { %3310 = vmatprep.subr.bf16.mxu0 %v4574_v46 }
 0x701   :  { %v1862_v34 = vpop.xlane.xlu0 %1861 }
 0x702   :  { %v1863_v6 = vadd.f32 %v1862_v34, %v4161_v48  ;;  %v2235_v34 = vld [vmem:[#allocation12 + $0x1a0] sm:$0xff] }
 0x704   :  { %v2824_v38 = vmul.f32 -1.442695, %v1863_v6 }
 0x706   :  { %3595 = vpow2.f32 %v2824_v38  ;;  %v4577_v38 = vpack.c.bf16 %v2238_v53, %v2234_v19  ;;  %v4593_v53 = vpack.c.bf16 %v2243_v14, %v2239_v3 }
 0x708   :  { %3342 = vmatprep.subr.bf16.mxu1 %v4577_v38 }
 0x710   :  { %v3596_v16 = vpop.eup %3595 }
 0x711   :  { %v1867_v29 = vadd.f32 1.0, %v3596_v16  ;;  %v2237_v16 = vld [vmem:[#allocation12 + $0x1b0] sm:$0xff] }
 0x713   :  { %3597 = vrcp.f32 %v1867_v29 }
 0x71d   :  { %v4560_v35 = vpop.eup %3597 }
 0x71e   :  { %4893 = vst [vmem:[#allocation27_spill] sm:$0xff] %v4560_v35  ;;  %v1871_v52 = vadd.f32 %v4560_v35, %v4455_v9  ;;  %v1870_v17 = vmul.f32 %v4560_v35, %v4458_v13  ;;  %v4579_v13 = vpack.c.bf16 %v2235_v34, %v2231_v10  ;;  %v2241_v10 = vld [vmem:[#allocation12 + $0x1d0] sm:$0xff] }
 0x71f   :  { %v2245_v34 = vld [vmem:[#allocation12 + $0x1f0] sm:$0xff] }
 0x720   :  { %v1872_v2 = vmax.f32 %v1871_v52, 0.0  ;;  %v2240_v52 = vld [vmem:[#allocation12 + $0x1c8] sm:$0xff]  ;;  %3312 = vmatpush1.bf16.msra.mxu0 %v4579_v13 }
 0x722   :  { %v1873_v25 = vmin.f32 %v1872_v2, 1.0  ;;  %v2244_v2 = vld [vmem:[#allocation12 + $0x1e8] sm:$0xff] }
 0x724   :  { %v1874_v27 = vmul.f32 %v1873_v25, %v1849_v15  ;;  %v2233_v15 = vld [vmem:[#allocation12 + $0x190] sm:$0xff]  ;;  %v2242_v25 = vld [vmem:[#allocation12 + $0x1d8] sm:$0xff] }
 0x725   :  { %v4582_v29 = vpack.c.bf16 %v2237_v16, %v2233_v15  ;;  %v4596_v15 = vpack.c.bf16 %v2245_v34, %v2241_v10 }
 0x726   :  { %v4568_v40 = vadd.f32 %v1874_v27, %v1870_v17  ;;  %v4589_v17 = vpack.c.bf16 %v2244_v2, %v2240_v52  ;;  %v2246_v27 = vld [vmem:[#allocation12 + $0x1f8] sm:$0xff] }
 0x727   :  { %3344 = vmatpush1.bf16.msra.mxu1 %v4582_v29  ;;  %v4591_v19 = vpack.c.bf16 %v2246_v27, %v2242_v25 }
 0x728   :  { %v4571_v55 = vround.rtne.f32 %v4568_v40  ;;  %3314 = vmatprep.subr.bf16.mxu0 %v4589_v17 }
 0x729   :  { %3346 = vmatprep.subr.bf16.mxu1 %v4591_v19  ;;  %3316 = vmatpush1.bf16.msra.mxu0 %v4593_v53 }
 0x72a   :  { %2132 = vperm.xlu1 %3498, %v4571_v55   ;;  %v4878_v6 = vsub.f32 1.0, %v4571_v55  ;;  %3350 = vmatprep.subr.bf16.mxu0 %v4487_v56 }
 0x72b   :  { %3348 = vmatpush1.bf16.msra.mxu1 %v4596_v15 }
 0x72c   :  { %3382 = vmatprep.subr.bf16.mxu1 %v4489_v28 }
 0x72e   :  { %2139 = vperm.xlu1 %3498, %v4878_v6  }
 0x745   :  { %v2026_v16 = vpop.f32.mrb[10].mxu0  ;;  %v2097_v52 = vpop.f32.mrb[10].mxu1 }
 0x746   :  { %v3423_v2 = vadd.f32 %v2026_v16, %v4091_v45  ;;  %v2028_v25 = vpop.f32.mrb[11].mxu0  ;;  %v2099_v27 = vpop.f32.mrb[11].mxu1  ;;  %v3439_v34 = vadd.f32 %v2097_v52, %v4097_v63 }
 0x747   :  { %v3424_v3 = vadd.f32 %v2028_v25, %v4093_v47  ;;  %v3440_v56 = vadd.f32 %v2099_v27, %v4100_v8 }
 0x748   :  { %v2825_v14 = vmul.f32 -1.442695, %v3423_v2  ;;  %v2827_v6 = vmul.f32 -1.442695, %v3439_v34 }
 0x749   :  { %v2826_v10 = vmul.f32 -1.442695, %v3424_v3 }
 0x74a   :  { %3599 = vpow2.f32 %v2825_v14 }
 0x74b   :  { %3601 = vpow2.f32 %v2826_v10 }
 0x74c   :  { %3603 = vpow2.f32 %v2827_v6 }
 0x754   :  { %v3600_v20 = vpop.eup %3599 }
 0x755   :  { %v2109_v12 = vadd.f32 1.0, %v3600_v20  ;;  %v3602_v28 = vpop.eup %3601 }
 0x756   :  { %v2115_v9 = vadd.f32 1.0, %v3602_v28  ;;  %v3604_v16 = vpop.eup %3603 }
 0x757   :  { %3605 = vrcp.f32 %v2109_v12  ;;  %v2121_v14 = vadd.f32 1.0, %v3604_v16 }
 0x758   :  { %3607 = vtanh.f32 %v3440_v56 }
 0x759   :  { %3609 = vrcp.f32 %v2115_v9 }
 0x75a   :  { %3611 = vrcp.f32 %v2121_v14 }
 0x761   :  { %v3606_v31 = vpop.eup %3605 }
 0x762   :  { %v3608_v25 = vpop.eup %3607  ;;  %v2125_v2 = vmul.f32 %v3606_v31, %v4477_v11 }
 0x763   :  { %v3610_v3 = vpop.eup %3609 }
 0x764   :  { %v2126_v10 = vmul.f32 %v3610_v3, %v3608_v25  ;;  %v3612_v34 = vpop.eup %3611  ;;  %v4625_v25 = vld [vmem:[%s4866_s7] ss:$0 sm:$0xff]  ;;  %s3809_s7 = smov [#allocation14]  }
 0x765   :  { %s2772_s26 = sshll.u32 %s3809_s7, 4  ;;  %s2773_s26 = int_to_ptr.vmem [resolvable:$true] %s2772_s26 }
 0x766   :  { %v2127_v52 = vadd.f32 %v2126_v10, %v2125_v2  ;;  %s3726_s12 = scalar_lea.vmem %s2773_s26, 1024  ;;  %p3731_p11 = scmp.lt.s32.totalorder %s2773_s26, %s2773_s26 }
 0x767   :  { %p3727_p10 = scmp.ne.s32.totalorder %s2773_s26, %s3726_s12  ;;  %p3732_p12 = scmp.lt.s32.totalorder %s3726_s12, %s3726_s12 }
 0x768   :  { %3613 = vtanh.f32 %v2127_v52 }
 0x769   :  { %p3733_p13 = por %p3732_p12, %p3731_p11 }
 0x76b   :  { %p3734_p0 = pnand %p3733_p13, %p3727_p10 }
 0x772   :  { %v3614_v27 = vpop.eup %3613 }
 0x773   :  { %v2129_v20 = vmul.f32 %v3614_v27, %v3612_v34 }
 0x7a9   :  { %v4608_v35 = vpop.permute.xlu1 %2132 }
 0x7aa   :  { %v2135_v6 = vmul.f32 %v4608_v35, %v2129_v20  ;;  %v2144_v9 = vmul.f32 %v4608_v35, %v2127_v52 }
 0x7ad   :  { %v2140_v12 = vpop.permute.xlu1 %2139 }
 0x7ae   :  { %v2142_v56 = vmul.f32 %v2140_v12, %v4475_v57  ;;  %v2145_v31 = vmul.f32 %v2140_v12, %v4477_v11 }
 0x7b0   :  { %v4614_v28 = vadd.f32 %v2142_v56, %v2135_v6  ;;  %v4616_v16 = vadd.f32 %v2145_v31, %v2144_v9 }
 0x7b2   :  { %2164 = vst [vmem:[#allocation13 + $0x28] sm:$0xff] %v4614_v28  ;;  %2166 = vst [vmem:[#allocation14 + $0x28] sm:$0xff] %v4616_v16  ;;  %2312 = vmatmul.mubr.f32.vlgmr.msra.gmra.mrb[12].mxu0 %v4614_v28  ;;  %2383 = vmatmul.mubr.f32.vlgmr.msra.gmra.mrb[12].mxu1 %v4614_v28  ;;  %v2147_v57 = vmul.f32 %v4625_v25, %v4616_v16 }
 0x7b3   :  { %3352 = vmatpush1.bf16.msra.mxu0 %v4491_v37  ;;  %3384 = vmatpush1.bf16.msra.mxu1 %v4494_v50 }
 0x7b4   :  { %2148 = vadd.xlane.f32.xlu1 %v2147_v57  ;;  %3354 = vmatprep.subr.bf16.mxu0 %v4498_v32 }
 0x7b5   :  { %3386 = vmatprep.subr.bf16.mxu1 %v4500_v33  ;;  %2598 = vmatprep.mubr.f32.mxu0 %v4885_v42 }
 0x7b6   :  { %2669 = vmatprep.mubr.f32.mxu1 %v4885_v42 }
 0x7b7   :  { %3356 = vmatpush1.bf16.msra.mxu0 %v4503_v30  ;;  %3388 = vmatpush1.bf16.msra.mxu1 %v4507_v1 }
 0x7b8   :  { %3358 = vmatprep.subr.bf16.mxu0 %v4509_v61  ;;  %3390 = vmatprep.subr.bf16.mxu1 %v4511_v51 }
 0x7bb   :  { %3360 = vmatpush1.bf16.msra.mxu0 %v4514_v23  ;;  %3392 = vmatpush1.bf16.msra.mxu1 %v4518_v59  ;;  %v4894_v23 = vsub.f32 1.0, %v4571_v55 }
 0x7bc   :  { %3362 = vmatprep.subr.bf16.mxu0 %v4520_v54  ;;  %3394 = vmatprep.subr.bf16.mxu1 %v4523_v41 }
 0x7bf   :  { %3364 = vmatpush1.bf16.msra.mxu0 %v4526_v7  ;;  %3396 = vmatpush1.bf16.msra.mxu1 %v4530_v58 }
 0x7c0   :  { %3366 = vmatprep.subr.bf16.mxu0 %v4532_v60  ;;  %3398 = vmatprep.subr.bf16.mxu1 %v4535_v21 }
 0x7c3   :  { %3368 = vmatpush1.bf16.msra.mxu0 %v4538_v36  ;;  %3400 = vmatpush1.bf16.msra.mxu1 %v4542_v62 }
 0x7c4   :  { %3370 = vmatprep.subr.bf16.mxu0 %v4544_v18  ;;  %3402 = vmatprep.subr.bf16.mxu1 %v4547_v26 }
 0x7c7   :  { %3372 = vmatpush1.bf16.msra.mxu0 %v4550_v0  ;;  %3404 = vmatpush1.bf16.msra.mxu1 %v4554_v43 }
 0x7c8   :  { %3374 = vmatprep.subr.bf16.mxu0 %v4574_v46  ;;  %3406 = vmatprep.subr.bf16.mxu1 %v4577_v38 }
 0x7cb   :  { %3376 = vmatpush1.bf16.msra.mxu0 %v4579_v13  ;;  %3408 = vmatpush1.bf16.msra.mxu1 %v4582_v29 }
 0x7cc   :  { %3378 = vmatprep.subr.bf16.mxu0 %v4589_v17  ;;  %3410 = vmatprep.subr.bf16.mxu1 %v4591_v19 }
 0x7cf   :  { %3380 = vmatpush1.bf16.msra.mxu0 %v4593_v53  ;;  %3412 = vmatpush1.bf16.msra.mxu1 %v4596_v15 }
 0x841   :  { %v2149_v42 = vpop.xlane.xlu1 %2148 }
 0x842   :  { %v2150_v11 = vadd.f32 %v2149_v42, %v4161_v48 }
 0x844   :  { %v2828_v37 = vmul.f32 -1.442695, %v2150_v11 }
 0x846   :  { %3615 = vpow2.f32 %v2828_v37 }
 0x850   :  { %v3616_v50 = vpop.eup %3615 }
 0x851   :  { %v2154_v32 = vadd.f32 1.0, %v3616_v50  ;;  %v4895_v50 = vlaneseq }
 0x853   :  { %3617 = vrcp.f32 %v2154_v32  ;;  %v4707_v32 = vand.u32 127, %v4895_v50 }
 0x855   :  { %vm732_vm1 = vcmp.eq.s32.totalorder %v4707_v32, 2  ;;  %vm731_vm2 = vcmp.eq.s32.totalorder %v4707_v32, 1  ;;  %vm730_vm3 = vcmp.eq.s32.totalorder %v4707_v32, 0 }
 0x85d   :  { %v4662_v33 = vpop.eup %3617 }
 0x85e   :  { %v2158_v30 = vadd.f32 %v4662_v33, %v4568_v40  ;;  %v2157_v51 = vmul.f32 %v4662_v33, %v4571_v55 }
 0x860   :  { %v2159_v1 = vmax.f32 %v2158_v30, 0.0 }
 0x862   :  { %v2160_v61 = vmin.f32 %v2159_v1, 1.0  ;;  %v1019_v1 = vsel %vm732_vm1, %v4277_v49, 0.0  ;;  %v4897_v49 = vld [vmem:[#allocation21_spill] sm:$0xff] }
 0x864   :  { %v2161_v59 = vmul.f32 %v2160_v61, %v4894_v23 }
 0x866   :  { %v4670_v54 = vadd.f32 %v2161_v59, %v2157_v51 }
 0x868   :  { %v4673_v41 = vround.rtne.f32 %v4670_v54 }
 0x86a   :  { %2419 = vperm.xlu0 %3497, %v4673_v41   ;;  %v2423_v7 = vsub.f32 1.0, %v4673_v41 }
 0x86e   :  { %2426 = vperm.xlu0 %3497, %v2423_v7  }
 0x885   :  { %v2313_v58 = vpop.f32.mrb[12].mxu0  ;;  %v2384_v60 = vpop.f32.mrb[12].mxu1 }
 0x886   :  { %v3425_v21 = vadd.f32 %v2313_v58, %v4091_v45  ;;  %v2315_v36 = vpop.f32.mrb[13].mxu0  ;;  %v2386_v62 = vpop.f32.mrb[13].mxu1  ;;  %v3441_v43 = vadd.f32 %v2384_v60, %v4097_v63  ;;  %v4896_v58 = vld [vmem:[#allocation22_spill] sm:$0xff] }
 0x887   :  { %v3426_v18 = vadd.f32 %v2315_v36, %v4093_v47  ;;  %v3442_v38 = vadd.f32 %v2386_v62, %v4100_v8  ;;  %v4898_v62 = vld [vmem:[#allocation27_spill] sm:$0xff] }
 0x888   :  { %v2829_v26 = vmul.f32 -1.442695, %v3425_v21  ;;  %v2831_v55 = vmul.f32 -1.442695, %v3441_v43 }
 0x889   :  { %v2830_v0 = vmul.f32 -1.442695, %v3426_v18 }
 0x88a   :  { %3619 = vpow2.f32 %v2829_v26 }
 0x88b   :  { %3621 = vpow2.f32 %v2830_v0  ;;  %v4899_v0 = vld [vmem:[#allocation26_spill] sm:$0xff] }
 0x88c   :  { %3623 = vpow2.f32 %v2831_v55  ;;  %v2167_v55 = vsel %vm732_vm1, %v4662_v33, 0.0 }
 0x894   :  { %v3620_v46 = vpop.eup %3619 }
 0x895   :  { %v2396_v13 = vadd.f32 1.0, %v3620_v46  ;;  %v3622_v29 = vpop.eup %3621 }
 0x896   :  { %v2402_v17 = vadd.f32 1.0, %v3622_v29  ;;  %v3624_v19 = vpop.eup %3623 }
 0x897   :  { %3625 = vrcp.f32 %v2396_v13  ;;  %v2408_v14 = vadd.f32 1.0, %v3624_v19 }
 0x898   :  { %3627 = vtanh.f32 %v3442_v38 }
 0x899   :  { %3629 = vrcp.f32 %v2402_v17 }
 0x89a   :  { %3631 = vrcp.f32 %v2408_v14 }
 0x8a1   :  { %v3626_v53 = vpop.eup %3625 }
 0x8a2   :  { %v3628_v15 = vpop.eup %3627  ;;  %v2412_v2 = vmul.f32 %v3626_v53, %v4616_v16 }
 0x8a3   :  { %v3630_v3 = vpop.eup %3629 }
 0x8a4   :  { %v2413_v10 = vmul.f32 %v3630_v3, %v3628_v15  ;;  %v3632_v34 = vpop.eup %3631 }
 0x8a6   :  { %v2414_v52 = vadd.f32 %v2413_v10, %v2412_v2 }
 0x8a8   :  { %3633 = vtanh.f32 %v2414_v52 }
 0x8b2   :  { %v3634_v27 = vpop.eup %3633 }
 0x8b3   :  { %v2416_v20 = vmul.f32 %v3634_v27, %v3632_v34 }
 0x8e9   :  { %v4684_v12 = vpop.permute.xlu0 %2419 }
 0x8ea   :  { %v2422_v9 = vmul.f32 %v4684_v12, %v2416_v20  ;;  %v2431_v56 = vmul.f32 %v4684_v12, %v2414_v52 }
 0x8ed   :  { %v2427_v6 = vpop.permute.xlu0 %2426 }
 0x8ee   :  { %v2429_v31 = vmul.f32 %v2427_v6, %v4614_v28  ;;  %v2432_v57 = vmul.f32 %v2427_v6, %v4616_v16 }
 0x8f0   :  { %v4690_v42 = vadd.f32 %v2429_v31, %v2422_v9  ;;  %v4692_v11 = vadd.f32 %v2432_v57, %v2431_v56 }
 0x8f2   :  { %2451 = vst [vmem:[#allocation13 + $0x30] sm:$0xff] %v4690_v42  ;;  %2453 = vst [vmem:[#allocation14 + $0x30] sm:$0xff] %v4692_v11  ;;  %2599 = vmatmul.mubr.f32.vlgmr.msra.gmra.mrb[14].mxu0 %v4690_v42  ;;  %2670 = vmatmul.mubr.f32.vlgmr.msra.gmra.mrb[14].mxu1 %v4690_v42  ;;  %v2434_v37 = vmul.f32 %v4625_v25, %v4692_v11 }
 0x8f4   :  { %2435 = vadd.xlane.f32.xlu0 %v2434_v37 }
 0x90a   :  { %736 = vperm.xlu0 %3497, %v4172_v24   ;;  %v733_v24 = vsel %vm732_vm1, %v4164_v4, 0.0 }
 0x90e   :  { %1022 = vperm.xlu0 %3497, %v4285_v5  }
 0x912   :  { %1309 = vperm.xlu0 %3497, %v4384_v39  }
 0x916   :  { %1883 = vperm.xlu0 %3497, %v4568_v40  }
 0x91a   :  { %2170 = vperm.xlu0 %3497, %v4670_v54  }
 0x981   :  { %v2436_v28 = vpop.xlane.xlu0 %2435 }
 0x982   :  { %v2437_v16 = vadd.f32 %v2436_v28, %v4161_v48 }
 0x984   :  { %v2832_v30 = vmul.f32 -1.442695, %v2437_v16 }
 0x986   :  { %3635 = vpow2.f32 %v2832_v30 }
 0x989   :  { %v737_v5 = vpop.permute.xlu0 %736 }
 0x98a   :  { %v739_v39 = vsel %vm731_vm2, %v737_v5, %v733_v24 }
 0x98b   :  { %v740_v40 = vsel %vm730_vm3, %v4103_v22, %v739_v39  ;;  %v1306_v22 = vsel %vm732_vm1, %v4896_v58, 0.0 }
 0x98c   :  { %741 = vst [vmem:[#allocation16] sm:$0xff] %v740_v40 }
 0x98d   :  { %v1023_v61 = vpop.permute.xlu0 %1022 }
 0x98e   :  { %v1025_v51 = vsel %vm731_vm2, %v1023_v61, %v1019_v1 }
 0x98f   :  { %v1026_v4 = vsel %vm730_vm3, %v4186_v44, %v1025_v51  ;;  %v1880_v44 = vsel %vm732_vm1, %v4898_v62, 0.0 }
 0x990   :  { %v3636_v23 = vpop.eup %3635  ;;  %1028 = vst [vmem:[#allocation16 + $0x8] sm:$0xff] %v1026_v4 }
 0x991   :  { %v2441_v59 = vadd.f32 1.0, %v3636_v23  ;;  %v1310_v60 = vpop.permute.xlu0 %1309 }
 0x992   :  { %v1312_v21 = vsel %vm731_vm2, %v1310_v60, %v1306_v22 }
 0x993   :  { %3637 = vrcp.f32 %v2441_v59  ;;  %v1313_v36 = vsel %vm730_vm3, %v4897_v49, %v1312_v21 }
 0x994   :  { %1315 = vst [vmem:[#allocation16 + $0x10] sm:$0xff] %v1313_v36 }
 0x995   :  { %v1884_v18 = vpop.permute.xlu0 %1883 }
 0x996   :  { %v1886_v26 = vsel %vm731_vm2, %v1884_v18, %v1880_v44 }
 0x997   :  { %v1887_v43 = vsel %vm730_vm3, %v4899_v0, %v1886_v26  ;;  %v4901_v26 = vld [vmem:[#allocation24_spill] sm:$0xff] }
 0x998   :  { %1889 = vst [vmem:[#allocation16 + $0x20] sm:$0xff] %v1887_v43  ;;  %v1593_v0 = vsel %vm732_vm1, %v4901_v26, 0.0  ;;  %v4902_v43 = vld [vmem:[#allocation23_spill] sm:$0xff] }
 0x999   :  { %v2171_v46 = vpop.permute.xlu0 %2170 }
 0x99a   :  { %v2173_v38 = vsel %vm731_vm2, %v2171_v46, %v2167_v55 }
 0x99b   :  { %v2174_v13 = vsel %vm730_vm3, %v4608_v35, %v2173_v38 }
 0x99c   :  { %2176 = vst [vmem:[#allocation16 + $0x28] sm:$0xff] %v2174_v13 }
 0x99d   :  { %v3638_v29 = vpop.eup %3637 }
 0x99e   :  { %v2445_v17 = vadd.f32 %v3638_v29, %v4670_v54  ;;  %v2444_v15 = vmul.f32 %v3638_v29, %v4673_v41  ;;  %v2454_v40 = vsel %vm732_vm1, %v3638_v29, 0.0 }
 0x9a0   :  { %v2446_v19 = vmax.f32 %v2445_v17, 0.0 }
 0x9a2   :  { %v2447_v53 = vmin.f32 %v2446_v19, 1.0 }
 0x9a4   :  { %v2448_v2 = vmul.f32 %v2447_v53, %v2423_v7 }
 0x9a6   :  { %v4756_v33 = vadd.f32 %v2448_v2, %v2444_v15 }
 0x9a8   :  { %2457 = vperm.xlu0 %3497, %v4756_v33   ;;  %v4760_v3 = vround.rtne.f32 %v4756_v33 }
 0x9aa   :  { %2706 = vperm.xlu1 %3498, %v4760_v3   ;;  %v2710_v35 = vsub.f32 1.0, %v4760_v3 }
 0x9ae   :  { %2713 = vperm.xlu1 %3498, %v2710_v35  }
 0x9c5   :  { %v2600_v54 = vpop.f32.mrb[14].mxu0  ;;  %v2671_v14 = vpop.f32.mrb[14].mxu1 }
 0x9c6   :  { %v3427_v10 = vadd.f32 %v2600_v54, %v4091_v45  ;;  %v2602_v41 = vpop.f32.mrb[15].mxu0  ;;  %v2673_v7 = vpop.f32.mrb[15].mxu1  ;;  %v3443_v20 = vadd.f32 %v2671_v14, %v4097_v63 }
 0x9c7   :  { %v3428_v52 = vadd.f32 %v2602_v41, %v4093_v47  ;;  %v3444_v56 = vadd.f32 %v2673_v7, %v4100_v8 }
 0x9c8   :  { %v2833_v34 = vmul.f32 -1.442695, %v3427_v10  ;;  %v2835_v6 = vmul.f32 -1.442695, %v3443_v20 }
 0x9c9   :  { %v2834_v27 = vmul.f32 -1.442695, %v3428_v52 }
 0x9ca   :  { %3639 = vpow2.f32 %v2833_v34 }
 0x9cb   :  { %3641 = vpow2.f32 %v2834_v27 }
 0x9cc   :  { %3643 = vpow2.f32 %v2835_v6 }
 0x9d4   :  { %v3640_v9 = vpop.eup %3639 }
 0x9d5   :  { %v2683_v31 = vadd.f32 1.0, %v3640_v9  ;;  %v3642_v57 = vpop.eup %3641 }
 0x9d6   :  { %v2689_v37 = vadd.f32 1.0, %v3642_v57  ;;  %v3644_v45 = vpop.eup %3643 }
 0x9d7   :  { %3645 = vrcp.f32 %v2683_v31  ;;  %v2695_v30 = vadd.f32 1.0, %v3644_v45 }
 0x9d8   :  { %3647 = vtanh.f32 %v3444_v56 }
 0x9d9   :  { %3649 = vrcp.f32 %v2689_v37 }
 0x9da   :  { %3651 = vrcp.f32 %v2695_v30 }
 0x9e1   :  { %v3646_v28 = vpop.eup %3645 }
 0x9e2   :  { %v3648_v47 = vpop.eup %3647  ;;  %v2699_v16 = vmul.f32 %v3646_v28, %v4692_v11 }
 0x9e3   :  { %v3650_v50 = vpop.eup %3649 }
 0x9e4   :  { %v2700_v24 = vmul.f32 %v3650_v50, %v3648_v47  ;;  %v3652_v5 = vpop.eup %3651 }
 0x9e6   :  { %v2701_v63 = vadd.f32 %v2700_v24, %v2699_v16 }
 0x9e8   :  { %3653 = vtanh.f32 %v2701_v63 }
 0x9f2   :  { %v3654_v8 = vpop.eup %3653 }
 0x9f3   :  { %v2703_v39 = vmul.f32 %v3654_v8, %v3652_v5 }
 0xa27   :  { %v2458_v1 = vpop.permute.xlu0 %2457 }
 0xa28   :  { %v2460_v61 = vsel %vm731_vm2, %v2458_v1, %v2454_v40 }
 0xa29   :  { %v2461_v51 = vsel %vm730_vm3, %v4684_v12, %v2460_v61  ;;  %v4778_v4 = vpop.permute.xlu1 %2706  ;;  %v4900_v12 = vld [vmem:[#allocation25_spill] sm:$0xff] }
 0xa2a   :  { %2463 = vst [vmem:[#allocation16 + $0x30] sm:$0xff] %v2461_v51  ;;  %v2709_v59 = vmul.f32 %v4778_v4, %v2703_v39  ;;  %v2718_v58 = vmul.f32 %v4778_v4, %v2701_v63 }
 0xa2d   :  { %v2714_v23 = vpop.permute.xlu1 %2713 }
 0xa2e   :  { %v2716_v22 = vmul.f32 %v2714_v23, %v4690_v42  ;;  %v2719_v60 = vmul.f32 %v2714_v23, %v4692_v11 }
 0xa30   :  { %v2717_v21 = vadd.f32 %v2716_v22, %v2709_v59  ;;  %v2720_v49 = vadd.f32 %v2719_v60, %v2718_v58 }
 0xa32   :  { %2738 = vst [vmem:[#allocation13 + $0x38] sm:$0xff] %v2717_v21  ;;  %v2721_v36 = vmul.f32 %v4625_v25, %v2720_v49  ;;  %2740 = vst [vmem:[#allocation14 + $0x38] sm:$0xff] %v2720_v49 }
 0xa34   :  { %2722 = vadd.xlane.f32.xlu1 %v2721_v36 }
 0xa45   :  { %1596 = vperm.xlu1 %3498, %v4900_v12  }
 0xac1   :  { %v2723_v62 = vpop.xlane.xlu1 %2722 }
 0xac2   :  { %v2724_v44 = vadd.f32 %v2723_v62, %v4161_v48 }
 0xac4   :  { %v2836_v18 = vmul.f32 -1.442695, %v2724_v44 }
 0xac5   :  { %v1597_v42 = vpop.permute.xlu1 %1596 }
 0xac6   :  { %3655 = vpow2.f32 %v2836_v18  ;;  %v1599_v11 = vsel %vm731_vm2, %v1597_v42, %v1593_v0 }
 0xac7   :  { %v1600_v25 = vsel %vm730_vm3, %v4902_v43, %v1599_v11 }
 0xac8   :  { %1602 = vst [vmem:[#allocation16 + $0x18] sm:$0xff] %v1600_v25 }
 0xad0   :  { %v3656_v55 = vpop.eup %3655 }
 0xad1   :  { %v2728_v46 = vadd.f32 1.0, %v3656_v55 }
 0xad3   :  { %3657 = vrcp.f32 %v2728_v46 }
 0xadd   :  { %v3658_v38 = vpop.eup %3657 }
 0xade   :  { %v2732_v48 = vadd.f32 %v3658_v38, %v4756_v33  ;;  %v2731_v17 = vmul.f32 %v3658_v38, %v4760_v3 }
 0xae0   :  { %v2733_v13 = vmax.f32 %v2732_v48, 0.0 }
 0xae2   :  { %v2734_v29 = vmin.f32 %v2733_v13, 1.0 }
 0xae4   :  { %v2735_v19 = vmul.f32 %v2734_v29, %v2710_v35 }
 0xae6   :  { %v2736_v53 = vadd.f32 %v2735_v19, %v2731_v17 }
 0xae8   :  { %2744 = vperm.xlu0 %3497, %v2736_v53   ;;  %2754 = vst.msk [vmem:[#allocation4] sm:$0xff] %vm88_vm0, %v2736_v53 }
 0xae9   :  { %3737 = shalt.err (!%p3734_p0)
}
 0xaea   :  { %s3738_s16 = scalar_lea.hbm %s4869_s10, 1024 }
 0xaeb   :  { %p3739_p1 = scmp.ne.s32.totalorder %s4869_s10, %s3738_s16  ;;  %p3742_p2 = scmp.lt.u32.totalorder %s3738_s16, %s4869_s10 }
 0xaed   :  { %p3744_p3 = pnand %p3742_p2, %p3739_p1 }
 0xaef   :  { %3747 = shalt.err (!%p3744_p3)
}
 0xaf0   :  { %2778 = dma.vmem_to_hbm [thread:$0]  %s2773_s26, 1024, %s4869_s10, [#allocation15], %s3804_s4, %s3804_s4, %s3805_s18  }
 0xaf1   :  { %s3748_s3 = scalar_lea.vmem %s4800_s30, 1024  ;;  %p3753_p5 = scmp.lt.s32.totalorder %s4800_s30, %s4800_s30 }
 0xaf2   :  { %p3749_p4 = scmp.ne.s32.totalorder %s4800_s30, %s3748_s3  ;;  %p3754_p6 = scmp.lt.s32.totalorder %s3748_s3, %s3748_s3 }
 0xaf4   :  { %p3755_p7 = por %p3754_p6, %p3753_p5 }
 0xaf6   :  { %p3756_p8 = pnand %p3755_p7, %p3749_p4 }
 0xaf8   :  { %3759 = shalt.err (!%p3756_p8)
}
 0xaf9   :  { %s3760_s20 = scalar_lea.hbm %s4868_s9, 1024 }
 0xafa   :  { %p3761_p9 = scmp.ne.s32.totalorder %s4868_s9, %s3760_s20  ;;  %p3764_p10 = scmp.lt.u32.totalorder %s3760_s20, %s4868_s9 }
 0xafc   :  { %p3766_p11 = pnand %p3764_p10, %p3761_p9 }
 0xafe   :  { %3769 = shalt.err (!%p3766_p11)
}
 0xaff   :  { %2766 = dma.vmem_to_hbm [thread:$0]  %s4800_s30, 1024, %s4868_s9, [#allocation9], %s3804_s4, %s3804_s4, %s3805_s18   ;;  %v2741_v15 = vsel %vm732_vm1, %v3658_v38, 0.0 }
 0xb00   :  { %s3811_s24 = smov [#allocation16]  }
 0xb01   :  { %s2784_s8 = sshll.u32 %s3811_s24, 4  ;;  %s2785_s8 = int_to_ptr.vmem [resolvable:$true] %s2784_s8 }
 0xb02   :  { %s3770_s25 = scalar_lea.vmem %s2785_s8, 1024  ;;  %p3775_p13 = scmp.lt.s32.totalorder %s2785_s8, %s2785_s8 }
 0xb03   :  { %p3771_p12 = scmp.ne.s32.totalorder %s2785_s8, %s3770_s25  ;;  %p3776_p0 = scmp.lt.s32.totalorder %s3770_s25, %s3770_s25 }
 0xb05   :  { %p3777_p1 = por %p3776_p0, %p3775_p13 }
 0xb07   :  { %p3778_p2 = pnand %p3777_p1, %p3771_p12 }
 0xb67   :  { %v2745_v2 = vpop.permute.xlu0 %2744 }
 0xb68   :  { %v2747_v33 = vsel %vm731_vm2, %v2745_v2, %v2741_v15 }
 0xb69   :  { %v2748_v3 = vsel %vm730_vm3, %v4778_v4, %v2747_v33 }
 0xb6a   :  { %2750 = vst [vmem:[#allocation16 + $0x38] sm:$0xff] %v2748_v3 }
 0xb6b   :  { %3781 = shalt.err (!%p3778_p2)
}
 0xb6c   :  { %s3782_s26 = scalar_lea.hbm %s4870_s11, 1024 }
 0xb6d   :  { %p3783_p3 = scmp.ne.s32.totalorder %s4870_s11, %s3782_s26  ;;  %p3786_p4 = scmp.lt.u32.totalorder %s3782_s26, %s4870_s11 }
 0xb6f   :  { %p3788_p5 = pnand %p3786_p4, %p3783_p3 }
 0xb71   :  { %3791 = shalt.err (!%p3788_p5)
}
 0xb72   :  { %2790 = dma.vmem_to_hbm [thread:$0]  %s2785_s8, 1024, %s4870_s11, [#allocation15], %s3804_s4, %s3804_s4, %s3805_s18  }
 0xb73   :  { %3796 = dma.done.wait [#allocation9], 1024  }
 0xb74   :  { %3797 = vsyncadd [#allocation9], 4294966272 }
 0xb75   :  { %3798 = dma.done.wait [#allocation15], 2048  }
 0xb76   :  { %3799 = vsyncadd [#allocation15], 4294965248 }
 0xb77   :  { %2800 = vsyncpa [#allocation8], 1 }
 0xb78   :  { %2801 = vsyncpa [#allocation11], 1 }
 0xb79   :  { %2802 = vsyncpa [#allocation9], 1 }
 0xb7a   :  { %2803 = vsyncpa [#allocation15], 1 }

</bundles_post_ra>
